<compile_context>
chip_gen: v5e
topology: v5e:2x2
jax: 0.10.0
libtpu: 0.0.40
codegen_flags: <defaults>
</compile_context>

<pallas_src>
import functools

import jax
import jax.numpy as jnp
import numpy as np
from jax.experimental import pallas as pl
from jax.experimental.pallas import tpu as pltpu


def _downsampler_kernel(w_ref, b_ref, xph_ref, out_ref, patch_ref, *,
                        Cin, Cc, th, Wo, n_row_tiles):
    """One (sample, row-tile) grid step: im2col -> MXU conv + fused 2x2 max pool.

    w_ref     : VMEM (Cc, 9*Cin) f32      conv weight, rows ordered (kh, kw, ci)
    b_ref     : VMEM (Cc, 1)     f32      conv bias
    xph_ref   : VMEM (1, 4*Cin, Hb, Wb)   phase-split padded input (f32 or bf16)
    out_ref   : VMEM (1, Ctot, th*Wo)     lane-dense output tile [conv | pool]
    patch_ref : VMEM (9*Cin, Wo) f32      per-row im2col scratch panel
    """
    Ctot = Cc + Cin

    if n_row_tiles == 1:
        row0 = 0                                           # fully static indexing
    else:
        row0 = pl.multiple_of(pl.program_id(1) * th, th)   # first output row of tile

    w = w_ref[...]                                         # hoisted once per step
    b = b_ref[...]

    for row in range(th):                                  # static unroll in the tile
        # ---- assemble the (9*Cin, Wo) im2col panel for output row row0+row ----
        # tap (kh, kw, ci) of output pixel (oh, ow) lives at phase plane
        # (kh%2)*2 + kw%2, block row oh + kh//2, block col ow + kw//2.
        for kh in range(3):
            ph, bh = kh % 2, kh // 2
            for kw in range(3):
                pw, bw = kw % 2, kw // 2
                c0 = (ph * 2 + pw) * Cin
                tap = xph_ref[0, c0:c0 + Cin, row0 + row + bh, bw:bw + Wo]
                patch_ref[(kh * 3 + kw) * Cin:(kh * 3 + kw + 1) * Cin, :] = (
                    tap.astype(jnp.float32))

        patches = patch_ref[...]                           # (9*Cin, Wo) f32

        # ---- conv: one MXU matmul, f32 accumulation, bias folded in once ----
        conv = jnp.dot(w, patches, preferred_element_type=jnp.float32) + b
        out_ref[0, 0:Cc, row * Wo:(row + 1) * Wo] = (
            jnp.tanh(conv).astype(out_ref.dtype))

        # ---- 2x2 stride-2 max pool: operands are the (kh,kw) in {1,2}^2 taps ----
        pool = jnp.maximum(
            jnp.maximum(patches[4 * Cin:5 * Cin, :], patches[5 * Cin:6 * Cin, :]),
            jnp.maximum(patches[7 * Cin:8 * Cin, :], patches[8 * Cin:9 * Cin, :]))
        out_ref[0, Cc:Ctot, row * Wo:(row + 1) * Wo] = (
            jnp.tanh(pool).astype(out_ref.dtype))


def _choose_row_tile(Ho, Wo, Cin, Cc, in_itemsize, out_itemsize,
                     budget_bytes, want_split, max_unroll=32):
    """Largest legal output-row tile that keeps blocks inside the VMEM budget."""
    Ctot = Cc + Cin
    Hb, Wb = Ho + 1, Wo + 1
    # Costs that do not depend on the tile height (input is not row-tiled yet).
    fixed = (2 * 4 * Cin * Hb * Wb * in_itemsize      # double-buffered input block
             + Cc * (9 * Cin + 1) * 4                 # weights + bias in VMEM
             + 9 * Cin * Wo * 4                       # im2col scratch panel
             + 4 * Ctot * Wo * 4)                     # per-row temporaries (generous)
    per_row_out = 2 * Ctot * Wo * out_itemsize        # double-buffered output rows

    def legal(th):
        # (8,128) rule: a partial last dim of the output block must be 128-aligned.
        return th == Ho or (th * Wo) % 128 == 0

    cands = [d for d in range(1, Ho + 1) if Ho % d == 0 and legal(d)]
    avail = max(budget_bytes - fixed, per_row_out)
    fit = [d for d in cands if d * per_row_out <= avail and d <= max_unroll]
    if not fit:
        fit = [min(cands)]
    th = max(fit)
    if want_split and th == Ho:                        # N == 1: give megacore >=2 steps
        smaller = [d for d in fit if d <= max(1, Ho // 2)]
        if smaller:
            th = max(smaller)
    return th


def _vmem_limit_bytes(est_bytes):
    """Generation-aware VMEM limit (v7x only has 64 MiB/TC) with a safe fallback."""
    try:
        cap = int(pltpu.get_tpu_info().vmem_capacity_bytes)
    except Exception:
        cap = 0
    if cap <= 0:
        cap = 64 * 2 ** 20                             # assume the smallest (v7x)
    want = max(2 * est_bytes, 32 * 2 ** 20)
    return int(min(want, int(cap * 0.75)))


def downsampler_block(x, weight, bias, *, input_dtype=None, row_tile=None,
                      vmem_block_budget_bytes=12 * 2 ** 20):
    """x: (N, Cin, H, W), weight: (Cc, Cin, 3, 3), bias: (Cc,). H, W even."""
    N, Cin, H, W = x.shape
    Cc = int(weight.shape[0])
    assert weight.shape == (Cc, Cin, 3, 3)
    assert bias.shape == (Cc,)
    assert Cc >= 1
    assert H % 2 == 0 and W % 2 == 0, "DownsamplerBlock needs even H and W"
    Ho, Wo = H // 2, W // 2
    Hb, Wb = Ho + 1, Wo + 1
    Ctot = Cc + Cin

    cdtype = jnp.dtype(input_dtype) if input_dtype is not None else jnp.dtype(x.dtype)
    odtype = jnp.dtype(x.dtype)

    # --- layout plumbing: pad by 1, split rows/cols into stride-2 phases ---
    # Channel block (ph*2+pw)*Cin : (..+1)*Cin holds the padded pixels whose
    # (row, col) parities are (ph, pw); every stride-2 conv tap and every pool
    # operand is then a static contiguous slice of this array.
    xp = jnp.pad(x, ((0, 0), (0, 0), (1, 1), (1, 1)))
    xph = (xp.reshape(N, Cin, Hb, 2, Wb, 2)
             .transpose(0, 3, 5, 1, 2, 4)              # (N, ph, pw, Cin, Hb, Wb)
             .reshape(N, 4 * Cin, Hb, Wb)
             .astype(cdtype))

    # conv weights -> (Cc, 9*Cin), rows ordered (kh, kw, ci); staged in VMEM (f32)
    w_mat = jnp.transpose(weight, (0, 2, 3, 1)).reshape(Cc, 9 * Cin).astype(jnp.float32)
    b_mat = bias.reshape(Cc, 1).astype(jnp.float32)

    if row_tile is None:
        th = _choose_row_tile(Ho, Wo, Cin, Cc, cdtype.itemsize, odtype.itemsize,
                              vmem_block_budget_bytes, want_split=(N == 1))
    else:
        th = int(row_tile)
        assert Ho % th == 0 and (th == Ho or (th * Wo) % 128 == 0)
    n_row_tiles = Ho // th

    est = (2 * 4 * Cin * Hb * Wb * cdtype.itemsize
           + 2 * Ctot * th * Wo * odtype.itemsize
           + Cc * (9 * Cin + 1) * 4
           + 9 * Cin * Wo * 4
           + 4 * Ctot * Wo * 4)
    vmem_limit = _vmem_limit_bytes(est)

    kernel = functools.partial(_downsampler_kernel, Cin=Cin, Cc=Cc, th=th, Wo=Wo,
                               n_row_tiles=n_row_tiles)

    out_flat = pl.pallas_call(
        kernel,
        out_shape=jax.ShapeDtypeStruct((N, Ctot, Ho * Wo), odtype),
        grid_spec=pltpu.PrefetchScalarGridSpec(
            num_scalar_prefetch=0,
            grid=(N, n_row_tiles),
            in_specs=[
                pl.BlockSpec((Cc, 9 * Cin), lambda n, r: (0, 0)),       # weights (VMEM)
                pl.BlockSpec((Cc, 1), lambda n, r: (0, 0)),             # bias    (VMEM)
                # Whole phase-split image of sample n; re-fetched only when n changes.
                pl.BlockSpec((1, 4 * Cin, Hb, Wb), lambda n, r: (n, 0, 0, 0)),
            ],
            # Lane-dense output tile: pixels of th output rows flattened onto lanes.
            out_specs=pl.BlockSpec((1, Ctot, th * Wo), lambda n, r: (n, 0, r)),
            scratch_shapes=[pltpu.VMEM((9 * Cin, Wo), jnp.float32)],    # im2col panel
        ),
        compiler_params=pltpu.CompilerParams(
            dimension_semantics=("parallel", "parallel"),
            vmem_limit_bytes=vmem_limit,
        ),
    )(w_mat, b_mat, xph)

    return out_flat.reshape(N, Ctot, Ho, Wo)


def _reference(x, weight, bias):
    conv = jax.lax.conv_general_dilated(
        x, weight, window_strides=(2, 2), padding=((1, 1), (1, 1)),
        dimension_numbers=("NCHW", "OIHW", "NCHW"),
        precision=jax.lax.Precision.HIGHEST)
    conv = conv + bias[None, :, None, None]
    pool = jax.lax.reduce_window(
        x, -jnp.inf, jax.lax.max,
        window_dimensions=(1, 1, 2, 2), window_strides=(1, 1, 2, 2),
        padding="VALID")
    return jnp.tanh(jnp.concatenate([conv, pool], axis=1))


if __name__ == "__main__":
    key = jax.random.PRNGKey(0)
    k1, k2, k3 = jax.random.split(key, 3)

    # Shapes consistent with the module: ninput=4, noutput=8.
    N, Cin, H, W = 2, 4, 16, 16
    noutput = 8
    Cc = noutput - Cin

    # Make inputs bf16-representable so both the f32 and bf16-feed paths can be
    # checked against the same HIGHEST-precision reference with a tight tolerance.
    def _bf16_exact(a):
        return a.astype(jnp.bfloat16).astype(jnp.float32)

    x = _bf16_exact(jax.random.normal(k1, (N, Cin, H, W), jnp.float32))
    weight = _bf16_exact(jax.random.normal(k2, (Cc, Cin, 3, 3), jnp.float32) * 0.1)
    bias = _bf16_exact(jax.random.normal(k3, (Cc,), jnp.float32) * 0.1)

    ref = _reference(x, weight, bias)

    out = jax.block_until_ready(downsampler_block(x, weight, bias))
    assert out.shape == (N, noutput, H // 2, W // 2)
    np.testing.assert_allclose(np.asarray(out), np.asarray(ref), atol=2e-4, rtol=2e-4)

    # bf16 feed of the phase-split input (halves its HBM traffic; f32 accumulation).
    out_bf16 = jax.block_until_ready(
        downsampler_block(x, weight, bias, input_dtype=jnp.bfloat16))
    np.testing.assert_allclose(np.asarray(out_bf16), np.asarray(ref),
                               atol=2e-4, rtol=2e-4)

    # ERFNet-style first block (ninput=3, noutput=16), N=1: exercises the row-tile
    # grid axis (2 parallel tiles -> both TCs on v7x) and odd channel counts.
    k4, k5, k6 = jax.random.split(jax.random.PRNGKey(1), 3)
    x2 = _bf16_exact(jax.random.normal(k4, (1, 3, 16, 64), jnp.float32))
    w2 = _bf16_exact(jax.random.normal(k5, (13, 3, 3, 3), jnp.float32) * 0.1)
    b2 = _bf16_exact(jax.random.normal(k6, (13,), jnp.float32) * 0.1)
    out2 = jax.block_until_ready(downsampler_block(x2, w2, b2))
    np.testing.assert_allclose(np.asarray(out2), np.asarray(_reference(x2, w2, b2)),
                               atol=2e-4, rtol=2e-4)

    print("KERNEL_OK")
</pallas_src>

<mosaic_0001>
module attributes {stable_mosaic.version = 11 : i64} {
  func.func @_downsampler_kernel(%arg0: i32, %arg1: i32, %arg2: memref<4x36xf32, #tpu.memory_space<vmem>>, %arg3: memref<4x1xf32, #tpu.memory_space<vmem>>, %arg4: memref<1x16x9x9xf32, #tpu.memory_space<vmem>>, %arg5: memref<1x8x64xf32, #tpu.memory_space<vmem>>, %arg6: memref<36x8xf32, #tpu.memory_space<vmem>>) attributes {dimension_semantics = [#tpu.dimension_semantics<parallel>, #tpu.dimension_semantics<parallel>], iteration_bounds = array<i64: 2, 1>, scalar_prefetch = 0 : i64, scratch_operands = 1 : i64, tpu.core_type = #tpu.core_type<tc>, window_params = [{pipeline_mode = #tpu.pipeline_mode<synchronous>, transform_indices = @transform_0, window_bounds = array<i64: 4, 36>}, {pipeline_mode = #tpu.pipeline_mode<synchronous>, transform_indices = @transform_1, window_bounds = array<i64: 4, 1>}, {transform_indices = @transform_2, window_bounds = array<i64: 1, 16, 9, 9>}, {transform_indices = @transform_3, window_bounds = array<i64: 1, 8, 64>}]} {
    %c0 = arith.constant 0 : index
    %c0_0 = arith.constant 0 : index
    %0 = vector.load %arg2[%c0, %c0_0] : memref<4x36xf32, #tpu.memory_space<vmem>>, vector<4x36xf32>
    %c0_1 = arith.constant 0 : index
    %c0_2 = arith.constant 0 : index
    %1 = vector.load %arg3[%c0_1, %c0_2] : memref<4x1xf32, #tpu.memory_space<vmem>>, vector<4x1xf32>
    %c0_3 = arith.constant 0 : index
    %c0_4 = arith.constant 0 : index
    %c0_5 = arith.constant 0 : index
    %c0_6 = arith.constant 0 : index
    %2 = vector.load %arg4[%c0_3, %c0_4, %c0_5, %c0_6] : memref<1x16x9x9xf32, #tpu.memory_space<vmem>>, vector<1x4x1x8xf32>
    %3 = vector.shape_cast %2 : vector<1x4x1x8xf32> to vector<4x8xf32>
    %c0_7 = arith.constant 0 : index
    %c0_8 = arith.constant 0 : index
    %4 = vector.load %arg6[%c0_7, %c0_8] : memref<36x8xf32, #tpu.memory_space<vmem>>, vector<4x8xf32>
    tpu.vector_store %arg6[%c0_7, %c0_8], %3 {strides = array<i32>} : memref<36x8xf32, #tpu.memory_space<vmem>>, vector<4x8xf32>,
    %c0_9 = arith.constant 0 : index
    %c4 = arith.constant 4 : index
    %c0_10 = arith.constant 0 : index
    %c0_11 = arith.constant 0 : index
    %5 = vector.load %arg4[%c0_9, %c4, %c0_10, %c0_11] : memref<1x16x9x9xf32, #tpu.memory_space<vmem>>, vector<1x4x1x8xf32>
    %6 = vector.shape_cast %5 : vector<1x4x1x8xf32> to vector<4x8xf32>
    %c4_12 = arith.constant 4 : index
    %c0_13 = arith.constant 0 : index
    %7 = vector.load %arg6[%c4_12, %c0_13] : memref<36x8xf32, #tpu.memory_space<vmem>>, vector<4x8xf32>
    tpu.vector_store %arg6[%c4_12, %c0_13], %6 {strides = array<i32>} : memref<36x8xf32, #tpu.memory_space<vmem>>, vector<4x8xf32>,
    %c0_14 = arith.constant 0 : index
    %c0_15 = arith.constant 0 : index
    %c0_16 = arith.constant 0 : index
    %c1 = arith.constant 1 : index
    %8 = vector.load %arg4[%c0_14, %c0_15, %c0_16, %c1] : memref<1x16x9x9xf32, #tpu.memory_space<vmem>>, vector<1x4x1x8xf32>
    %9 = vector.shape_cast %8 : vector<1x4x1x8xf32> to vector<4x8xf32>
    %c8 = arith.constant 8 : index
    %c0_17 = arith.constant 0 : index
    %10 = vector.load %arg6[%c8, %c0_17] : memref<36x8xf32, #tpu.memory_space<vmem>>, vector<4x8xf32>
    tpu.vector_store %arg6[%c8, %c0_17], %9 {strides = array<i32>} : memref<36x8xf32, #tpu.memory_space<vmem>>, vector<4x8xf32>,
    %c0_18 = arith.constant 0 : index
    %c8_19 = arith.constant 8 : index
    %c0_20 = arith.constant 0 : index
    %c0_21 = arith.constant 0 : index
    %11 = vector.load %arg4[%c0_18, %c8_19, %c0_20, %c0_21] : memref<1x16x9x9xf32, #tpu.memory_space<vmem>>, vector<1x4x1x8xf32>
    %12 = vector.shape_cast %11 : vector<1x4x1x8xf32> to vector<4x8xf32>
    %c12 = arith.constant 12 : index
    %c0_22 = arith.constant 0 : index
    %13 = vector.load %arg6[%c12, %c0_22] : memref<36x8xf32, #tpu.memory_space<vmem>>, vector<4x8xf32>
    tpu.vector_store %arg6[%c12, %c0_22], %12 {strides = array<i32>} : memref<36x8xf32, #tpu.memory_space<vmem>>, vector<4x8xf32>,
    %c0_23 = arith.constant 0 : index
    %c12_24 = arith.constant 12 : index
    %c0_25 = arith.constant 0 : index
    %c0_26 = arith.constant 0 : index
    %14 = vector.load %arg4[%c0_23, %c12_24, %c0_25, %c0_26] : memref<1x16x9x9xf32, #tpu.memory_space<vmem>>, vector<1x4x1x8xf32>
    %15 = vector.shape_cast %14 : vector<1x4x1x8xf32> to vector<4x8xf32>
    %c16 = arith.constant 16 : index
    %c0_27 = arith.constant 0 : index
    %16 = vector.load %arg6[%c16, %c0_27] : memref<36x8xf32, #tpu.memory_space<vmem>>, vector<4x8xf32>
    tpu.vector_store %arg6[%c16, %c0_27], %15 {strides = array<i32>} : memref<36x8xf32, #tpu.memory_space<vmem>>, vector<4x8xf32>,
    %c0_28 = arith.constant 0 : index
    %c8_29 = arith.constant 8 : index
    %c0_30 = arith.constant 0 : index
    %c1_31 = arith.constant 1 : index
    %17 = vector.load %arg4[%c0_28, %c8_29, %c0_30, %c1_31] : memref<1x16x9x9xf32, #tpu.memory_space<vmem>>, vector<1x4x1x8xf32>
    %18 = vector.shape_cast %17 : vector<1x4x1x8xf32> to vector<4x8xf32>
    %c20 = arith.constant 20 : index
    %c0_32 = arith.constant 0 : index
    %19 = vector.load %arg6[%c20, %c0_32] : memref<36x8xf32, #tpu.memory_space<vmem>>, vector<4x8xf32>
    tpu.vector_store %arg6[%c20, %c0_32], %18 {strides = array<i32>} : memref<36x8xf32, #tpu.memory_space<vmem>>, vector<4x8xf32>,
    %c0_33 = arith.constant 0 : index
    %c0_34 = arith.constant 0 : index
    %c1_35 = arith.constant 1 : index
    %c0_36 = arith.constant 0 : index
    %20 = vector.load %arg4[%c0_33, %c0_34, %c1_35, %c0_36] : memref<1x16x9x9xf32, #tpu.memory_space<vmem>>, vector<1x4x1x8xf32>
    %21 = vector.shape_cast %20 : vector<1x4x1x8xf32> to vector<4x8xf32>
    %c24 = arith.constant 24 : index
    %c0_37 = arith.constant 0 : index
    %22 = vector.load %arg6[%c24, %c0_37] : memref<36x8xf32, #tpu.memory_space<vmem>>, vector<4x8xf32>
    tpu.vector_store %arg6[%c24, %c0_37], %21 {strides = array<i32>} : memref<36x8xf32, #tpu.memory_space<vmem>>, vector<4x8xf32>,
    %c0_38 = arith.constant 0 : index
    %c4_39 = arith.constant 4 : index
    %c1_40 = arith.constant 1 : index
    %c0_41 = arith.constant 0 : index
    %23 = vector.load %arg4[%c0_38, %c4_39, %c1_40, %c0_41] : memref<1x16x9x9xf32, #tpu.memory_space<vmem>>, vector<1x4x1x8xf32>
    %24 = vector.shape_cast %23 : vector<1x4x1x8xf32> to vector<4x8xf32>
    %c28 = arith.constant 28 : index
    %c0_42 = arith.constant 0 : index
    %25 = vector.load %arg6[%c28, %c0_42] : memref<36x8xf32, #tpu.memory_space<vmem>>, vector<4x8xf32>
    tpu.vector_store %arg6[%c28, %c0_42], %24 {strides = array<i32>} : memref<36x8xf32, #tpu.memory_space<vmem>>, vector<4x8xf32>,
    %c0_43 = arith.constant 0 : index
    %c0_44 = arith.constant 0 : index
    %c1_45 = arith.constant 1 : index
    %c1_46 = arith.constant 1 : index
    %26 = vector.load %arg4[%c0_43, %c0_44, %c1_45, %c1_46] : memref<1x16x9x9xf32, #tpu.memory_space<vmem>>, vector<1x4x1x8xf32>
    %27 = vector.shape_cast %26 : vector<1x4x1x8xf32> to vector<4x8xf32>
    %c32 = arith.constant 32 : index
    %c0_47 = arith.constant 0 : index
    %28 = vector.load %arg6[%c32, %c0_47] : memref<36x8xf32, #tpu.memory_space<vmem>>, vector<4x8xf32>
    tpu.vector_store %arg6[%c32, %c0_47], %27 {strides = array<i32>} : memref<36x8xf32, #tpu.memory_space<vmem>>, vector<4x8xf32>,
    %c0_48 = arith.constant 0 : index
    %c0_49 = arith.constant 0 : index
    %29 = vector.load %arg6[%c0_48, %c0_49] : memref<36x8xf32, #tpu.memory_space<vmem>>, vector<36x8xf32>
    %cst = arith.constant dense<0.000000e+00> : vector<4x8xf32>
    %30 = tpu.matmul %0, %29, %cst {dimension_numbers = #tpu.dot_dimension_numbers<[1], [0], [0], [1], [0, 0, 1, 1], [], []>} : vector<4x36xf32>, vector<36x8xf32>, vector<4x8xf32> -> vector<4x8xf32>
    %31 = vector.broadcast %1 : vector<4x1xf32> to vector<4x8xf32>
    %32 = arith.addf %30, %31 : vector<4x8xf32>
    %33 = math.tanh %32 : vector<4x8xf32>
    %c0_50 = arith.constant 0 : index
    %c0_51 = arith.constant 0 : index
    %c0_52 = arith.constant 0 : index
    %34 = vector.load %arg5[%c0_50, %c0_51, %c0_52] : memref<1x8x64xf32, #tpu.memory_space<vmem>>, vector<1x4x8xf32>
    %35 = vector.shape_cast %34 : vector<1x4x8xf32> to vector<4x8xf32>
    %36 = vector.shape_cast %33 : vector<4x8xf32> to vector<1x4x8xf32>
    tpu.vector_store %arg5[%c0_50, %c0_51, %c0_52], %36 {strides = array<i32>} : memref<1x8x64xf32, #tpu.memory_space<vmem>>, vector<1x4x8xf32>,
    %37 = vector.extract_strided_slice %29 {offsets = [16, 0], sizes = [4, 8], strides = [1, 1]} : vector<36x8xf32> to vector<4x8xf32>
    %38 = vector.extract_strided_slice %29 {offsets = [20, 0], sizes = [4, 8], strides = [1, 1]} : vector<36x8xf32> to vector<4x8xf32>
    %39 = arith.maximumf %37, %38 : vector<4x8xf32>
    %40 = vector.extract_strided_slice %29 {offsets = [28, 0], sizes = [4, 8], strides = [1, 1]} : vector<36x8xf32> to vector<4x8xf32>
    %41 = vector.extract_strided_slice %29 {offsets = [32, 0], sizes = [4, 8], strides = [1, 1]} : vector<36x8xf32> to vector<4x8xf32>
    %42 = arith.maximumf %40, %41 : vector<4x8xf32>
    %43 = arith.maximumf %39, %42 : vector<4x8xf32>
    %44 = math.tanh %43 : vector<4x8xf32>
    %c0_53 = arith.constant 0 : index
    %c4_54 = arith.constant 4 : index
    %c0_55 = arith.constant 0 : index
    %45 = vector.load %arg5[%c0_53, %c4_54, %c0_55] : memref<1x8x64xf32, #tpu.memory_space<vmem>>, vector<1x4x8xf32>
    %46 = vector.shape_cast %45 : vector<1x4x8xf32> to vector<4x8xf32>
    %47 = vector.shape_cast %44 : vector<4x8xf32> to vector<1x4x8xf32>
    tpu.vector_store %arg5[%c0_53, %c4_54, %c0_55], %47 {strides = array<i32>} : memref<1x8x64xf32, #tpu.memory_space<vmem>>, vector<1x4x8xf32>,
    %c0_56 = arith.constant 0 : index
    %c0_57 = arith.constant 0 : index
    %c1_58 = arith.constant 1 : index
    %c0_59 = arith.constant 0 : index
    %48 = vector.load %arg4[%c0_56, %c0_57, %c1_58, %c0_59] : memref<1x16x9x9xf32, #tpu.memory_space<vmem>>, vector<1x4x1x8xf32>
    %49 = vector.shape_cast %48 : vector<1x4x1x8xf32> to vector<4x8xf32>
    %c0_60 = arith.constant 0 : index
    %c0_61 = arith.constant 0 : index
    %50 = vector.load %arg6[%c0_60, %c0_61] : memref<36x8xf32, #tpu.memory_space<vmem>>, vector<4x8xf32>
    tpu.vector_store %arg6[%c0_60, %c0_61], %49 {strides = array<i32>} : memref<36x8xf32, #tpu.memory_space<vmem>>, vector<4x8xf32>,
    %c0_62 = arith.constant 0 : index
    %c4_63 = arith.constant 4 : index
    %c1_64 = arith.constant 1 : index
    %c0_65 = arith.constant 0 : index
    %51 = vector.load %arg4[%c0_62, %c4_63, %c1_64, %c0_65] : memref<1x16x9x9xf32, #tpu.memory_space<vmem>>, vector<1x4x1x8xf32>
    %52 = vector.shape_cast %51 : vector<1x4x1x8xf32> to vector<4x8xf32>
    %c4_66 = arith.constant 4 : index
    %c0_67 = arith.constant 0 : index
    %53 = vector.load %arg6[%c4_66, %c0_67] : memref<36x8xf32, #tpu.memory_space<vmem>>, vector<4x8xf32>
    tpu.vector_store %arg6[%c4_66, %c0_67], %52 {strides = array<i32>} : memref<36x8xf32, #tpu.memory_space<vmem>>, vector<4x8xf32>,
    %c0_68 = arith.constant 0 : index
    %c0_69 = arith.constant 0 : index
    %c1_70 = arith.constant 1 : index
    %c1_71 = arith.constant 1 : index
    %54 = vector.load %arg4[%c0_68, %c0_69, %c1_70, %c1_71] : memref<1x16x9x9xf32, #tpu.memory_space<vmem>>, vector<1x4x1x8xf32>
    %55 = vector.shape_cast %54 : vector<1x4x1x8xf32> to vector<4x8xf32>
    %c8_72 = arith.constant 8 : index
    %c0_73 = arith.constant 0 : index
    %56 = vector.load %arg6[%c8_72, %c0_73] : memref<36x8xf32, #tpu.memory_space<vmem>>, vector<4x8xf32>
    tpu.vector_store %arg6[%c8_72, %c0_73], %55 {strides = array<i32>} : memref<36x8xf32, #tpu.memory_space<vmem>>, vector<4x8xf32>,
    %c0_74 = arith.constant 0 : index
    %c8_75 = arith.constant 8 : index
    %c1_76 = arith.constant 1 : index
    %c0_77 = arith.constant 0 : index
    %57 = vector.load %arg4[%c0_74, %c8_75, %c1_76, %c0_77] : memref<1x16x9x9xf32, #tpu.memory_space<vmem>>, vector<1x4x1x8xf32>
    %58 = vector.shape_cast %57 : vector<1x4x1x8xf32> to vector<4x8xf32>
    %c12_78 = arith.constant 12 : index
    %c0_79 = arith.constant 0 : index
    %59 = vector.load %arg6[%c12_78, %c0_79] : memref<36x8xf32, #tpu.memory_space<vmem>>, vector<4x8xf32>
    tpu.vector_store %arg6[%c12_78, %c0_79], %58 {strides = array<i32>} : memref<36x8xf32, #tpu.memory_space<vmem>>, vector<4x8xf32>,
    %c0_80 = arith.constant 0 : index
    %c12_81 = arith.constant 12 : index
    %c1_82 = arith.constant 1 : index
    %c0_83 = arith.constant 0 : index
    %60 = vector.load %arg4[%c0_80, %c12_81, %c1_82, %c0_83] : memref<1x16x9x9xf32, #tpu.memory_space<vmem>>, vector<1x4x1x8xf32>
    %61 = vector.shape_cast %60 : vector<1x4x1x8xf32> to vector<4x8xf32>
    %c16_84 = arith.constant 16 : index
    %c0_85 = arith.constant 0 : index
    %62 = vector.load %arg6[%c16_84, %c0_85] : memref<36x8xf32, #tpu.memory_space<vmem>>, vector<4x8xf32>
    tpu.vector_store %arg6[%c16_84, %c0_85], %61 {strides = array<i32>} : memref<36x8xf32, #tpu.memory_space<vmem>>, vector<4x8xf32>,
    %c0_86 = arith.constant 0 : index
    %c8_87 = arith.constant 8 : index
    %c1_88 = arith.constant 1 : index
    %c1_89 = arith.constant 1 : index
    %63 = vector.load %arg4[%c0_86, %c8_87, %c1_88, %c1_89] : memref<1x16x9x9xf32, #tpu.memory_space<vmem>>, vector<1x4x1x8xf32>
    %64 = vector.shape_cast %63 : vector<1x4x1x8xf32> to vector<4x8xf32>
    %c20_90 = arith.constant 20 : index
    %c0_91 = arith.constant 0 : index
    %65 = vector.load %arg6[%c20_90, %c0_91] : memref<36x8xf32, #tpu.memory_space<vmem>>, vector<4x8xf32>
    tpu.vector_store %arg6[%c20_90, %c0_91], %64 {strides = array<i32>} : memref<36x8xf32, #tpu.memory_space<vmem>>, vector<4x8xf32>,
    %c0_92 = arith.constant 0 : index
    %c0_93 = arith.constant 0 : index
    %c2 = arith.constant 2 : index
    %c0_94 = arith.constant 0 : index
    %66 = vector.load %arg4[%c0_92, %c0_93, %c2, %c0_94] : memref<1x16x9x9xf32, #tpu.memory_space<vmem>>, vector<1x4x1x8xf32>
    %67 = vector.shape_cast %66 : vector<1x4x1x8xf32> to vector<4x8xf32>
    %c24_95 = arith.constant 24 : index
    %c0_96 = arith.constant 0 : index
    %68 = vector.load %arg6[%c24_95, %c0_96] : memref<36x8xf32, #tpu.memory_space<vmem>>, vector<4x8xf32>
    tpu.vector_store %arg6[%c24_95, %c0_96], %67 {strides = array<i32>} : memref<36x8xf32, #tpu.memory_space<vmem>>, vector<4x8xf32>,
    %c0_97 = arith.constant 0 : index
    %c4_98 = arith.constant 4 : index
    %c2_99 = arith.constant 2 : index
    %c0_100 = arith.constant 0 : index
    %69 = vector.load %arg4[%c0_97, %c4_98, %c2_99, %c0_100] : memref<1x16x9x9xf32, #tpu.memory_space<vmem>>, vector<1x4x1x8xf32>
    %70 = vector.shape_cast %69 : vector<1x4x1x8xf32> to vector<4x8xf32>
    %c28_101 = arith.constant 28 : index
    %c0_102 = arith.constant 0 : index
    %71 = vector.load %arg6[%c28_101, %c0_102] : memref<36x8xf32, #tpu.memory_space<vmem>>, vector<4x8xf32>
    tpu.vector_store %arg6[%c28_101, %c0_102], %70 {strides = array<i32>} : memref<36x8xf32, #tpu.memory_space<vmem>>, vector<4x8xf32>,
    %c0_103 = arith.constant 0 : index
    %c0_104 = arith.constant 0 : index
    %c2_105 = arith.constant 2 : index
    %c1_106 = arith.constant 1 : index
    %72 = vector.load %arg4[%c0_103, %c0_104, %c2_105, %c1_106] : memref<1x16x9x9xf32, #tpu.memory_space<vmem>>, vector<1x4x1x8xf32>
    %73 = vector.shape_cast %72 : vector<1x4x1x8xf32> to vector<4x8xf32>
    %c32_107 = arith.constant 32 : index
    %c0_108 = arith.constant 0 : index
    %74 = vector.load %arg6[%c32_107, %c0_108] : memref<36x8xf32, #tpu.memory_space<vmem>>, vector<4x8xf32>
    tpu.vector_store %arg6[%c32_107, %c0_108], %73 {strides = array<i32>} : memref<36x8xf32, #tpu.memory_space<vmem>>, vector<4x8xf32>,
    %c0_109 = arith.constant 0 : index
    %c0_110 = arith.constant 0 : index
    %75 = vector.load %arg6[%c0_109, %c0_110] : memref<36x8xf32, #tpu.memory_space<vmem>>, vector<36x8xf32>
    %cst_111 = arith.constant dense<0.000000e+00> : vector<4x8xf32>
    %76 = tpu.matmul %0, %75, %cst_111 {dimension_numbers = #tpu.dot_dimension_numbers<[1], [0], [0], [1], [0, 0, 1, 1], [], []>} : vector<4x36xf32>, vector<36x8xf32>, vector<4x8xf32> -> vector<4x8xf32>
    %77 = vector.broadcast %1 : vector<4x1xf32> to vector<4x8xf32>
    %78 = arith.addf %76, %77 : vector<4x8xf32>
    %79 = math.tanh %78 : vector<4x8xf32>
    %c0_112 = arith.constant 0 : index
    %c0_113 = arith.constant 0 : index
    %c8_114 = arith.constant 8 : index
    %80 = vector.load %arg5[%c0_112, %c0_113, %c8_114] : memref<1x8x64xf32, #tpu.memory_space<vmem>>, vector<1x4x8xf32>
    %81 = vector.shape_cast %80 : vector<1x4x8xf32> to vector<4x8xf32>
    %82 = vector.shape_cast %79 : vector<4x8xf32> to vector<1x4x8xf32>
    tpu.vector_store %arg5[%c0_112, %c0_113, %c8_114], %82 {strides = array<i32>} : memref<1x8x64xf32, #tpu.memory_space<vmem>>, vector<1x4x8xf32>,
    %83 = vector.extract_strided_slice %75 {offsets = [16, 0], sizes = [4, 8], strides = [1, 1]} : vector<36x8xf32> to vector<4x8xf32>
    %84 = vector.extract_strided_slice %75 {offsets = [20, 0], sizes = [4, 8], strides = [1, 1]} : vector<36x8xf32> to vector<4x8xf32>
    %85 = arith.maximumf %83, %84 : vector<4x8xf32>
    %86 = vector.extract_strided_slice %75 {offsets = [28, 0], sizes = [4, 8], strides = [1, 1]} : vector<36x8xf32> to vector<4x8xf32>
    %87 = vector.extract_strided_slice %75 {offsets = [32, 0], sizes = [4, 8], strides = [1, 1]} : vector<36x8xf32> to vector<4x8xf32>
    %88 = arith.maximumf %86, %87 : vector<4x8xf32>
    %89 = arith.maximumf %85, %88 : vector<4x8xf32>
    %90 = math.tanh %89 : vector<4x8xf32>
    %c0_115 = arith.constant 0 : index
    %c4_116 = arith.constant 4 : index
    %c8_117 = arith.constant 8 : index
    %91 = vector.load %arg5[%c0_115, %c4_116, %c8_117] : memref<1x8x64xf32, #tpu.memory_space<vmem>>, vector<1x4x8xf32>
    %92 = vector.shape_cast %91 : vector<1x4x8xf32> to vector<4x8xf32>
    %93 = vector.shape_cast %90 : vector<4x8xf32> to vector<1x4x8xf32>
    tpu.vector_store %arg5[%c0_115, %c4_116, %c8_117], %93 {strides = array<i32>} : memref<1x8x64xf32, #tpu.memory_space<vmem>>, vector<1x4x8xf32>,
    %c0_118 = arith.constant 0 : index
    %c0_119 = arith.constant 0 : index
    %c2_120 = arith.constant 2 : index
    %c0_121 = arith.constant 0 : index
    %94 = vector.load %arg4[%c0_118, %c0_119, %c2_120, %c0_121] : memref<1x16x9x9xf32, #tpu.memory_space<vmem>>, vector<1x4x1x8xf32>
    %95 = vector.shape_cast %94 : vector<1x4x1x8xf32> to vector<4x8xf32>
    %c0_122 = arith.constant 0 : index
    %c0_123 = arith.constant 0 : index
    %96 = vector.load %arg6[%c0_122, %c0_123] : memref<36x8xf32, #tpu.memory_space<vmem>>, vector<4x8xf32>
    tpu.vector_store %arg6[%c0_122, %c0_123], %95 {strides = array<i32>} : memref<36x8xf32, #tpu.memory_space<vmem>>, vector<4x8xf32>,
    %c0_124 = arith.constant 0 : index
    %c4_125 = arith.constant 4 : index
    %c2_126 = arith.constant 2 : index
    %c0_127 = arith.constant 0 : index
    %97 = vector.load %arg4[%c0_124, %c4_125, %c2_126, %c0_127] : memref<1x16x9x9xf32, #tpu.memory_space<vmem>>, vector<1x4x1x8xf32>
    %98 = vector.shape_cast %97 : vector<1x4x1x8xf32> to vector<4x8xf32>
    %c4_128 = arith.constant 4 : index
    %c0_129 = arith.constant 0 : index
    %99 = vector.load %arg6[%c4_128, %c0_129] : memref<36x8xf32, #tpu.memory_space<vmem>>, vector<4x8xf32>
    tpu.vector_store %arg6[%c4_128, %c0_129], %98 {strides = array<i32>} : memref<36x8xf32, #tpu.memory_space<vmem>>, vector<4x8xf32>,
    %c0_130 = arith.constant 0 : index
    %c0_131 = arith.constant 0 : index
    %c2_132 = arith.constant 2 : index
    %c1_133 = arith.constant 1 : index
    %100 = vector.load %arg4[%c0_130, %c0_131, %c2_132, %c1_133] : memref<1x16x9x9xf32, #tpu.memory_space<vmem>>, vector<1x4x1x8xf32>
    %101 = vector.shape_cast %100 : vector<1x4x1x8xf32> to vector<4x8xf32>
    %c8_134 = arith.constant 8 : index
    %c0_135 = arith.constant 0 : index
    %102 = vector.load %arg6[%c8_134, %c0_135] : memref<36x8xf32, #tpu.memory_space<vmem>>, vector<4x8xf32>
    tpu.vector_store %arg6[%c8_134, %c0_135], %101 {strides = array<i32>} : memref<36x8xf32, #tpu.memory_space<vmem>>, vector<4x8xf32>,
    %c0_136 = arith.constant 0 : index
    %c8_137 = arith.constant 8 : index
    %c2_138 = arith.constant 2 : index
    %c0_139 = arith.constant 0 : index
    %103 = vector.load %arg4[%c0_136, %c8_137, %c2_138, %c0_139] : memref<1x16x9x9xf32, #tpu.memory_space<vmem>>, vector<1x4x1x8xf32>
    %104 = vector.shape_cast %103 : vector<1x4x1x8xf32> to vector<4x8xf32>
    %c12_140 = arith.constant 12 : index
    %c0_141 = arith.constant 0 : index
    %105 = vector.load %arg6[%c12_140, %c0_141] : memref<36x8xf32, #tpu.memory_space<vmem>>, vector<4x8xf32>
    tpu.vector_store %arg6[%c12_140, %c0_141], %104 {strides = array<i32>} : memref<36x8xf32, #tpu.memory_space<vmem>>, vector<4x8xf32>,
    %c0_142 = arith.constant 0 : index
    %c12_143 = arith.constant 12 : index
    %c2_144 = arith.constant 2 : index
    %c0_145 = arith.constant 0 : index
    %106 = vector.load %arg4[%c0_142, %c12_143, %c2_144, %c0_145] : memref<1x16x9x9xf32, #tpu.memory_space<vmem>>, vector<1x4x1x8xf32>
    %107 = vector.shape_cast %106 : vector<1x4x1x8xf32> to vector<4x8xf32>
    %c16_146 = arith.constant 16 : index
    %c0_147 = arith.constant 0 : index
    %108 = vector.load %arg6[%c16_146, %c0_147] : memref<36x8xf32, #tpu.memory_space<vmem>>, vector<4x8xf32>
    tpu.vector_store %arg6[%c16_146, %c0_147], %107 {strides = array<i32>} : memref<36x8xf32, #tpu.memory_space<vmem>>, vector<4x8xf32>,
    %c0_148 = arith.constant 0 : index
    %c8_149 = arith.constant 8 : index
    %c2_150 = arith.constant 2 : index
    %c1_151 = arith.constant 1 : index
    %109 = vector.load %arg4[%c0_148, %c8_149, %c2_150, %c1_151] : memref<1x16x9x9xf32, #tpu.memory_space<vmem>>, vector<1x4x1x8xf32>
    %110 = vector.shape_cast %109 : vector<1x4x1x8xf32> to vector<4x8xf32>
    %c20_152 = arith.constant 20 : index
    %c0_153 = arith.constant 0 : index
    %111 = vector.load %arg6[%c20_152, %c0_153] : memref<36x8xf32, #tpu.memory_space<vmem>>, vector<4x8xf32>
    tpu.vector_store %arg6[%c20_152, %c0_153], %110 {strides = array<i32>} : memref<36x8xf32, #tpu.memory_space<vmem>>, vector<4x8xf32>,
    %c0_154 = arith.constant 0 : index
    %c0_155 = arith.constant 0 : index
    %c3 = arith.constant 3 : index
    %c0_156 = arith.constant 0 : index
    %112 = vector.load %arg4[%c0_154, %c0_155, %c3, %c0_156] : memref<1x16x9x9xf32, #tpu.memory_space<vmem>>, vector<1x4x1x8xf32>
    %113 = vector.shape_cast %112 : vector<1x4x1x8xf32> to vector<4x8xf32>
    %c24_157 = arith.constant 24 : index
    %c0_158 = arith.constant 0 : index
    %114 = vector.load %arg6[%c24_157, %c0_158] : memref<36x8xf32, #tpu.memory_space<vmem>>, vector<4x8xf32>
    tpu.vector_store %arg6[%c24_157, %c0_158], %113 {strides = array<i32>} : memref<36x8xf32, #tpu.memory_space<vmem>>, vector<4x8xf32>,
    %c0_159 = arith.constant 0 : index
    %c4_160 = arith.constant 4 : index
    %c3_161 = arith.constant 3 : index
    %c0_162 = arith.constant 0 : index
    %115 = vector.load %arg4[%c0_159, %c4_160, %c3_161, %c0_162] : memref<1x16x9x9xf32, #tpu.memory_space<vmem>>, vector<1x4x1x8xf32>
    %116 = vector.shape_cast %115 : vector<1x4x1x8xf32> to vector<4x8xf32>
    %c28_163 = arith.constant 28 : index
    %c0_164 = arith.constant 0 : index
    %117 = vector.load %arg6[%c28_163, %c0_164] : memref<36x8xf32, #tpu.memory_space<vmem>>, vector<4x8xf32>
    tpu.vector_store %arg6[%c28_163, %c0_164], %116 {strides = array<i32>} : memref<36x8xf32, #tpu.memory_space<vmem>>, vector<4x8xf32>,
    %c0_165 = arith.constant 0 : index
    %c0_166 = arith.constant 0 : index
    %c3_167 = arith.constant 3 : index
    %c1_168 = arith.constant 1 : index
    %118 = vector.load %arg4[%c0_165, %c0_166, %c3_167, %c1_168] : memref<1x16x9x9xf32, #tpu.memory_space<vmem>>, vector<1x4x1x8xf32>
    %119 = vector.shape_cast %118 : vector<1x4x1x8xf32> to vector<4x8xf32>
    %c32_169 = arith.constant 32 : index
    %c0_170 = arith.constant 0 : index
    %120 = vector.load %arg6[%c32_169, %c0_170] : memref<36x8xf32, #tpu.memory_space<vmem>>, vector<4x8xf32>
    tpu.vector_store %arg6[%c32_169, %c0_170], %119 {strides = array<i32>} : memref<36x8xf32, #tpu.memory_space<vmem>>, vector<4x8xf32>,
    %c0_171 = arith.constant 0 : index
    %c0_172 = arith.constant 0 : index
    %121 = vector.load %arg6[%c0_171, %c0_172] : memref<36x8xf32, #tpu.memory_space<vmem>>, vector<36x8xf32>
    %cst_173 = arith.constant dense<0.000000e+00> : vector<4x8xf32>
    %122 = tpu.matmul %0, %121, %cst_173 {dimension_numbers = #tpu.dot_dimension_numbers<[1], [0], [0], [1], [0, 0, 1, 1], [], []>} : vector<4x36xf32>, vector<36x8xf32>, vector<4x8xf32> -> vector<4x8xf32>
    %123 = vector.broadcast %1 : vector<4x1xf32> to vector<4x8xf32>
    %124 = arith.addf %122, %123 : vector<4x8xf32>
    %125 = math.tanh %124 : vector<4x8xf32>
    %c0_174 = arith.constant 0 : index
    %c0_175 = arith.constant 0 : index
    %c16_176 = arith.constant 16 : index
    %126 = vector.load %arg5[%c0_174, %c0_175, %c16_176] : memref<1x8x64xf32, #tpu.memory_space<vmem>>, vector<1x4x8xf32>
    %127 = vector.shape_cast %126 : vector<1x4x8xf32> to vector<4x8xf32>
    %128 = vector.shape_cast %125 : vector<4x8xf32> to vector<1x4x8xf32>
    tpu.vector_store %arg5[%c0_174, %c0_175, %c16_176], %128 {strides = array<i32>} : memref<1x8x64xf32, #tpu.memory_space<vmem>>, vector<1x4x8xf32>,
    %129 = vector.extract_strided_slice %121 {offsets = [16, 0], sizes = [4, 8], strides = [1, 1]} : vector<36x8xf32> to vector<4x8xf32>
    %130 = vector.extract_strided_slice %121 {offsets = [20, 0], sizes = [4, 8], strides = [1, 1]} : vector<36x8xf32> to vector<4x8xf32>
    %131 = arith.maximumf %129, %130 : vector<4x8xf32>
    %132 = vector.extract_strided_slice %121 {offsets = [28, 0], sizes = [4, 8], strides = [1, 1]} : vector<36x8xf32> to vector<4x8xf32>
    %133 = vector.extract_strided_slice %121 {offsets = [32, 0], sizes = [4, 8], strides = [1, 1]} : vector<36x8xf32> to vector<4x8xf32>
    %134 = arith.maximumf %132, %133 : vector<4x8xf32>
    %135 = arith.maximumf %131, %134 : vector<4x8xf32>
    %136 = math.tanh %135 : vector<4x8xf32>
    %c0_177 = arith.constant 0 : index
    %c4_178 = arith.constant 4 : index
    %c16_179 = arith.constant 16 : index
    %137 = vector.load %arg5[%c0_177, %c4_178, %c16_179] : memref<1x8x64xf32, #tpu.memory_space<vmem>>, vector<1x4x8xf32>
    %138 = vector.shape_cast %137 : vector<1x4x8xf32> to vector<4x8xf32>
    %139 = vector.shape_cast %136 : vector<4x8xf32> to vector<1x4x8xf32>
    tpu.vector_store %arg5[%c0_177, %c4_178, %c16_179], %139 {strides = array<i32>} : memref<1x8x64xf32, #tpu.memory_space<vmem>>, vector<1x4x8xf32>,
    %c0_180 = arith.constant 0 : index
    %c0_181 = arith.constant 0 : index
    %c3_182 = arith.constant 3 : index
    %c0_183 = arith.constant 0 : index
    %140 = vector.load %arg4[%c0_180, %c0_181, %c3_182, %c0_183] : memref<1x16x9x9xf32, #tpu.memory_space<vmem>>, vector<1x4x1x8xf32>
    %141 = vector.shape_cast %140 : vector<1x4x1x8xf32> to vector<4x8xf32>
    %c0_184 = arith.constant 0 : index
    %c0_185 = arith.constant 0 : index
    %142 = vector.load %arg6[%c0_184, %c0_185] : memref<36x8xf32, #tpu.memory_space<vmem>>, vector<4x8xf32>
    tpu.vector_store %arg6[%c0_184, %c0_185], %141 {strides = array<i32>} : memref<36x8xf32, #tpu.memory_space<vmem>>, vector<4x8xf32>,
    %c0_186 = arith.constant 0 : index
    %c4_187 = arith.constant 4 : index
    %c3_188 = arith.constant 3 : index
    %c0_189 = arith.constant 0 : index
    %143 = vector.load %arg4[%c0_186, %c4_187, %c3_188, %c0_189] : memref<1x16x9x9xf32, #tpu.memory_space<vmem>>, vector<1x4x1x8xf32>
    %144 = vector.shape_cast %143 : vector<1x4x1x8xf32> to vector<4x8xf32>
    %c4_190 = arith.constant 4 : index
    %c0_191 = arith.constant 0 : index
    %145 = vector.load %arg6[%c4_190, %c0_191] : memref<36x8xf32, #tpu.memory_space<vmem>>, vector<4x8xf32>
    tpu.vector_store %arg6[%c4_190, %c0_191], %144 {strides = array<i32>} : memref<36x8xf32, #tpu.memory_space<vmem>>, vector<4x8xf32>,
    %c0_192 = arith.constant 0 : index
    %c0_193 = arith.constant 0 : index
    %c3_194 = arith.constant 3 : index
    %c1_195 = arith.constant 1 : index
    %146 = vector.load %arg4[%c0_192, %c0_193, %c3_194, %c1_195] : memref<1x16x9x9xf32, #tpu.memory_space<vmem>>, vector<1x4x1x8xf32>
    %147 = vector.shape_cast %146 : vector<1x4x1x8xf32> to vector<4x8xf32>
    %c8_196 = arith.constant 8 : index
    %c0_197 = arith.constant 0 : index
    %148 = vector.load %arg6[%c8_196, %c0_197] : memref<36x8xf32, #tpu.memory_space<vmem>>, vector<4x8xf32>
    tpu.vector_store %arg6[%c8_196, %c0_197], %147 {strides = array<i32>} : memref<36x8xf32, #tpu.memory_space<vmem>>, vector<4x8xf32>,
    %c0_198 = arith.constant 0 : index
    %c8_199 = arith.constant 8 : index
    %c3_200 = arith.constant 3 : index
    %c0_201 = arith.constant 0 : index
    %149 = vector.load %arg4[%c0_198, %c8_199, %c3_200, %c0_201] : memref<1x16x9x9xf32, #tpu.memory_space<vmem>>, vector<1x4x1x8xf32>
    %150 = vector.shape_cast %149 : vector<1x4x1x8xf32> to vector<4x8xf32>
    %c12_202 = arith.constant 12 : index
    %c0_203 = arith.constant 0 : index
    %151 = vector.load %arg6[%c12_202, %c0_203] : memref<36x8xf32, #tpu.memory_space<vmem>>, vector<4x8xf32>
    tpu.vector_store %arg6[%c12_202, %c0_203], %150 {strides = array<i32>} : memref<36x8xf32, #tpu.memory_space<vmem>>, vector<4x8xf32>,
    %c0_204 = arith.constant 0 : index
    %c12_205 = arith.constant 12 : index
    %c3_206 = arith.constant 3 : index
    %c0_207 = arith.constant 0 : index
    %152 = vector.load %arg4[%c0_204, %c12_205, %c3_206, %c0_207] : memref<1x16x9x9xf32, #tpu.memory_space<vmem>>, vector<1x4x1x8xf32>
    %153 = vector.shape_cast %152 : vector<1x4x1x8xf32> to vector<4x8xf32>
    %c16_208 = arith.constant 16 : index
    %c0_209 = arith.constant 0 : index
    %154 = vector.load %arg6[%c16_208, %c0_209] : memref<36x8xf32, #tpu.memory_space<vmem>>, vector<4x8xf32>
    tpu.vector_store %arg6[%c16_208, %c0_209], %153 {strides = array<i32>} : memref<36x8xf32, #tpu.memory_space<vmem>>, vector<4x8xf32>,
    %c0_210 = arith.constant 0 : index
    %c8_211 = arith.constant 8 : index
    %c3_212 = arith.constant 3 : index
    %c1_213 = arith.constant 1 : index
    %155 = vector.load %arg4[%c0_210, %c8_211, %c3_212, %c1_213] : memref<1x16x9x9xf32, #tpu.memory_space<vmem>>, vector<1x4x1x8xf32>
    %156 = vector.shape_cast %155 : vector<1x4x1x8xf32> to vector<4x8xf32>
    %c20_214 = arith.constant 20 : index
    %c0_215 = arith.constant 0 : index
    %157 = vector.load %arg6[%c20_214, %c0_215] : memref<36x8xf32, #tpu.memory_space<vmem>>, vector<4x8xf32>
    tpu.vector_store %arg6[%c20_214, %c0_215], %156 {strides = array<i32>} : memref<36x8xf32, #tpu.memory_space<vmem>>, vector<4x8xf32>,
    %c0_216 = arith.constant 0 : index
    %c0_217 = arith.constant 0 : index
    %c4_218 = arith.constant 4 : index
    %c0_219 = arith.constant 0 : index
    %158 = vector.load %arg4[%c0_216, %c0_217, %c4_218, %c0_219] : memref<1x16x9x9xf32, #tpu.memory_space<vmem>>, vector<1x4x1x8xf32>
    %159 = vector.shape_cast %158 : vector<1x4x1x8xf32> to vector<4x8xf32>
    %c24_220 = arith.constant 24 : index
    %c0_221 = arith.constant 0 : index
    %160 = vector.load %arg6[%c24_220, %c0_221] : memref<36x8xf32, #tpu.memory_space<vmem>>, vector<4x8xf32>
    tpu.vector_store %arg6[%c24_220, %c0_221], %159 {strides = array<i32>} : memref<36x8xf32, #tpu.memory_space<vmem>>, vector<4x8xf32>,
    %c0_222 = arith.constant 0 : index
    %c4_223 = arith.constant 4 : index
    %c4_224 = arith.constant 4 : index
    %c0_225 = arith.constant 0 : index
    %161 = vector.load %arg4[%c0_222, %c4_223, %c4_224, %c0_225] : memref<1x16x9x9xf32, #tpu.memory_space<vmem>>, vector<1x4x1x8xf32>
    %162 = vector.shape_cast %161 : vector<1x4x1x8xf32> to vector<4x8xf32>
    %c28_226 = arith.constant 28 : index
    %c0_227 = arith.constant 0 : index
    %163 = vector.load %arg6[%c28_226, %c0_227] : memref<36x8xf32, #tpu.memory_space<vmem>>, vector<4x8xf32>
    tpu.vector_store %arg6[%c28_226, %c0_227], %162 {strides = array<i32>} : memref<36x8xf32, #tpu.memory_space<vmem>>, vector<4x8xf32>,
    %c0_228 = arith.constant 0 : index
    %c0_229 = arith.constant 0 : index
    %c4_230 = arith.constant 4 : index
    %c1_231 = arith.constant 1 : index
    %164 = vector.load %arg4[%c0_228, %c0_229, %c4_230, %c1_231] : memref<1x16x9x9xf32, #tpu.memory_space<vmem>>, vector<1x4x1x8xf32>
    %165 = vector.shape_cast %164 : vector<1x4x1x8xf32> to vector<4x8xf32>
    %c32_232 = arith.constant 32 : index
    %c0_233 = arith.constant 0 : index
    %166 = vector.load %arg6[%c32_232, %c0_233] : memref<36x8xf32, #tpu.memory_space<vmem>>, vector<4x8xf32>
    tpu.vector_store %arg6[%c32_232, %c0_233], %165 {strides = array<i32>} : memref<36x8xf32, #tpu.memory_space<vmem>>, vector<4x8xf32>,
    %c0_234 = arith.constant 0 : index
    %c0_235 = arith.constant 0 : index
    %167 = vector.load %arg6[%c0_234, %c0_235] : memref<36x8xf32, #tpu.memory_space<vmem>>, vector<36x8xf32>
    %cst_236 = arith.constant dense<0.000000e+00> : vector<4x8xf32>
    %168 = tpu.matmul %0, %167, %cst_236 {dimension_numbers = #tpu.dot_dimension_numbers<[1], [0], [0], [1], [0, 0, 1, 1], [], []>} : vector<4x36xf32>, vector<36x8xf32>, vector<4x8xf32> -> vector<4x8xf32>
    %169 = vector.broadcast %1 : vector<4x1xf32> to vector<4x8xf32>
    %170 = arith.addf %168, %169 : vector<4x8xf32>
    %171 = math.tanh %170 : vector<4x8xf32>
    %c0_237 = arith.constant 0 : index
    %c0_238 = arith.constant 0 : index
    %c24_239 = arith.constant 24 : index
    %172 = vector.load %arg5[%c0_237, %c0_238, %c24_239] : memref<1x8x64xf32, #tpu.memory_space<vmem>>, vector<1x4x8xf32>
    %173 = vector.shape_cast %172 : vector<1x4x8xf32> to vector<4x8xf32>
    %174 = vector.shape_cast %171 : vector<4x8xf32> to vector<1x4x8xf32>
    tpu.vector_store %arg5[%c0_237, %c0_238, %c24_239], %174 {strides = array<i32>} : memref<1x8x64xf32, #tpu.memory_space<vmem>>, vector<1x4x8xf32>,
    %175 = vector.extract_strided_slice %167 {offsets = [16, 0], sizes = [4, 8], strides = [1, 1]} : vector<36x8xf32> to vector<4x8xf32>
    %176 = vector.extract_strided_slice %167 {offsets = [20, 0], sizes = [4, 8], strides = [1, 1]} : vector<36x8xf32> to vector<4x8xf32>
    %177 = arith.maximumf %175, %176 : vector<4x8xf32>
    %178 = vector.extract_strided_slice %167 {offsets = [28, 0], sizes = [4, 8], strides = [1, 1]} : vector<36x8xf32> to vector<4x8xf32>
    %179 = vector.extract_strided_slice %167 {offsets = [32, 0], sizes = [4, 8], strides = [1, 1]} : vector<36x8xf32> to vector<4x8xf32>
    %180 = arith.maximumf %178, %179 : vector<4x8xf32>
    %181 = arith.maximumf %177, %180 : vector<4x8xf32>
    %182 = math.tanh %181 : vector<4x8xf32>
    %c0_240 = arith.constant 0 : index
    %c4_241 = arith.constant 4 : index
    %c24_242 = arith.constant 24 : index
    %183 = vector.load %arg5[%c0_240, %c4_241, %c24_242] : memref<1x8x64xf32, #tpu.memory_space<vmem>>, vector<1x4x8xf32>
    %184 = vector.shape_cast %183 : vector<1x4x8xf32> to vector<4x8xf32>
    %185 = vector.shape_cast %182 : vector<4x8xf32> to vector<1x4x8xf32>
    tpu.vector_store %arg5[%c0_240, %c4_241, %c24_242], %185 {strides = array<i32>} : memref<1x8x64xf32, #tpu.memory_space<vmem>>, vector<1x4x8xf32>,
    %c0_243 = arith.constant 0 : index
    %c0_244 = arith.constant 0 : index
    %c4_245 = arith.constant 4 : index
    %c0_246 = arith.constant 0 : index
    %186 = vector.load %arg4[%c0_243, %c0_244, %c4_245, %c0_246] : memref<1x16x9x9xf32, #tpu.memory_space<vmem>>, vector<1x4x1x8xf32>
    %187 = vector.shape_cast %186 : vector<1x4x1x8xf32> to vector<4x8xf32>
    %c0_247 = arith.constant 0 : index
    %c0_248 = arith.constant 0 : index
    %188 = vector.load %arg6[%c0_247, %c0_248] : memref<36x8xf32, #tpu.memory_space<vmem>>, vector<4x8xf32>
    tpu.vector_store %arg6[%c0_247, %c0_248], %187 {strides = array<i32>} : memref<36x8xf32, #tpu.memory_space<vmem>>, vector<4x8xf32>,
    %c0_249 = arith.constant 0 : index
    %c4_250 = arith.constant 4 : index
    %c4_251 = arith.constant 4 : index
    %c0_252 = arith.constant 0 : index
    %189 = vector.load %arg4[%c0_249, %c4_250, %c4_251, %c0_252] : memref<1x16x9x9xf32, #tpu.memory_space<vmem>>, vector<1x4x1x8xf32>
    %190 = vector.shape_cast %189 : vector<1x4x1x8xf32> to vector<4x8xf32>
    %c4_253 = arith.constant 4 : index
    %c0_254 = arith.constant 0 : index
    %191 = vector.load %arg6[%c4_253, %c0_254] : memref<36x8xf32, #tpu.memory_space<vmem>>, vector<4x8xf32>
    tpu.vector_store %arg6[%c4_253, %c0_254], %190 {strides = array<i32>} : memref<36x8xf32, #tpu.memory_space<vmem>>, vector<4x8xf32>,
    %c0_255 = arith.constant 0 : index
    %c0_256 = arith.constant 0 : index
    %c4_257 = arith.constant 4 : index
    %c1_258 = arith.constant 1 : index
    %192 = vector.load %arg4[%c0_255, %c0_256, %c4_257, %c1_258] : memref<1x16x9x9xf32, #tpu.memory_space<vmem>>, vector<1x4x1x8xf32>
    %193 = vector.shape_cast %192 : vector<1x4x1x8xf32> to vector<4x8xf32>
    %c8_259 = arith.constant 8 : index
    %c0_260 = arith.constant 0 : index
    %194 = vector.load %arg6[%c8_259, %c0_260] : memref<36x8xf32, #tpu.memory_space<vmem>>, vector<4x8xf32>
    tpu.vector_store %arg6[%c8_259, %c0_260], %193 {strides = array<i32>} : memref<36x8xf32, #tpu.memory_space<vmem>>, vector<4x8xf32>,
    %c0_261 = arith.constant 0 : index
    %c8_262 = arith.constant 8 : index
    %c4_263 = arith.constant 4 : index
    %c0_264 = arith.constant 0 : index
    %195 = vector.load %arg4[%c0_261, %c8_262, %c4_263, %c0_264] : memref<1x16x9x9xf32, #tpu.memory_space<vmem>>, vector<1x4x1x8xf32>
    %196 = vector.shape_cast %195 : vector<1x4x1x8xf32> to vector<4x8xf32>
    %c12_265 = arith.constant 12 : index
    %c0_266 = arith.constant 0 : index
    %197 = vector.load %arg6[%c12_265, %c0_266] : memref<36x8xf32, #tpu.memory_space<vmem>>, vector<4x8xf32>
    tpu.vector_store %arg6[%c12_265, %c0_266], %196 {strides = array<i32>} : memref<36x8xf32, #tpu.memory_space<vmem>>, vector<4x8xf32>,
    %c0_267 = arith.constant 0 : index
    %c12_268 = arith.constant 12 : index
    %c4_269 = arith.constant 4 : index
    %c0_270 = arith.constant 0 : index
    %198 = vector.load %arg4[%c0_267, %c12_268, %c4_269, %c0_270] : memref<1x16x9x9xf32, #tpu.memory_space<vmem>>, vector<1x4x1x8xf32>
    %199 = vector.shape_cast %198 : vector<1x4x1x8xf32> to vector<4x8xf32>
    %c16_271 = arith.constant 16 : index
    %c0_272 = arith.constant 0 : index
    %200 = vector.load %arg6[%c16_271, %c0_272] : memref<36x8xf32, #tpu.memory_space<vmem>>, vector<4x8xf32>
    tpu.vector_store %arg6[%c16_271, %c0_272], %199 {strides = array<i32>} : memref<36x8xf32, #tpu.memory_space<vmem>>, vector<4x8xf32>,
    %c0_273 = arith.constant 0 : index
    %c8_274 = arith.constant 8 : index
    %c4_275 = arith.constant 4 : index
    %c1_276 = arith.constant 1 : index
    %201 = vector.load %arg4[%c0_273, %c8_274, %c4_275, %c1_276] : memref<1x16x9x9xf32, #tpu.memory_space<vmem>>, vector<1x4x1x8xf32>
    %202 = vector.shape_cast %201 : vector<1x4x1x8xf32> to vector<4x8xf32>
    %c20_277 = arith.constant 20 : index
    %c0_278 = arith.constant 0 : index
    %203 = vector.load %arg6[%c20_277, %c0_278] : memref<36x8xf32, #tpu.memory_space<vmem>>, vector<4x8xf32>
    tpu.vector_store %arg6[%c20_277, %c0_278], %202 {strides = array<i32>} : memref<36x8xf32, #tpu.memory_space<vmem>>, vector<4x8xf32>,
    %c0_279 = arith.constant 0 : index
    %c0_280 = arith.constant 0 : index
    %c5 = arith.constant 5 : index
    %c0_281 = arith.constant 0 : index
    %204 = vector.load %arg4[%c0_279, %c0_280, %c5, %c0_281] : memref<1x16x9x9xf32, #tpu.memory_space<vmem>>, vector<1x4x1x8xf32>
    %205 = vector.shape_cast %204 : vector<1x4x1x8xf32> to vector<4x8xf32>
    %c24_282 = arith.constant 24 : index
    %c0_283 = arith.constant 0 : index
    %206 = vector.load %arg6[%c24_282, %c0_283] : memref<36x8xf32, #tpu.memory_space<vmem>>, vector<4x8xf32>
    tpu.vector_store %arg6[%c24_282, %c0_283], %205 {strides = array<i32>} : memref<36x8xf32, #tpu.memory_space<vmem>>, vector<4x8xf32>,
    %c0_284 = arith.constant 0 : index
    %c4_285 = arith.constant 4 : index
    %c5_286 = arith.constant 5 : index
    %c0_287 = arith.constant 0 : index
    %207 = vector.load %arg4[%c0_284, %c4_285, %c5_286, %c0_287] : memref<1x16x9x9xf32, #tpu.memory_space<vmem>>, vector<1x4x1x8xf32>
    %208 = vector.shape_cast %207 : vector<1x4x1x8xf32> to vector<4x8xf32>
    %c28_288 = arith.constant 28 : index
    %c0_289 = arith.constant 0 : index
    %209 = vector.load %arg6[%c28_288, %c0_289] : memref<36x8xf32, #tpu.memory_space<vmem>>, vector<4x8xf32>
    tpu.vector_store %arg6[%c28_288, %c0_289], %208 {strides = array<i32>} : memref<36x8xf32, #tpu.memory_space<vmem>>, vector<4x8xf32>,
    %c0_290 = arith.constant 0 : index
    %c0_291 = arith.constant 0 : index
    %c5_292 = arith.constant 5 : index
    %c1_293 = arith.constant 1 : index
    %210 = vector.load %arg4[%c0_290, %c0_291, %c5_292, %c1_293] : memref<1x16x9x9xf32, #tpu.memory_space<vmem>>, vector<1x4x1x8xf32>
    %211 = vector.shape_cast %210 : vector<1x4x1x8xf32> to vector<4x8xf32>
    %c32_294 = arith.constant 32 : index
    %c0_295 = arith.constant 0 : index
    %212 = vector.load %arg6[%c32_294, %c0_295] : memref<36x8xf32, #tpu.memory_space<vmem>>, vector<4x8xf32>
    tpu.vector_store %arg6[%c32_294, %c0_295], %211 {strides = array<i32>} : memref<36x8xf32, #tpu.memory_space<vmem>>, vector<4x8xf32>,
    %c0_296 = arith.constant 0 : index
    %c0_297 = arith.constant 0 : index
    %213 = vector.load %arg6[%c0_296, %c0_297] : memref<36x8xf32, #tpu.memory_space<vmem>>, vector<36x8xf32>
    %cst_298 = arith.constant dense<0.000000e+00> : vector<4x8xf32>
    %214 = tpu.matmul %0, %213, %cst_298 {dimension_numbers = #tpu.dot_dimension_numbers<[1], [0], [0], [1], [0, 0, 1, 1], [], []>} : vector<4x36xf32>, vector<36x8xf32>, vector<4x8xf32> -> vector<4x8xf32>
    %215 = vector.broadcast %1 : vector<4x1xf32> to vector<4x8xf32>
    %216 = arith.addf %214, %215 : vector<4x8xf32>
    %217 = math.tanh %216 : vector<4x8xf32>
    %c0_299 = arith.constant 0 : index
    %c0_300 = arith.constant 0 : index
    %c32_301 = arith.constant 32 : index
    %218 = vector.load %arg5[%c0_299, %c0_300, %c32_301] : memref<1x8x64xf32, #tpu.memory_space<vmem>>, vector<1x4x8xf32>
    %219 = vector.shape_cast %218 : vector<1x4x8xf32> to vector<4x8xf32>
    %220 = vector.shape_cast %217 : vector<4x8xf32> to vector<1x4x8xf32>
    tpu.vector_store %arg5[%c0_299, %c0_300, %c32_301], %220 {strides = array<i32>} : memref<1x8x64xf32, #tpu.memory_space<vmem>>, vector<1x4x8xf32>,
    %221 = vector.extract_strided_slice %213 {offsets = [16, 0], sizes = [4, 8], strides = [1, 1]} : vector<36x8xf32> to vector<4x8xf32>
    %222 = vector.extract_strided_slice %213 {offsets = [20, 0], sizes = [4, 8], strides = [1, 1]} : vector<36x8xf32> to vector<4x8xf32>
    %223 = arith.maximumf %221, %222 : vector<4x8xf32>
    %224 = vector.extract_strided_slice %213 {offsets = [28, 0], sizes = [4, 8], strides = [1, 1]} : vector<36x8xf32> to vector<4x8xf32>
    %225 = vector.extract_strided_slice %213 {offsets = [32, 0], sizes = [4, 8], strides = [1, 1]} : vector<36x8xf32> to vector<4x8xf32>
    %226 = arith.maximumf %224, %225 : vector<4x8xf32>
    %227 = arith.maximumf %223, %226 : vector<4x8xf32>
    %228 = math.tanh %227 : vector<4x8xf32>
    %c0_302 = arith.constant 0 : index
    %c4_303 = arith.constant 4 : index
    %c32_304 = arith.constant 32 : index
    %229 = vector.load %arg5[%c0_302, %c4_303, %c32_304] : memref<1x8x64xf32, #tpu.memory_space<vmem>>, vector<1x4x8xf32>
    %230 = vector.shape_cast %229 : vector<1x4x8xf32> to vector<4x8xf32>
    %231 = vector.shape_cast %228 : vector<4x8xf32> to vector<1x4x8xf32>
    tpu.vector_store %arg5[%c0_302, %c4_303, %c32_304], %231 {strides = array<i32>} : memref<1x8x64xf32, #tpu.memory_space<vmem>>, vector<1x4x8xf32>,
    %c0_305 = arith.constant 0 : index
    %c0_306 = arith.constant 0 : index
    %c5_307 = arith.constant 5 : index
    %c0_308 = arith.constant 0 : index
    %232 = vector.load %arg4[%c0_305, %c0_306, %c5_307, %c0_308] : memref<1x16x9x9xf32, #tpu.memory_space<vmem>>, vector<1x4x1x8xf32>
    %233 = vector.shape_cast %232 : vector<1x4x1x8xf32> to vector<4x8xf32>
    %c0_309 = arith.constant 0 : index
    %c0_310 = arith.constant 0 : index
    %234 = vector.load %arg6[%c0_309, %c0_310] : memref<36x8xf32, #tpu.memory_space<vmem>>, vector<4x8xf32>
    tpu.vector_store %arg6[%c0_309, %c0_310], %233 {strides = array<i32>} : memref<36x8xf32, #tpu.memory_space<vmem>>, vector<4x8xf32>,
    %c0_311 = arith.constant 0 : index
    %c4_312 = arith.constant 4 : index
    %c5_313 = arith.constant 5 : index
    %c0_314 = arith.constant 0 : index
    %235 = vector.load %arg4[%c0_311, %c4_312, %c5_313, %c0_314] : memref<1x16x9x9xf32, #tpu.memory_space<vmem>>, vector<1x4x1x8xf32>
    %236 = vector.shape_cast %235 : vector<1x4x1x8xf32> to vector<4x8xf32>
    %c4_315 = arith.constant 4 : index
    %c0_316 = arith.constant 0 : index
    %237 = vector.load %arg6[%c4_315, %c0_316] : memref<36x8xf32, #tpu.memory_space<vmem>>, vector<4x8xf32>
    tpu.vector_store %arg6[%c4_315, %c0_316], %236 {strides = array<i32>} : memref<36x8xf32, #tpu.memory_space<vmem>>, vector<4x8xf32>,
    %c0_317 = arith.constant 0 : index
    %c0_318 = arith.constant 0 : index
    %c5_319 = arith.constant 5 : index
    %c1_320 = arith.constant 1 : index
    %238 = vector.load %arg4[%c0_317, %c0_318, %c5_319, %c1_320] : memref<1x16x9x9xf32, #tpu.memory_space<vmem>>, vector<1x4x1x8xf32>
    %239 = vector.shape_cast %238 : vector<1x4x1x8xf32> to vector<4x8xf32>
    %c8_321 = arith.constant 8 : index
    %c0_322 = arith.constant 0 : index
    %240 = vector.load %arg6[%c8_321, %c0_322] : memref<36x8xf32, #tpu.memory_space<vmem>>, vector<4x8xf32>
    tpu.vector_store %arg6[%c8_321, %c0_322], %239 {strides = array<i32>} : memref<36x8xf32, #tpu.memory_space<vmem>>, vector<4x8xf32>,
    %c0_323 = arith.constant 0 : index
    %c8_324 = arith.constant 8 : index
    %c5_325 = arith.constant 5 : index
    %c0_326 = arith.constant 0 : index
    %241 = vector.load %arg4[%c0_323, %c8_324, %c5_325, %c0_326] : memref<1x16x9x9xf32, #tpu.memory_space<vmem>>, vector<1x4x1x8xf32>
    %242 = vector.shape_cast %241 : vector<1x4x1x8xf32> to vector<4x8xf32>
    %c12_327 = arith.constant 12 : index
    %c0_328 = arith.constant 0 : index
    %243 = vector.load %arg6[%c12_327, %c0_328] : memref<36x8xf32, #tpu.memory_space<vmem>>, vector<4x8xf32>
    tpu.vector_store %arg6[%c12_327, %c0_328], %242 {strides = array<i32>} : memref<36x8xf32, #tpu.memory_space<vmem>>, vector<4x8xf32>,
    %c0_329 = arith.constant 0 : index
    %c12_330 = arith.constant 12 : index
    %c5_331 = arith.constant 5 : index
    %c0_332 = arith.constant 0 : index
    %244 = vector.load %arg4[%c0_329, %c12_330, %c5_331, %c0_332] : memref<1x16x9x9xf32, #tpu.memory_space<vmem>>, vector<1x4x1x8xf32>
    %245 = vector.shape_cast %244 : vector<1x4x1x8xf32> to vector<4x8xf32>
    %c16_333 = arith.constant 16 : index
    %c0_334 = arith.constant 0 : index
    %246 = vector.load %arg6[%c16_333, %c0_334] : memref<36x8xf32, #tpu.memory_space<vmem>>, vector<4x8xf32>
    tpu.vector_store %arg6[%c16_333, %c0_334], %245 {strides = array<i32>} : memref<36x8xf32, #tpu.memory_space<vmem>>, vector<4x8xf32>,
    %c0_335 = arith.constant 0 : index
    %c8_336 = arith.constant 8 : index
    %c5_337 = arith.constant 5 : index
    %c1_338 = arith.constant 1 : index
    %247 = vector.load %arg4[%c0_335, %c8_336, %c5_337, %c1_338] : memref<1x16x9x9xf32, #tpu.memory_space<vmem>>, vector<1x4x1x8xf32>
    %248 = vector.shape_cast %247 : vector<1x4x1x8xf32> to vector<4x8xf32>
    %c20_339 = arith.constant 20 : index
    %c0_340 = arith.constant 0 : index
    %249 = vector.load %arg6[%c20_339, %c0_340] : memref<36x8xf32, #tpu.memory_space<vmem>>, vector<4x8xf32>
    tpu.vector_store %arg6[%c20_339, %c0_340], %248 {strides = array<i32>} : memref<36x8xf32, #tpu.memory_space<vmem>>, vector<4x8xf32>,
    %c0_341 = arith.constant 0 : index
    %c0_342 = arith.constant 0 : index
    %c6 = arith.constant 6 : index
    %c0_343 = arith.constant 0 : index
    %250 = vector.load %arg4[%c0_341, %c0_342, %c6, %c0_343] : memref<1x16x9x9xf32, #tpu.memory_space<vmem>>, vector<1x4x1x8xf32>
    %251 = vector.shape_cast %250 : vector<1x4x1x8xf32> to vector<4x8xf32>
    %c24_344 = arith.constant 24 : index
    %c0_345 = arith.constant 0 : index
    %252 = vector.load %arg6[%c24_344, %c0_345] : memref<36x8xf32, #tpu.memory_space<vmem>>, vector<4x8xf32>
    tpu.vector_store %arg6[%c24_344, %c0_345], %251 {strides = array<i32>} : memref<36x8xf32, #tpu.memory_space<vmem>>, vector<4x8xf32>,
    %c0_346 = arith.constant 0 : index
    %c4_347 = arith.constant 4 : index
    %c6_348 = arith.constant 6 : index
    %c0_349 = arith.constant 0 : index
    %253 = vector.load %arg4[%c0_346, %c4_347, %c6_348, %c0_349] : memref<1x16x9x9xf32, #tpu.memory_space<vmem>>, vector<1x4x1x8xf32>
    %254 = vector.shape_cast %253 : vector<1x4x1x8xf32> to vector<4x8xf32>
    %c28_350 = arith.constant 28 : index
    %c0_351 = arith.constant 0 : index
    %255 = vector.load %arg6[%c28_350, %c0_351] : memref<36x8xf32, #tpu.memory_space<vmem>>, vector<4x8xf32>
    tpu.vector_store %arg6[%c28_350, %c0_351], %254 {strides = array<i32>} : memref<36x8xf32, #tpu.memory_space<vmem>>, vector<4x8xf32>,
    %c0_352 = arith.constant 0 : index
    %c0_353 = arith.constant 0 : index
    %c6_354 = arith.constant 6 : index
    %c1_355 = arith.constant 1 : index
    %256 = vector.load %arg4[%c0_352, %c0_353, %c6_354, %c1_355] : memref<1x16x9x9xf32, #tpu.memory_space<vmem>>, vector<1x4x1x8xf32>
    %257 = vector.shape_cast %256 : vector<1x4x1x8xf32> to vector<4x8xf32>
    %c32_356 = arith.constant 32 : index
    %c0_357 = arith.constant 0 : index
    %258 = vector.load %arg6[%c32_356, %c0_357] : memref<36x8xf32, #tpu.memory_space<vmem>>, vector<4x8xf32>
    tpu.vector_store %arg6[%c32_356, %c0_357], %257 {strides = array<i32>} : memref<36x8xf32, #tpu.memory_space<vmem>>, vector<4x8xf32>,
    %c0_358 = arith.constant 0 : index
    %c0_359 = arith.constant 0 : index
    %259 = vector.load %arg6[%c0_358, %c0_359] : memref<36x8xf32, #tpu.memory_space<vmem>>, vector<36x8xf32>
    %cst_360 = arith.constant dense<0.000000e+00> : vector<4x8xf32>
    %260 = tpu.matmul %0, %259, %cst_360 {dimension_numbers = #tpu.dot_dimension_numbers<[1], [0], [0], [1], [0, 0, 1, 1], [], []>} : vector<4x36xf32>, vector<36x8xf32>, vector<4x8xf32> -> vector<4x8xf32>
    %261 = vector.broadcast %1 : vector<4x1xf32> to vector<4x8xf32>
    %262 = arith.addf %260, %261 : vector<4x8xf32>
    %263 = math.tanh %262 : vector<4x8xf32>
    %c0_361 = arith.constant 0 : index
    %c0_362 = arith.constant 0 : index
    %c40 = arith.constant 40 : index
    %264 = vector.load %arg5[%c0_361, %c0_362, %c40] : memref<1x8x64xf32, #tpu.memory_space<vmem>>, vector<1x4x8xf32>
    %265 = vector.shape_cast %264 : vector<1x4x8xf32> to vector<4x8xf32>
    %266 = vector.shape_cast %263 : vector<4x8xf32> to vector<1x4x8xf32>
    tpu.vector_store %arg5[%c0_361, %c0_362, %c40], %266 {strides = array<i32>} : memref<1x8x64xf32, #tpu.memory_space<vmem>>, vector<1x4x8xf32>,
    %267 = vector.extract_strided_slice %259 {offsets = [16, 0], sizes = [4, 8], strides = [1, 1]} : vector<36x8xf32> to vector<4x8xf32>
    %268 = vector.extract_strided_slice %259 {offsets = [20, 0], sizes = [4, 8], strides = [1, 1]} : vector<36x8xf32> to vector<4x8xf32>
    %269 = arith.maximumf %267, %268 : vector<4x8xf32>
    %270 = vector.extract_strided_slice %259 {offsets = [28, 0], sizes = [4, 8], strides = [1, 1]} : vector<36x8xf32> to vector<4x8xf32>
    %271 = vector.extract_strided_slice %259 {offsets = [32, 0], sizes = [4, 8], strides = [1, 1]} : vector<36x8xf32> to vector<4x8xf32>
    %272 = arith.maximumf %270, %271 : vector<4x8xf32>
    %273 = arith.maximumf %269, %272 : vector<4x8xf32>
    %274 = math.tanh %273 : vector<4x8xf32>
    %c0_363 = arith.constant 0 : index
    %c4_364 = arith.constant 4 : index
    %c40_365 = arith.constant 40 : index
    %275 = vector.load %arg5[%c0_363, %c4_364, %c40_365] : memref<1x8x64xf32, #tpu.memory_space<vmem>>, vector<1x4x8xf32>
    %276 = vector.shape_cast %275 : vector<1x4x8xf32> to vector<4x8xf32>
    %277 = vector.shape_cast %274 : vector<4x8xf32> to vector<1x4x8xf32>
    tpu.vector_store %arg5[%c0_363, %c4_364, %c40_365], %277 {strides = array<i32>} : memref<1x8x64xf32, #tpu.memory_space<vmem>>, vector<1x4x8xf32>,
    %c0_366 = arith.constant 0 : index
    %c0_367 = arith.constant 0 : index
    %c6_368 = arith.constant 6 : index
    %c0_369 = arith.constant 0 : index
    %278 = vector.load %arg4[%c0_366, %c0_367, %c6_368, %c0_369] : memref<1x16x9x9xf32, #tpu.memory_space<vmem>>, vector<1x4x1x8xf32>
    %279 = vector.shape_cast %278 : vector<1x4x1x8xf32> to vector<4x8xf32>
    %c0_370 = arith.constant 0 : index
    %c0_371 = arith.constant 0 : index
    %280 = vector.load %arg6[%c0_370, %c0_371] : memref<36x8xf32, #tpu.memory_space<vmem>>, vector<4x8xf32>
    tpu.vector_store %arg6[%c0_370, %c0_371], %279 {strides = array<i32>} : memref<36x8xf32, #tpu.memory_space<vmem>>, vector<4x8xf32>,
    %c0_372 = arith.constant 0 : index
    %c4_373 = arith.constant 4 : index
    %c6_374 = arith.constant 6 : index
    %c0_375 = arith.constant 0 : index
    %281 = vector.load %arg4[%c0_372, %c4_373, %c6_374, %c0_375] : memref<1x16x9x9xf32, #tpu.memory_space<vmem>>, vector<1x4x1x8xf32>
    %282 = vector.shape_cast %281 : vector<1x4x1x8xf32> to vector<4x8xf32>
    %c4_376 = arith.constant 4 : index
    %c0_377 = arith.constant 0 : index
    %283 = vector.load %arg6[%c4_376, %c0_377] : memref<36x8xf32, #tpu.memory_space<vmem>>, vector<4x8xf32>
    tpu.vector_store %arg6[%c4_376, %c0_377], %282 {strides = array<i32>} : memref<36x8xf32, #tpu.memory_space<vmem>>, vector<4x8xf32>,
    %c0_378 = arith.constant 0 : index
    %c0_379 = arith.constant 0 : index
    %c6_380 = arith.constant 6 : index
    %c1_381 = arith.constant 1 : index
    %284 = vector.load %arg4[%c0_378, %c0_379, %c6_380, %c1_381] : memref<1x16x9x9xf32, #tpu.memory_space<vmem>>, vector<1x4x1x8xf32>
    %285 = vector.shape_cast %284 : vector<1x4x1x8xf32> to vector<4x8xf32>
    %c8_382 = arith.constant 8 : index
    %c0_383 = arith.constant 0 : index
    %286 = vector.load %arg6[%c8_382, %c0_383] : memref<36x8xf32, #tpu.memory_space<vmem>>, vector<4x8xf32>
    tpu.vector_store %arg6[%c8_382, %c0_383], %285 {strides = array<i32>} : memref<36x8xf32, #tpu.memory_space<vmem>>, vector<4x8xf32>,
    %c0_384 = arith.constant 0 : index
    %c8_385 = arith.constant 8 : index
    %c6_386 = arith.constant 6 : index
    %c0_387 = arith.constant 0 : index
    %287 = vector.load %arg4[%c0_384, %c8_385, %c6_386, %c0_387] : memref<1x16x9x9xf32, #tpu.memory_space<vmem>>, vector<1x4x1x8xf32>
    %288 = vector.shape_cast %287 : vector<1x4x1x8xf32> to vector<4x8xf32>
    %c12_388 = arith.constant 12 : index
    %c0_389 = arith.constant 0 : index
    %289 = vector.load %arg6[%c12_388, %c0_389] : memref<36x8xf32, #tpu.memory_space<vmem>>, vector<4x8xf32>
    tpu.vector_store %arg6[%c12_388, %c0_389], %288 {strides = array<i32>} : memref<36x8xf32, #tpu.memory_space<vmem>>, vector<4x8xf32>,
    %c0_390 = arith.constant 0 : index
    %c12_391 = arith.constant 12 : index
    %c6_392 = arith.constant 6 : index
    %c0_393 = arith.constant 0 : index
    %290 = vector.load %arg4[%c0_390, %c12_391, %c6_392, %c0_393] : memref<1x16x9x9xf32, #tpu.memory_space<vmem>>, vector<1x4x1x8xf32>
    %291 = vector.shape_cast %290 : vector<1x4x1x8xf32> to vector<4x8xf32>
    %c16_394 = arith.constant 16 : index
    %c0_395 = arith.constant 0 : index
    %292 = vector.load %arg6[%c16_394, %c0_395] : memref<36x8xf32, #tpu.memory_space<vmem>>, vector<4x8xf32>
    tpu.vector_store %arg6[%c16_394, %c0_395], %291 {strides = array<i32>} : memref<36x8xf32, #tpu.memory_space<vmem>>, vector<4x8xf32>,
    %c0_396 = arith.constant 0 : index
    %c8_397 = arith.constant 8 : index
    %c6_398 = arith.constant 6 : index
    %c1_399 = arith.constant 1 : index
    %293 = vector.load %arg4[%c0_396, %c8_397, %c6_398, %c1_399] : memref<1x16x9x9xf32, #tpu.memory_space<vmem>>, vector<1x4x1x8xf32>
    %294 = vector.shape_cast %293 : vector<1x4x1x8xf32> to vector<4x8xf32>
    %c20_400 = arith.constant 20 : index
    %c0_401 = arith.constant 0 : index
    %295 = vector.load %arg6[%c20_400, %c0_401] : memref<36x8xf32, #tpu.memory_space<vmem>>, vector<4x8xf32>
    tpu.vector_store %arg6[%c20_400, %c0_401], %294 {strides = array<i32>} : memref<36x8xf32, #tpu.memory_space<vmem>>, vector<4x8xf32>,
    %c0_402 = arith.constant 0 : index
    %c0_403 = arith.constant 0 : index
    %c7 = arith.constant 7 : index
    %c0_404 = arith.constant 0 : index
    %296 = vector.load %arg4[%c0_402, %c0_403, %c7, %c0_404] : memref<1x16x9x9xf32, #tpu.memory_space<vmem>>, vector<1x4x1x8xf32>
    %297 = vector.shape_cast %296 : vector<1x4x1x8xf32> to vector<4x8xf32>
    %c24_405 = arith.constant 24 : index
    %c0_406 = arith.constant 0 : index
    %298 = vector.load %arg6[%c24_405, %c0_406] : memref<36x8xf32, #tpu.memory_space<vmem>>, vector<4x8xf32>
    tpu.vector_store %arg6[%c24_405, %c0_406], %297 {strides = array<i32>} : memref<36x8xf32, #tpu.memory_space<vmem>>, vector<4x8xf32>,
    %c0_407 = arith.constant 0 : index
    %c4_408 = arith.constant 4 : index
    %c7_409 = arith.constant 7 : index
    %c0_410 = arith.constant 0 : index
    %299 = vector.load %arg4[%c0_407, %c4_408, %c7_409, %c0_410] : memref<1x16x9x9xf32, #tpu.memory_space<vmem>>, vector<1x4x1x8xf32>
    %300 = vector.shape_cast %299 : vector<1x4x1x8xf32> to vector<4x8xf32>
    %c28_411 = arith.constant 28 : index
    %c0_412 = arith.constant 0 : index
    %301 = vector.load %arg6[%c28_411, %c0_412] : memref<36x8xf32, #tpu.memory_space<vmem>>, vector<4x8xf32>
    tpu.vector_store %arg6[%c28_411, %c0_412], %300 {strides = array<i32>} : memref<36x8xf32, #tpu.memory_space<vmem>>, vector<4x8xf32>,
    %c0_413 = arith.constant 0 : index
    %c0_414 = arith.constant 0 : index
    %c7_415 = arith.constant 7 : index
    %c1_416 = arith.constant 1 : index
    %302 = vector.load %arg4[%c0_413, %c0_414, %c7_415, %c1_416] : memref<1x16x9x9xf32, #tpu.memory_space<vmem>>, vector<1x4x1x8xf32>
    %303 = vector.shape_cast %302 : vector<1x4x1x8xf32> to vector<4x8xf32>
    %c32_417 = arith.constant 32 : index
    %c0_418 = arith.constant 0 : index
    %304 = vector.load %arg6[%c32_417, %c0_418] : memref<36x8xf32, #tpu.memory_space<vmem>>, vector<4x8xf32>
    tpu.vector_store %arg6[%c32_417, %c0_418], %303 {strides = array<i32>} : memref<36x8xf32, #tpu.memory_space<vmem>>, vector<4x8xf32>,
    %c0_419 = arith.constant 0 : index
    %c0_420 = arith.constant 0 : index
    %305 = vector.load %arg6[%c0_419, %c0_420] : memref<36x8xf32, #tpu.memory_space<vmem>>, vector<36x8xf32>
    %cst_421 = arith.constant dense<0.000000e+00> : vector<4x8xf32>
    %306 = tpu.matmul %0, %305, %cst_421 {dimension_numbers = #tpu.dot_dimension_numbers<[1], [0], [0], [1], [0, 0, 1, 1], [], []>} : vector<4x36xf32>, vector<36x8xf32>, vector<4x8xf32> -> vector<4x8xf32>
    %307 = vector.broadcast %1 : vector<4x1xf32> to vector<4x8xf32>
    %308 = arith.addf %306, %307 : vector<4x8xf32>
    %309 = math.tanh %308 : vector<4x8xf32>
    %c0_422 = arith.constant 0 : index
    %c0_423 = arith.constant 0 : index
    %c48 = arith.constant 48 : index
    %310 = vector.load %arg5[%c0_422, %c0_423, %c48] : memref<1x8x64xf32, #tpu.memory_space<vmem>>, vector<1x4x8xf32>
    %311 = vector.shape_cast %310 : vector<1x4x8xf32> to vector<4x8xf32>
    %312 = vector.shape_cast %309 : vector<4x8xf32> to vector<1x4x8xf32>
    tpu.vector_store %arg5[%c0_422, %c0_423, %c48], %312 {strides = array<i32>} : memref<1x8x64xf32, #tpu.memory_space<vmem>>, vector<1x4x8xf32>,
    %313 = vector.extract_strided_slice %305 {offsets = [16, 0], sizes = [4, 8], strides = [1, 1]} : vector<36x8xf32> to vector<4x8xf32>
    %314 = vector.extract_strided_slice %305 {offsets = [20, 0], sizes = [4, 8], strides = [1, 1]} : vector<36x8xf32> to vector<4x8xf32>
    %315 = arith.maximumf %313, %314 : vector<4x8xf32>
    %316 = vector.extract_strided_slice %305 {offsets = [28, 0], sizes = [4, 8], strides = [1, 1]} : vector<36x8xf32> to vector<4x8xf32>
    %317 = vector.extract_strided_slice %305 {offsets = [32, 0], sizes = [4, 8], strides = [1, 1]} : vector<36x8xf32> to vector<4x8xf32>
    %318 = arith.maximumf %316, %317 : vector<4x8xf32>
    %319 = arith.maximumf %315, %318 : vector<4x8xf32>
    %320 = math.tanh %319 : vector<4x8xf32>
    %c0_424 = arith.constant 0 : index
    %c4_425 = arith.constant 4 : index
    %c48_426 = arith.constant 48 : index
    %321 = vector.load %arg5[%c0_424, %c4_425, %c48_426] : memref<1x8x64xf32, #tpu.memory_space<vmem>>, vector<1x4x8xf32>
    %322 = vector.shape_cast %321 : vector<1x4x8xf32> to vector<4x8xf32>
    %323 = vector.shape_cast %320 : vector<4x8xf32> to vector<1x4x8xf32>
    tpu.vector_store %arg5[%c0_424, %c4_425, %c48_426], %323 {strides = array<i32>} : memref<1x8x64xf32, #tpu.memory_space<vmem>>, vector<1x4x8xf32>,
    %c0_427 = arith.constant 0 : index
    %c0_428 = arith.constant 0 : index
    %c7_429 = arith.constant 7 : index
    %c0_430 = arith.constant 0 : index
    %324 = vector.load %arg4[%c0_427, %c0_428, %c7_429, %c0_430] : memref<1x16x9x9xf32, #tpu.memory_space<vmem>>, vector<1x4x1x8xf32>
    %325 = vector.shape_cast %324 : vector<1x4x1x8xf32> to vector<4x8xf32>
    %c0_431 = arith.constant 0 : index
    %c0_432 = arith.constant 0 : index
    %326 = vector.load %arg6[%c0_431, %c0_432] : memref<36x8xf32, #tpu.memory_space<vmem>>, vector<4x8xf32>
    tpu.vector_store %arg6[%c0_431, %c0_432], %325 {strides = array<i32>} : memref<36x8xf32, #tpu.memory_space<vmem>>, vector<4x8xf32>,
    %c0_433 = arith.constant 0 : index
    %c4_434 = arith.constant 4 : index
    %c7_435 = arith.constant 7 : index
    %c0_436 = arith.constant 0 : index
    %327 = vector.load %arg4[%c0_433, %c4_434, %c7_435, %c0_436] : memref<1x16x9x9xf32, #tpu.memory_space<vmem>>, vector<1x4x1x8xf32>
    %328 = vector.shape_cast %327 : vector<1x4x1x8xf32> to vector<4x8xf32>
    %c4_437 = arith.constant 4 : index
    %c0_438 = arith.constant 0 : index
    %329 = vector.load %arg6[%c4_437, %c0_438] : memref<36x8xf32, #tpu.memory_space<vmem>>, vector<4x8xf32>
    tpu.vector_store %arg6[%c4_437, %c0_438], %328 {strides = array<i32>} : memref<36x8xf32, #tpu.memory_space<vmem>>, vector<4x8xf32>,
    %c0_439 = arith.constant 0 : index
    %c0_440 = arith.constant 0 : index
    %c7_441 = arith.constant 7 : index
    %c1_442 = arith.constant 1 : index
    %330 = vector.load %arg4[%c0_439, %c0_440, %c7_441, %c1_442] : memref<1x16x9x9xf32, #tpu.memory_space<vmem>>, vector<1x4x1x8xf32>
    %331 = vector.shape_cast %330 : vector<1x4x1x8xf32> to vector<4x8xf32>
    %c8_443 = arith.constant 8 : index
    %c0_444 = arith.constant 0 : index
    %332 = vector.load %arg6[%c8_443, %c0_444] : memref<36x8xf32, #tpu.memory_space<vmem>>, vector<4x8xf32>
    tpu.vector_store %arg6[%c8_443, %c0_444], %331 {strides = array<i32>} : memref<36x8xf32, #tpu.memory_space<vmem>>, vector<4x8xf32>,
    %c0_445 = arith.constant 0 : index
    %c8_446 = arith.constant 8 : index
    %c7_447 = arith.constant 7 : index
    %c0_448 = arith.constant 0 : index
    %333 = vector.load %arg4[%c0_445, %c8_446, %c7_447, %c0_448] : memref<1x16x9x9xf32, #tpu.memory_space<vmem>>, vector<1x4x1x8xf32>
    %334 = vector.shape_cast %333 : vector<1x4x1x8xf32> to vector<4x8xf32>
    %c12_449 = arith.constant 12 : index
    %c0_450 = arith.constant 0 : index
    %335 = vector.load %arg6[%c12_449, %c0_450] : memref<36x8xf32, #tpu.memory_space<vmem>>, vector<4x8xf32>
    tpu.vector_store %arg6[%c12_449, %c0_450], %334 {strides = array<i32>} : memref<36x8xf32, #tpu.memory_space<vmem>>, vector<4x8xf32>,
    %c0_451 = arith.constant 0 : index
    %c12_452 = arith.constant 12 : index
    %c7_453 = arith.constant 7 : index
    %c0_454 = arith.constant 0 : index
    %336 = vector.load %arg4[%c0_451, %c12_452, %c7_453, %c0_454] : memref<1x16x9x9xf32, #tpu.memory_space<vmem>>, vector<1x4x1x8xf32>
    %337 = vector.shape_cast %336 : vector<1x4x1x8xf32> to vector<4x8xf32>
    %c16_455 = arith.constant 16 : index
    %c0_456 = arith.constant 0 : index
    %338 = vector.load %arg6[%c16_455, %c0_456] : memref<36x8xf32, #tpu.memory_space<vmem>>, vector<4x8xf32>
    tpu.vector_store %arg6[%c16_455, %c0_456], %337 {strides = array<i32>} : memref<36x8xf32, #tpu.memory_space<vmem>>, vector<4x8xf32>,
    %c0_457 = arith.constant 0 : index
    %c8_458 = arith.constant 8 : index
    %c7_459 = arith.constant 7 : index
    %c1_460 = arith.constant 1 : index
    %339 = vector.load %arg4[%c0_457, %c8_458, %c7_459, %c1_460] : memref<1x16x9x9xf32, #tpu.memory_space<vmem>>, vector<1x4x1x8xf32>
    %340 = vector.shape_cast %339 : vector<1x4x1x8xf32> to vector<4x8xf32>
    %c20_461 = arith.constant 20 : index
    %c0_462 = arith.constant 0 : index
    %341 = vector.load %arg6[%c20_461, %c0_462] : memref<36x8xf32, #tpu.memory_space<vmem>>, vector<4x8xf32>
    tpu.vector_store %arg6[%c20_461, %c0_462], %340 {strides = array<i32>} : memref<36x8xf32, #tpu.memory_space<vmem>>, vector<4x8xf32>,
    %c0_463 = arith.constant 0 : index
    %c0_464 = arith.constant 0 : index
    %c8_465 = arith.constant 8 : index
    %c0_466 = arith.constant 0 : index
    %342 = vector.load %arg4[%c0_463, %c0_464, %c8_465, %c0_466] : memref<1x16x9x9xf32, #tpu.memory_space<vmem>>, vector<1x4x1x8xf32>
    %343 = vector.shape_cast %342 : vector<1x4x1x8xf32> to vector<4x8xf32>
    %c24_467 = arith.constant 24 : index
    %c0_468 = arith.constant 0 : index
    %344 = vector.load %arg6[%c24_467, %c0_468] : memref<36x8xf32, #tpu.memory_space<vmem>>, vector<4x8xf32>
    tpu.vector_store %arg6[%c24_467, %c0_468], %343 {strides = array<i32>} : memref<36x8xf32, #tpu.memory_space<vmem>>, vector<4x8xf32>,
    %c0_469 = arith.constant 0 : index
    %c4_470 = arith.constant 4 : index
    %c8_471 = arith.constant 8 : index
    %c0_472 = arith.constant 0 : index
    %345 = vector.load %arg4[%c0_469, %c4_470, %c8_471, %c0_472] : memref<1x16x9x9xf32, #tpu.memory_space<vmem>>, vector<1x4x1x8xf32>
    %346 = vector.shape_cast %345 : vector<1x4x1x8xf32> to vector<4x8xf32>
    %c28_473 = arith.constant 28 : index
    %c0_474 = arith.constant 0 : index
    %347 = vector.load %arg6[%c28_473, %c0_474] : memref<36x8xf32, #tpu.memory_space<vmem>>, vector<4x8xf32>
    tpu.vector_store %arg6[%c28_473, %c0_474], %346 {strides = array<i32>} : memref<36x8xf32, #tpu.memory_space<vmem>>, vector<4x8xf32>,
    %c0_475 = arith.constant 0 : index
    %c0_476 = arith.constant 0 : index
    %c8_477 = arith.constant 8 : index
    %c1_478 = arith.constant 1 : index
    %348 = vector.load %arg4[%c0_475, %c0_476, %c8_477, %c1_478] : memref<1x16x9x9xf32, #tpu.memory_space<vmem>>, vector<1x4x1x8xf32>
    %349 = vector.shape_cast %348 : vector<1x4x1x8xf32> to vector<4x8xf32>
    %c32_479 = arith.constant 32 : index
    %c0_480 = arith.constant 0 : index
    %350 = vector.load %arg6[%c32_479, %c0_480] : memref<36x8xf32, #tpu.memory_space<vmem>>, vector<4x8xf32>
    tpu.vector_store %arg6[%c32_479, %c0_480], %349 {strides = array<i32>} : memref<36x8xf32, #tpu.memory_space<vmem>>, vector<4x8xf32>,
    %c0_481 = arith.constant 0 : index
    %c0_482 = arith.constant 0 : index
    %351 = vector.load %arg6[%c0_481, %c0_482] : memref<36x8xf32, #tpu.memory_space<vmem>>, vector<36x8xf32>
    %cst_483 = arith.constant dense<0.000000e+00> : vector<4x8xf32>
    %352 = tpu.matmul %0, %351, %cst_483 {dimension_numbers = #tpu.dot_dimension_numbers<[1], [0], [0], [1], [0, 0, 1, 1], [], []>} : vector<4x36xf32>, vector<36x8xf32>, vector<4x8xf32> -> vector<4x8xf32>
    %353 = vector.broadcast %1 : vector<4x1xf32> to vector<4x8xf32>
    %354 = arith.addf %352, %353 : vector<4x8xf32>
    %355 = math.tanh %354 : vector<4x8xf32>
    %c0_484 = arith.constant 0 : index
    %c0_485 = arith.constant 0 : index
    %c56 = arith.constant 56 : index
    %356 = vector.load %arg5[%c0_484, %c0_485, %c56] : memref<1x8x64xf32, #tpu.memory_space<vmem>>, vector<1x4x8xf32>
    %357 = vector.shape_cast %356 : vector<1x4x8xf32> to vector<4x8xf32>
    %358 = vector.shape_cast %355 : vector<4x8xf32> to vector<1x4x8xf32>
    tpu.vector_store %arg5[%c0_484, %c0_485, %c56], %358 {strides = array<i32>} : memref<1x8x64xf32, #tpu.memory_space<vmem>>, vector<1x4x8xf32>,
    %359 = vector.extract_strided_slice %351 {offsets = [16, 0], sizes = [4, 8], strides = [1, 1]} : vector<36x8xf32> to vector<4x8xf32>
    %360 = vector.extract_strided_slice %351 {offsets = [20, 0], sizes = [4, 8], strides = [1, 1]} : vector<36x8xf32> to vector<4x8xf32>
    %361 = arith.maximumf %359, %360 : vector<4x8xf32>
    %362 = vector.extract_strided_slice %351 {offsets = [28, 0], sizes = [4, 8], strides = [1, 1]} : vector<36x8xf32> to vector<4x8xf32>
    %363 = vector.extract_strided_slice %351 {offsets = [32, 0], sizes = [4, 8], strides = [1, 1]} : vector<36x8xf32> to vector<4x8xf32>
    %364 = arith.maximumf %362, %363 : vector<4x8xf32>
    %365 = arith.maximumf %361, %364 : vector<4x8xf32>
    %366 = math.tanh %365 : vector<4x8xf32>
    %c0_486 = arith.constant 0 : index
    %c4_487 = arith.constant 4 : index
    %c56_488 = arith.constant 56 : index
    %367 = vector.load %arg5[%c0_486, %c4_487, %c56_488] : memref<1x8x64xf32, #tpu.memory_space<vmem>>, vector<1x4x8xf32>
    %368 = vector.shape_cast %367 : vector<1x4x8xf32> to vector<4x8xf32>
    %369 = vector.shape_cast %366 : vector<4x8xf32> to vector<1x4x8xf32>
    tpu.vector_store %arg5[%c0_486, %c4_487, %c56_488], %369 {strides = array<i32>} : memref<1x8x64xf32, #tpu.memory_space<vmem>>, vector<1x4x8xf32>,
    return
  }
  func.func @transform_0(%arg0: i32, %arg1: i32) -> (i32, i32) {
    %c0_i32 = arith.constant 0 : i32
    %c0_i32_0 = arith.constant 0 : i32
    %c0_i32_1 = arith.constant 0 : i32
    return %c0_i32, %c0_i32_0 : i32, i32
  }
  func.func @transform_1(%arg0: i32, %arg1: i32) -> (i32, i32) {
    %c0_i32 = arith.constant 0 : i32
    %c0_i32_0 = arith.constant 0 : i32
    %c0_i32_1 = arith.constant 0 : i32
    return %c0_i32, %c0_i32_0 : i32, i32
  }
  func.func @transform_2(%arg0: i32, %arg1: i32) -> (i32, i32, i32, i32) {
    %c0_i32 = arith.constant 0 : i32
    %c0_i32_0 = arith.constant 0 : i32
    %c0_i32_1 = arith.constant 0 : i32
    %c0_i32_2 = arith.constant 0 : i32
    return %arg0, %c0_i32, %c0_i32_0, %c0_i32_1 : i32, i32, i32, i32
  }
  func.func @transform_3(%arg0: i32, %arg1: i32) -> (i32, i32, i32) {
    %c0_i32 = arith.constant 0 : i32
    %c0_i32_0 = arith.constant 0 : i32
    return %arg0, %c0_i32, %arg1 : i32, i32, i32
  }
}

</mosaic_0001>

<bundles_post_ra>
// kernel: tpu_custom_call.1
= control target key start
LH: loop header
LB: loop body
LE: loop exit
PB: predicated region body
PF: predicated region fallthrough
CT: control target
= control target key end

     0   :  { %8 = vsyncpa [#allocation4], 0  ;;  %s3216_s0 = inlined_call_operand.vmem [shape: f32[4,36], index: 0, kind: input, shape index: {}]   ;;  %s3217_s1 = inlined_call_operand.vmem [shape: f32[4,1], index: 1, kind: input, shape index: {}]   ;;  %s3218_s2 = inlined_call_operand.vmem [shape: f32[2,16,9,9], index: 2, kind: input, shape index: {}]   ;;  %s3219_s3 = inlined_call_operand.hbm [shape: f32[2,8,64], index: 3, kind: output, shape index: {}]  }
   0x1   :  { %10 = vsyncpa [#allocation4 + $0x1], 0  ;;  %s2289_s12 = smov 0   ;;  %s2291_s13 = smov 0  }
   0x2   :  { %s2293_s14 = smov 0   ;;  %s2295_s15 = smov 0  }
   0x3   :  { %s2297_s16 = smov 0   ;;  %s2299_s17 = smov 0  }
   0x4 LB: > { %s1894_s18 = sadd.s32 4294967295, %s2258_s17   ;;  %s1895_s19 = sadd.s32 4294967294, %s2258_s17   ;;  %s2258_s17 = sphi %s2299_s17, %s16_s17   ;;  %s2254_s16 = sphi %s2297_s16, %s3226_s16   ;;  %s2250_s15 = sphi %s2295_s15, %s3225_s15   ;;  %s2246_s14 = sphi %s2293_s14, %s3224_s14   ;;  %s2242_s13 = sphi %s2291_s13, %s3223_s13   ;;  %s2238_s12 = sphi %s2289_s12, %s3222_s12  }
   0x5   : > { %s28_s20 = sadd.s32 1, %s2254_s16  ;;  %s105_s21 = sadd.s32 1, %s2246_s14 }
   0x6   : > { %p30_p0 = scmp.ge.s32.totalorder %s28_s20, 2  ;;  %p115_p1 = scmp.ne.s32.totalorder %s2246_s14, %s2242_s13 }
   0x7   : > { %p116_p2 = scmp.eq.s32.totalorder %s1894_s18, 1  ;;  %p121_p3 = scmp.ne.s32.totalorder %s2242_s13, %s2238_s12 }
   0x8   : > { %s3228_s20 = smov (%p30_p0, %s28_s20), 0  ;;  %p122_p5 = scmp.eq.s32.totalorder %s1895_s19, 1 }
   0x9   : > { %p2329_p4 = por %p116_p2, %p115_p1  ;;  %s100_s23 = ssub.s32 %s2254_s16, %s3228_s20 }
   0xa   : > { %p1898_p6 = scmp.ge.s32.totalorder %s2258_s17, 1  ;;  %p103_p7 = scmp.eq.s32.totalorder %s100_s23, 0 }
   0xb   : > { %p2336_p8 = por %p122_p5, %p121_p3  ;;  %p154_p9 = scmp.lt.s32.totalorder %s2258_s17, 3 }
   0xc   : > { %s2342_s25 = scalar_select %p103_p7, %s2246_s14, %s105_s21  }
   0xd   : > { %p155_p10 = pnand %p1898_p6, %p154_p9 }
   0xe   : > { %p178_p11 = scmp.lt.s32.totalorder (!%p155_p10), %s2250_s15, 1  ;;  %s2260_s4 = smov (!%p155_p10), 127  }
   0xf   : > { %158 = sbr.rel (%p155_p10) target bundleno = 498 (0x1f2), region = 32  ;;  %s2261_s7 = smov (!%p155_p10), 8  }
  0x10   : > { %s2263_s10 = smov (!%p155_p10), 16   ;;  %s2264_s11 = smov (!%p155_p10), 24  }
  0x11   : > { %s2265_s18 = smov (!%p155_p10), 32   ;;  %s175_s19 = sand.u32 (!%p155_p10), 1, %s2242_s13  }
  0x12   : > { %s2266_s21 = smov (!%p155_p10), 40   ;;  %s1899_s23 = sshll.u32 (!%p155_p10), %s175_s19, 3 }
  0x13   : > { %s2268_s28 = smov (!%p155_p10), 56   ;;  %s2079_s29 = sshll.u32 (!%p155_p10), %s2250_s15, 3 }
  0x14   : > { %s179_s26 = scalar_select %p178_p11, %s2250_s15, 1  ;;  %vm194_vm0 = vcmask 1041409   ;;  %vm197_vm1 = vcmask 1042434   ;;  %vm200_vm2 = vcmask 1043459   ;;  %vm203_vm3 = vcmask 60416  }
  0x15   : > { %vm356_vm4 = vcmask 1043456   ;;  %vm352_vm5 = vcmask 293888   ;;  %vm578_vm6 = vcmask 126016   ;;  %vm780_vm7 = vcmask 191616   ;;  %s1821_s5 = scalar_lea.hbm %s3219_s3, %s2079_s29  ;;  %s1810_s8 = scalar_lea.sflag [#allocation4], %s175_s19 }
  0x16   : > { %s2082_s27 = sshll.u32 %s179_s26, 8  ;;  %s3132_s26 = scalar_lea.vmem [#allocation3], %s1899_s23  ;;  %vm982_vm8 = vcmask 257216   ;;  %vm1184_vm9 = vcmask 322816   ;;  %vm1386_vm10 = vcmask 388416   ;;  %vm1588_vm11 = vcmask 454016  }
  0x17   : > { %s2349_s30 = scalar_lea.vmem %s3218_s2, %s2082_s27  ;;  %s2267_s27 = smov 48   ;;  %vm1790_vm12 = vcmask 519616  }
  0x18   : > { %v324_v0 = vld [vmem:[%s2349_s30 + $0x1] sm:$0x1]  ;;  %v325_v1 = vld [vmem:[%s2349_s30 + $0x11] sm:$0x1]  ;;  %v222_v6 = vld [vmem:[%s2349_s30] sm:$0x1] }
  0x19   : > { %v326_v2 = vld [vmem:[%s2349_s30 + $0x21] sm:$0x1]  ;;  %v327_v3 = vld [vmem:[%s2349_s30 + $0x31] sm:$0x1]  ;;  %v332_v4 = vrot.slane %v325_v1, 7  ;;  %s1823_s6 = sshll.u32 %s3132_s26, 4  ;;  %s1824_s6 = int_to_ptr.vmem [resolvable:$true] %s1823_s6 }
  0x1a   : > { %v334_v5 = vrot.slane %v326_v2, 6  ;;  %v336_v7 = vrot.slane %v327_v3, 5  ;;  %v223_v8 = vld [vmem:[%s2349_s30 + $0x10] sm:$0x1]  ;;  %v224_v9 = vld [vmem:[%s2349_s30 + $0x20] sm:$0x1] }
  0x1b   : > { %v333_v10 = vsel %vm194_vm0, %v332_v4, %v324_v0  ;;  %v225_v11 = vld [vmem:[%s2349_s30 + $0x30] sm:$0x1]  ;;  %v230_v12 = vrot.slane %v223_v8, 7  ;;  %v232_v13 = vrot.slane %v224_v9, 6  ;;  %v1914_v14 = vld [vmem:[%s2349_s30 + $0x80] sm:$0x1] }
  0x1c   : > { %v335_v15 = vsel %vm197_vm1, %v334_v5, %v333_v10  ;;  %v234_v16 = vrot.slane %v225_v11, 5  ;;  %v1915_v17 = vld [vmem:[%s2349_s30 + $0x90] sm:$0x1]  ;;  %v1916_v18 = vld [vmem:[%s2349_s30 + $0xa0] sm:$0x1] }
  0x1d   : > { %v337_v19 = vsel %vm200_vm2, %v336_v7, %v335_v15  ;;  %v231_v20 = vsel %vm194_vm0, %v230_v12, %v222_v6  ;;  %v1917_v21 = vld [vmem:[%s2349_s30 + $0xb0] sm:$0x1]  ;;  %v282_v22 = vrot.slane %v1915_v17, 7  ;;  %v284_v23 = vrot.slane %v1916_v18, 6  ;;  %v527_v24 = vld [vmem:[%s2349_s30 + $0x2] sm:$0x1] }
  0x1e   : > { %338 = vrot.lane.b32.xlu0 %v337_v19, %s2260_s4  ;;  %v233_v25 = vsel %vm197_vm1, %v232_v13, %v231_v20  ;;  %v286_v26 = vrot.slane %v1917_v21, 5  ;;  %v528_v27 = vld [vmem:[%s2349_s30 + $0x12] sm:$0x1]  ;;  %v529_v28 = vld [vmem:[%s2349_s30 + $0x22] sm:$0x1] }
  0x1f   : > { %v235_v29 = vsel %vm200_vm2, %v234_v16, %v233_v25  ;;  %v283_v30 = vsel %vm194_vm0, %v282_v22, %v1914_v14  ;;  %v530_v31 = vld [vmem:[%s2349_s30 + $0x32] sm:$0x1]  ;;  %v535_v32 = vrot.slane %v528_v27, 7  ;;  %v537_v33 = vrot.slane %v529_v28, 6  ;;  %v730_v35 = vld [vmem:[%s2349_s30 + $0x13] sm:$0x1] }
  0x20   : > { %236 = vrot.lane.b32.xlu1 %v235_v29, %s2260_s4  ;;  %v285_v34 = vsel %vm197_vm1, %v284_v23, %v283_v30  ;;  %v539_v37 = vrot.slane %v530_v31, 5  ;;  %v731_v38 = vld [vmem:[%s2349_s30 + $0x23] sm:$0x1]  ;;  %v737_v39 = vrot.slane %v730_v35, 7  ;;  %v1959_v42 = vld [vmem:[%s2349_s30 + $0x92] sm:$0x1] }
  0x21   : > { %v536_v36 = vsel %vm194_vm0, %v535_v32, %v527_v24  ;;  %v729_v41 = vld [vmem:[%s2349_s30 + $0x3] sm:$0x1]  ;;  %v287_v43 = vsel %vm200_vm2, %v286_v26, %v285_v34  ;;  %v1960_v44 = vld [vmem:[%s2349_s30 + $0xa2] sm:$0x1]  ;;  %v687_v45 = vrot.slane %v1959_v42, 7  ;;  %v739_v47 = vrot.slane %v731_v38, 6 }
  0x22   : > { %v538_v40 = vsel %vm197_vm1, %v537_v33, %v536_v36  ;;  %v732_v46 = vld [vmem:[%s2349_s30 + $0x33] sm:$0x1]  ;;  %v1958_v48 = vld [vmem:[%s2349_s30 + $0x82] sm:$0x1]  ;;  %v738_v50 = vsel %vm194_vm0, %v737_v39, %v729_v41  ;;  %v1961_v51 = vld [vmem:[%s2349_s30 + $0xb2] sm:$0x1] }
  0x23   : > { %v540_v49 = vsel %vm200_vm2, %v539_v37, %v538_v40  ;;  %v689_v52 = vrot.slane %v1960_v44, 6  ;;  %v932_v53 = vld [vmem:[%s2349_s30 + $0x14] sm:$0x1]  ;;  %v741_v54 = vrot.slane %v732_v46, 5  ;;  %v688_v55 = vsel %vm194_vm0, %v687_v45, %v1958_v48  ;;  %v933_v56 = vld [vmem:[%s2349_s30 + $0x24] sm:$0x1] }
  0x24   : > { %v1981_v57 = vld [vmem:[%s2349_s30 + $0x93] sm:$0x1]  ;;  %v740_v58 = vsel %vm197_vm1, %v739_v47, %v738_v50  ;;  %v1936_v59 = vld [vmem:[%s2349_s30 + $0x81] sm:$0x1]  ;;  %v1937_v60 = vld [vmem:[%s2349_s30 + $0x91] sm:$0x1] }
  0x25   : > { %v1938_v61 = vld [vmem:[%s2349_s30 + $0xa1] sm:$0x1]  ;;  %v691_v62 = vrot.slane %v1961_v51, 5  ;;  %v939_v63 = vrot.slane %v932_v53, 7  ;;  %v1939_v0 = vld [vmem:[%s2349_s30 + $0xb1] sm:$0x1]  ;;  %v690_v3 = vsel %vm197_vm1, %v689_v52, %v688_v55  ;;  %v742_v6 = vsel %vm200_vm2, %v741_v54, %v740_v58 }
  0x26   : > { %288 = vrot.lane.b32.xlu0 %v287_v43, %s2260_s4  ;;  %v485_v1 = vrot.slane %v1937_v60, 7  ;;  %v487_v2 = vrot.slane %v1938_v61, 6  ;;  %v931_v4 = vld [vmem:[%s2349_s30 + $0x4] sm:$0x1]  ;;  %v489_v5 = vrot.slane %v1939_v0, 5  ;;  %v889_v8 = vrot.slane %v1981_v57, 7 }
  0x27   : > { %v1982_v7 = vld [vmem:[%s2349_s30 + $0xa3] sm:$0x1]  ;;  %v934_v10 = vld [vmem:[%s2349_s30 + $0x34] sm:$0x1]  ;;  %v941_v11 = vrot.slane %v933_v56, 6  ;;  %v692_v14 = vsel %vm200_vm2, %v691_v62, %v690_v3  ;;  %v940_v15 = vsel %vm194_vm0, %v939_v63, %v931_v4 }
  0x28   : > { %541 = vrot.lane.b32.xlu1 %v540_v49, %s2260_s4  ;;  %v486_v9 = vsel %vm194_vm0, %v485_v1, %v1936_v59  ;;  %v1980_v12 = vld [vmem:[%s2349_s30 + $0x83] sm:$0x1]  ;;  %v1983_v16 = vld [vmem:[%s2349_s30 + $0xb3] sm:$0x1]  ;;  %v1134_v18 = vld [vmem:[%s2349_s30 + $0x15] sm:$0x1] }
  0x29   : > { %v488_v13 = vsel %vm197_vm1, %v487_v2, %v486_v9  ;;  %v427_v19 = vld [vmem:[%s2349_s30 + $0x1] sm:$0x1]  ;;  %v891_v20 = vrot.slane %v1982_v7, 6  ;;  %v428_v21 = vld [vmem:[%s2349_s30 + $0x11] sm:$0x1]  ;;  %v943_v23 = vrot.slane %v934_v10, 5  ;;  %v890_v24 = vsel %vm194_vm0, %v889_v8, %v1980_v12 }
  0x2a   : > { %v490_v17 = vsel %vm200_vm2, %v489_v5, %v488_v13  ;;  %v429_v22 = vld [vmem:[%s2349_s30 + $0x21] sm:$0x1]  ;;  %v430_v25 = vld [vmem:[%s2349_s30 + $0x31] sm:$0x1]  ;;  %v435_v26 = vrot.slane %v428_v21, 7  ;;  %v942_v28 = vsel %vm197_vm1, %v941_v11, %v940_v15  ;;  %v893_v32 = vrot.slane %v1983_v16, 5 }
  0x2b   : > { %491 = vrot.lane.b32.xlu2 %v490_v17, %s2260_s4  ;;  %v437_v27 = vrot.slane %v429_v22, 6  ;;  %v1135_v29 = vld [vmem:[%s2349_s30 + $0x25] sm:$0x1]  ;;  %v2003_v30 = vld [vmem:[%s2349_s30 + $0x94] sm:$0x1]  ;;  %v439_v31 = vrot.slane %v430_v25, 5  ;;  %v892_v35 = vsel %vm197_vm1, %v891_v20, %v890_v24  ;;  %v944_v39 = vsel %vm200_vm2, %v943_v23, %v942_v28 }
  0x2c   : > { %v1141_v33 = vrot.slane %v1134_v18, 7  ;;  %v436_v34 = vsel %vm194_vm0, %v435_v26, %v427_v19  ;;  %v1133_v36 = vld [vmem:[%s2349_s30 + $0x5] sm:$0x1]  ;;  %v1136_v37 = vld [vmem:[%s2349_s30 + $0x35] sm:$0x1]  ;;  %v1143_v40 = vrot.slane %v1135_v29, 6  ;;  %v894_v48 = vsel %vm200_vm2, %v893_v32, %v892_v35 }
  0x2d   : > { %v438_v38 = vsel %vm197_vm1, %v437_v27, %v436_v34  ;;  %v2002_v41 = vld [vmem:[%s2349_s30 + $0x84] sm:$0x1]  ;;  %v1091_v43 = vrot.slane %v2003_v30, 7  ;;  %v629_v45 = vld [vmem:[%s2349_s30 + $0x2] sm:$0x1]  ;;  %v1145_v56 = vrot.slane %v1136_v37, 5 }
  0x2e   : > { %743 = vrot.lane.b32.xlu0 %v742_v6, %s2260_s4  ;;  %v2004_v42 = vld [vmem:[%s2349_s30 + $0xa4] sm:$0x1]  ;;  %v440_v44 = vsel %vm200_vm2, %v439_v31, %v438_v38  ;;  %v630_v46 = vld [vmem:[%s2349_s30 + $0x12] sm:$0x1]  ;;  %v631_v47 = vld [vmem:[%s2349_s30 + $0x22] sm:$0x1]  ;;  %v1142_v49 = vsel %vm194_vm0, %v1141_v33, %v1133_v36 }
  0x2f   : > { %v632_v50 = vld [vmem:[%s2349_s30 + $0x32] sm:$0x1]  ;;  %v637_v51 = vrot.slane %v630_v46, 7  ;;  %v639_v52 = vrot.slane %v631_v47, 6  ;;  %v2005_v53 = vld [vmem:[%s2349_s30 + $0xb4] sm:$0x1]  ;;  %v1092_v57 = vsel %vm194_vm0, %v1091_v43, %v2002_v41  ;;  %v1144_v60 = vsel %vm197_vm1, %v1143_v40, %v1142_v49 }
  0x30   : > { %693 = vrot.lane.b32.xlu1 %v692_v14, %s2260_s4  ;;  %v1093_v54 = vrot.slane %v2004_v42, 6  ;;  %v1336_v55 = vld [vmem:[%s2349_s30 + $0x16] sm:$0x1]  ;;  %v641_v59 = vrot.slane %v632_v50, 5  ;;  %v2025_v61 = vld [vmem:[%s2349_s30 + $0x95] sm:$0x1]  ;;  %v1146_v7 = vsel %vm200_vm2, %v1145_v56, %v1144_v60 }
  0x31   : > { %v638_v58 = vsel %vm194_vm0, %v637_v51, %v629_v45  ;;  %v1095_v63 = vrot.slane %v2005_v53, 5  ;;  %v1335_v0 = vld [vmem:[%s2349_s30 + $0x6] sm:$0x1]  ;;  %v1343_v2 = vrot.slane %v1336_v55, 7  ;;  %v831_v4 = vld [vmem:[%s2349_s30 + $0x3] sm:$0x1] }
  0x32   : > { %v640_v62 = vsel %vm197_vm1, %v639_v52, %v638_v58  ;;  %v1337_v1 = vld [vmem:[%s2349_s30 + $0x26] sm:$0x1]  ;;  %v1094_v3 = vsel %vm197_vm1, %v1093_v54, %v1092_v57  ;;  %v832_v5 = vld [vmem:[%s2349_s30 + $0x13] sm:$0x1]  ;;  %v833_v6 = vld [vmem:[%s2349_s30 + $0x23] sm:$0x1] }
  0x33   : > { %441 = vrot.lane.b32.xlu2 %v440_v44, %s2260_s4  ;;  %v1338_v8 = vld [vmem:[%s2349_s30 + $0x36] sm:$0x1]  ;;  %v2026_v9 = vld [vmem:[%s2349_s30 + $0xa5] sm:$0x1]  ;;  %v1293_v10 = vrot.slane %v2025_v61, 7  ;;  %v642_v11 = vsel %vm200_vm2, %v641_v59, %v640_v62  ;;  %v839_v12 = vrot.slane %v832_v5, 7  ;;  %v1096_v17 = vsel %vm200_vm2, %v1095_v63, %v1094_v3 }
  0x34   : > { %v1345_v13 = vrot.slane %v1337_v1, 6  ;;  %v2024_v14 = vld [vmem:[%s2349_s30 + $0x85] sm:$0x1]  ;;  %v834_v15 = vld [vmem:[%s2349_s30 + $0x33] sm:$0x1]  ;;  %v841_v16 = vrot.slane %v833_v6, 6  ;;  %v1344_v18 = vsel %vm194_vm0, %v1343_v2, %v1335_v0 }
  0x35   : > { %v2027_v19 = vld [vmem:[%s2349_s30 + $0xb5] sm:$0x1]  ;;  %v840_v20 = vsel %vm194_vm0, %v839_v12, %v831_v4  ;;  %v1295_v21 = vrot.slane %v2026_v9, 6  ;;  %v1538_v22 = vld [vmem:[%s2349_s30 + $0x17] sm:$0x1]  ;;  %v1347_v23 = vrot.slane %v1338_v8, 5  ;;  %v1294_v24 = vsel %vm194_vm0, %v1293_v10, %v2024_v14 }
  0x36   : > { %945 = vrot.lane.b32.xlu0 %v944_v39, %s2260_s4  ;;  %v843_v25 = vrot.slane %v834_v15, 5  ;;  %v1346_v26 = vsel %vm197_vm1, %v1345_v13, %v1344_v18  ;;  %v1297_v27 = vrot.slane %v2027_v19, 5  ;;  %v2047_v28 = vld [vmem:[%s2349_s30 + $0x96] sm:$0x1]  ;;  %v842_v29 = vsel %vm197_vm1, %v841_v16, %v840_v20  ;;  %v1034_v30 = vld [vmem:[%s2349_s30 + $0x14] sm:$0x1] }
  0x37   : > { %v1539_v31 = vld [vmem:[%s2349_s30 + $0x27] sm:$0x1]  ;;  %v1545_v32 = vrot.slane %v1538_v22, 7  ;;  %v1035_v33 = vld [vmem:[%s2349_s30 + $0x24] sm:$0x1]  ;;  %v1041_v34 = vrot.slane %v1034_v30, 7  ;;  %v1296_v35 = vsel %vm197_vm1, %v1295_v21, %v1294_v24  ;;  %v1348_v38 = vsel %vm200_vm2, %v1347_v23, %v1346_v26 }
  0x38   : > { %895 = vrot.lane.b32.xlu1 %v894_v48, %s2260_s4  ;;  %v1537_v36 = vld [vmem:[%s2349_s30 + $0x7] sm:$0x1]  ;;  %v1033_v37 = vld [vmem:[%s2349_s30 + $0x4] sm:$0x1]  ;;  %v1540_v39 = vld [vmem:[%s2349_s30 + $0x37] sm:$0x1]  ;;  %v844_v42 = vsel %vm200_vm2, %v843_v25, %v842_v29  ;;  %v1298_v47 = vsel %vm200_vm2, %v1297_v27, %v1296_v35 }
  0x39   : > { %v2048_v40 = vld [vmem:[%s2349_s30 + $0xa6] sm:$0x1]  ;;  %v1495_v41 = vrot.slane %v2047_v28, 7  ;;  %v1547_v43 = vrot.slane %v1539_v31, 6  ;;  %v1036_v45 = vld [vmem:[%s2349_s30 + $0x34] sm:$0x1]  ;;  %v1546_v48 = vsel %vm194_vm0, %v1545_v32, %v1537_v36  ;;  %v1042_v50 = vsel %vm194_vm0, %v1041_v34, %v1033_v37 }
  0x3a   : > { %v2046_v44 = vld [vmem:[%s2349_s30 + $0x86] sm:$0x1]  ;;  %v1043_v46 = vrot.slane %v1035_v33, 6  ;;  %v2049_v49 = vld [vmem:[%s2349_s30 + $0xb6] sm:$0x1]  ;;  %v1497_v51 = vrot.slane %v2048_v40, 6 }
  0x3b   : > { %643 = vrot.lane.b32.xlu2 %v642_v11, %s2260_s4  ;;  %v1740_v52 = vld [vmem:[%s2349_s30 + $0x18] sm:$0x1]  ;;  %v1236_v53 = vld [vmem:[%s2349_s30 + $0x15] sm:$0x1]  ;;  %v1549_v54 = vrot.slane %v1540_v39, 5  ;;  %v1496_v55 = vsel %vm194_vm0, %v1495_v41, %v2046_v44  ;;  %v1045_v56 = vrot.slane %v1036_v45, 5  ;;  %v1548_v57 = vsel %vm197_vm1, %v1547_v43, %v1546_v48 }
  0x3c   : > { %v1499_v58 = vrot.slane %v2049_v49, 5  ;;  %v2069_v59 = vld [vmem:[%s2349_s30 + $0x97] sm:$0x1]  ;;  %v1044_v60 = vsel %vm197_vm1, %v1043_v46, %v1042_v50  ;;  %v1741_v61 = vld [vmem:[%s2349_s30 + $0x28] sm:$0x1]  ;;  %v1747_v62 = vrot.slane %v1740_v52, 7  ;;  %v1498_v1 = vsel %vm197_vm1, %v1497_v51, %v1496_v55 }
  0x3d   : > { %v1237_v63 = vld [vmem:[%s2349_s30 + $0x25] sm:$0x1]  ;;  %v1243_v0 = vrot.slane %v1236_v53, 7  ;;  %v1739_v2 = vld [vmem:[%s2349_s30 + $0x8] sm:$0x1]  ;;  %v1550_v4 = vsel %vm200_vm2, %v1549_v54, %v1548_v57  ;;  %v1046_v8 = vsel %vm200_vm2, %v1045_v56, %v1044_v60  ;;  %v1749_v9 = vrot.slane %v1741_v61, 6 }
  0x3e   : > { %1147 = vrot.lane.b32.xlu0 %v1146_v7, %s2260_s4  ;;  %v1235_v3 = vld [vmem:[%s2349_s30 + $0x5] sm:$0x1]  ;;  %v1742_v5 = vld [vmem:[%s2349_s30 + $0x38] sm:$0x1]  ;;  %v2070_v6 = vld [vmem:[%s2349_s30 + $0xa7] sm:$0x1]  ;;  %v1500_v13 = vsel %vm200_vm2, %v1499_v58, %v1498_v1  ;;  %v1748_v14 = vsel %vm194_vm0, %v1747_v62, %v1739_v2 }
  0x3f   : > { %v1697_v7 = vrot.slane %v2069_v59, 7  ;;  %v2068_v10 = vld [vmem:[%s2349_s30 + $0x87] sm:$0x1]  ;;  %v1238_v11 = vld [vmem:[%s2349_s30 + $0x35] sm:$0x1]  ;;  %v1245_v12 = vrot.slane %v1237_v63, 6  ;;  %v1244_v15 = vsel %vm194_vm0, %v1243_v0, %v1235_v3  ;;  %v1750_v22 = vsel %vm197_vm1, %v1749_v9, %v1748_v14 }
  0x40   : > { %1097 = vrot.lane.b32.xlu1 %v1096_v17, %s2260_s4  ;;  %v2071_v16 = vld [vmem:[%s2349_s30 + $0xb7] sm:$0x1]  ;;  %v1699_v17 = vrot.slane %v2070_v6, 6  ;;  %v1438_v18 = vld [vmem:[%s2349_s30 + $0x16] sm:$0x1]  ;;  %v1751_v19 = vrot.slane %v1742_v5, 5 }
  0x41   : > { %v1698_v20 = vsel %vm194_vm0, %v1697_v7, %v2068_v10  ;;  %v1247_v21 = vrot.slane %v1238_v11, 5  ;;  %v1246_v23 = vsel %vm197_vm1, %v1245_v12, %v1244_v15  ;;  %v1701_v24 = vrot.slane %v2071_v16, 5  ;;  %v1439_v25 = vld [vmem:[%s2349_s30 + $0x26] sm:$0x1]  ;;  %v1440_v31 = vld [vmem:[%s2349_s30 + $0x36] sm:$0x1] }
  0x42   : > { %v1445_v26 = vrot.slane %v1438_v18, 7  ;;  %v1700_v27 = vsel %vm197_vm1, %v1699_v17, %v1698_v20  ;;  %v1437_v28 = vld [vmem:[%s2349_s30 + $0x6] sm:$0x1]  ;;  %v1752_v29 = vsel %vm200_vm2, %v1751_v19, %v1750_v22  ;;  %v1447_v32 = vrot.slane %v1439_v25, 6  ;;  %v1640_v35 = vld [vmem:[%s2349_s30 + $0x17] sm:$0x1] }
  0x43   : > { %845 = vrot.lane.b32.xlu2 %v844_v42, %s2260_s4  ;;  %v1248_v30 = vsel %vm200_vm2, %v1247_v21, %v1246_v23  ;;  %v1702_v33 = vsel %vm200_vm2, %v1701_v24, %v1700_v27  ;;  %v1449_v36 = vrot.slane %v1440_v31, 5  ;;  %v1647_v39 = vrot.slane %v1640_v35, 7  ;;  %v1639_v40 = vld [vmem:[%s2349_s30 + $0x7] sm:$0x1]  ;;  %v1642_v42 = vld [vmem:[%s2349_s30 + $0x37] sm:$0x1] }
  0x44   : > { %v1446_v34 = vsel %vm194_vm0, %v1445_v26, %v1437_v28  ;;  %v1651_v45 = vrot.slane %v1642_v42, 5  ;;  %v293_v48 = vld [vmem:[%s2349_s30 + $0x11] sm:$0x1]  ;;  %v1907_v50 = vld [vmem:[%s2349_s30 + $0x90] sm:$0x1] }
  0x45   : > { %v1448_v37 = vsel %vm197_vm1, %v1447_v32, %v1446_v34  ;;  %v1648_v44 = vsel %vm194_vm0, %v1647_v39, %v1639_v40  ;;  %v1919_v49 = vld [vmem:[%s2349_s30 + $0x51] sm:$0x1]  ;;  %v294_v51 = vld [vmem:[%s2349_s30 + $0x21] sm:$0x1]  ;;  %v300_v52 = vrot.slane %v293_v48, 7  ;;  %v249_v55 = vrot.slane %v1907_v50, 7 }
  0x46   : > { %1349 = vrot.lane.b32.xlu0 %v1348_v38, %s2260_s4  ;;  %v1641_v38 = vld [vmem:[%s2349_s30 + $0x27] sm:$0x1]  ;;  %v1450_v41 = vsel %vm200_vm2, %v1449_v36, %v1448_v37  ;;  %v316_v53 = vrot.slane %v1919_v49, 7  ;;  %v1908_v54 = vld [vmem:[%s2349_s30 + $0xa0] sm:$0x1]  ;;  %v302_v57 = vrot.slane %v294_v51, 6 }
  0x47   : > { %v1649_v43 = vrot.slane %v1641_v38, 6  ;;  %v292_v56 = vld [vmem:[%s2349_s30 + $0x1] sm:$0x1]  ;;  %v1906_v58 = vld [vmem:[%s2349_s30 + $0x80] sm:$0x1]  ;;  %v251_v60 = vrot.slane %v1908_v54, 6 }
  0x48   : > { %1299 = vrot.lane.b32.xlu1 %v1298_v47, %s2260_s4  ;;  %v1909_v59 = vld [vmem:[%s2349_s30 + $0xb0] sm:$0x1]  ;;  %v301_v61 = vsel %vm194_vm0, %v300_v52, %v292_v56  ;;  %v250_v62 = vsel %vm194_vm0, %v249_v55, %v1906_v58  ;;  %v295_v0 = vld [vmem:[%s2349_s30 + $0x31] sm:$0x1]  ;;  %v1918_v2 = vld [vmem:[%s2349_s30 + $0x41] sm:$0x1] }
  0x49   : > { %v1650_v46 = vsel %vm197_vm1, %v1649_v43, %v1648_v44  ;;  %v253_v63 = vrot.slane %v1909_v59, 5  ;;  %v303_v1 = vsel %vm197_vm1, %v302_v57, %v301_v61  ;;  %v252_v3 = vsel %vm197_vm1, %v251_v60, %v250_v62  ;;  %v1920_v6 = vld [vmem:[%s2349_s30 + $0x61] sm:$0x1]  ;;  %v1912_v9 = vld [vmem:[%s2349_s30 + $0xe0] sm:$0x1] }
  0x4a   : > { %v1652_v47 = vsel %vm200_vm2, %v1651_v45, %v1650_v46  ;;  %v304_v5 = vrot.slane %v295_v0, 5  ;;  %v317_v7 = vsel %vm194_vm0, %v316_v53, %v1918_v2  ;;  %v1921_v11 = vld [vmem:[%s2349_s30 + $0x71] sm:$0x1]  ;;  %v318_v12 = vrot.slane %v1920_v6, 6  ;;  %v1913_v14 = vld [vmem:[%s2349_s30 + $0xf0] sm:$0x1] }
  0x4b   : > { %1047 = vrot.lane.b32.xlu2 %v1046_v8, %s2260_s4  ;;  %v254_v8 = vsel %vm200_vm2, %v253_v63, %v252_v3  ;;  %v268_v17 = vrot.slane %v1912_v9, 6  ;;  %v270_v18 = vrot.slane %v1913_v14, 5  ;;  %v320_v20 = vrot.slane %v1921_v11, 5  ;;  %v496_v24 = vld [vmem:[%s2349_s30 + $0x12] sm:$0x1] }
  0x4c   : > { %256 = vst.msk [vmem:[#allocation2 + $0xc] sm:$0xf] %vm203_vm3, %v254_v8  ;;  %v305_v15 = vsel %vm200_vm2, %v304_v5, %v303_v1  ;;  %v319_v19 = vsel %vm197_vm1, %v318_v12, %v317_v7  ;;  %v497_v25 = vld [vmem:[%s2349_s30 + $0x22] sm:$0x1]  ;;  %v1941_v26 = vld [vmem:[%s2349_s30 + $0x52] sm:$0x1] }
  0x4d   : > { %307 = vst.msk [vmem:[#allocation2 + $0x18] sm:$0xf] %vm203_vm3, %v305_v15  ;;  %v321_v23 = vsel %vm200_vm2, %v320_v20, %v319_v19  ;;  %v495_v27 = vld [vmem:[%s2349_s30 + $0x2] sm:$0x1]  ;;  %v503_v28 = vrot.slane %v496_v24, 7  ;;  %v519_v32 = vrot.slane %v1941_v26, 7 }
  0x4e   : > { %1551 = vrot.lane.b32.xlu0 %v1550_v4, %s2260_s4  ;;  %v1911_v4 = vld [vmem:[%s2349_s30 + $0xd0] sm:$0x1]  ;;  %323 = vst.msk [vmem:[#allocation2 + $0x1c] sm:$0xf] %vm203_vm3, %v321_v23  ;;  %v1940_v35 = vld [vmem:[%s2349_s30 + $0x42] sm:$0x1] }
  0x4f   : > { %v266_v10 = vrot.slane %v1911_v4, 7  ;;  %v504_v31 = vsel %vm194_vm0, %v503_v28, %v495_v27  ;;  %v1942_v37 = vld [vmem:[%s2349_s30 + $0x62] sm:$0x1]  ;;  %v1943_v38 = vld [vmem:[%s2349_s30 + $0x72] sm:$0x1]  ;;  %v520_v39 = vsel %vm194_vm0, %v519_v32, %v1940_v35 }
  0x50   : > { %1501 = vrot.lane.b32.xlu1 %v1500_v13, %s2260_s4  ;;  %v1910_v13 = vld [vmem:[%s2349_s30 + $0xc0] sm:$0x1]  ;;  %v523_v42 = vrot.slane %v1943_v38, 5  ;;  %v698_v43 = vld [vmem:[%s2349_s30 + $0x13] sm:$0x1] }
  0x51   : > { %v267_v16 = vsel %vm194_vm0, %v266_v10, %v1910_v13  ;;  %v1963_v44 = vld [vmem:[%s2349_s30 + $0x53] sm:$0x1]  ;;  %v699_v46 = vld [vmem:[%s2349_s30 + $0x23] sm:$0x1]  ;;  %v2602_v57 = vld [vmem:[%s2349_s30 + $0xd1] sm:$0x1] }
  0x52   : > { %v269_v21 = vsel %vm197_vm1, %v268_v17, %v267_v16  ;;  %v697_v49 = vld [vmem:[%s2349_s30 + $0x3] sm:$0x1]  ;;  %v707_v50 = vrot.slane %v699_v46, 6  ;;  %v721_v52 = vrot.slane %v1963_v44, 7  ;;  %v700_v53 = vld [vmem:[%s2349_s30 + $0x33] sm:$0x1] }
  0x53   : > { %1249 = vrot.lane.b32.xlu2 %v1248_v30, %s2260_s4  ;;  %v271_v22 = vsel %vm200_vm2, %v270_v18, %v269_v21  ;;  %v498_v30 = vld [vmem:[%s2349_s30 + $0x32] sm:$0x1]  ;;  %v709_v55 = vrot.slane %v700_v53, 5  ;;  %v1962_v56 = vld [vmem:[%s2349_s30 + $0x43] sm:$0x1]  ;;  %v469_v4 = vrot.slane %v2602_v57, 7 }
  0x54   : > { %273 = vst.msk [vmem:[#allocation2 + $0x10] sm:$0xf] %vm203_vm3, %v271_v22  ;;  %v507_v34 = vrot.slane %v498_v30, 5  ;;  %v2605_v58 = vld [vmem:[%s2349_s30 + $0xe1] sm:$0x1]  ;;  %v722_v61 = vsel %vm194_vm0, %v721_v52, %v1962_v56 }
  0x55   : > { %v2587_v40 = vld [vmem:[#allocation2 + $0x18] sm:$0xff]  ;;  %v1964_v59 = vld [vmem:[%s2349_s30 + $0x63] sm:$0x1]  ;;  %v1965_v60 = vld [vmem:[%s2349_s30 + $0x73] sm:$0x1]  ;;  %v471_v5 = vrot.slane %v2605_v58, 6 }
  0x56   : > { %1753 = vrot.lane.b32.xlu0 %v1752_v29, %s2260_s4  ;;  %v505_v29 = vrot.slane %v497_v25, 6  ;;  %v2611_v62 = vld [vmem:[%s2349_s30 + $0xf1] sm:$0x1]  ;;  %v723_v1 = vrot.slane %v1964_v59, 6  ;;  %v725_v2 = vrot.slane %v1965_v60, 5 }
  0x57   : > { %v1929_v63 = vld [vmem:[%s2349_s30 + $0x91] sm:$0x1]  ;;  %v1930_v6 = vld [vmem:[%s2349_s30 + $0xa1] sm:$0x1]  ;;  %v900_v7 = vld [vmem:[%s2349_s30 + $0x14] sm:$0x1] }
  0x58   : > { %1703 = vrot.lane.b32.xlu1 %v1702_v33, %s2260_s4  ;;  %v506_v33 = vsel %vm197_vm1, %v505_v29, %v504_v31  ;;  %v1928_v8 = vld [vmem:[%s2349_s30 + $0x81] sm:$0x1]  ;;  %v724_v10 = vsel %vm197_vm1, %v723_v1, %v722_v61  ;;  %v901_v11 = vld [vmem:[%s2349_s30 + $0x24] sm:$0x1]  ;;  %v907_v12 = vrot.slane %v900_v7, 7  ;;  %v453_v13 = vrot.slane %v1929_v63, 7 }
  0x59   : > { %v508_v36 = vsel %vm200_vm2, %v507_v34, %v506_v33  ;;  %v726_v14 = vsel %vm200_vm2, %v725_v2, %v724_v10  ;;  %v909_v15 = vrot.slane %v901_v11, 6  ;;  %v1985_v16 = vld [vmem:[%s2349_s30 + $0x54] sm:$0x1]  ;;  %v473_v17 = vrot.slane %v2611_v62, 5  ;;  %v1931_v18 = vld [vmem:[%s2349_s30 + $0xb1] sm:$0x1] }
  0x5a   : > { %510 = vst.msk [vmem:[#allocation2 + $0x18] sm:$0xf] %vm203_vm3, %v508_v36  ;;  %v455_v19 = vrot.slane %v1930_v6, 6  ;;  %v2633_v21 = vld [vmem:[%s2349_s30 + $0xd2] sm:$0x1]  ;;  %v923_v27 = vrot.slane %v1985_v16, 7  ;;  %v454_v29 = vsel %vm194_vm0, %v453_v13, %v1928_v8 }
  0x5b   : > { %1451 = vrot.lane.b32.xlu2 %v1450_v41, %s2260_s4  ;;  %v521_v41 = vrot.slane %v1942_v37, 6  ;;  %v899_v22 = vld [vmem:[%s2349_s30 + $0x4] sm:$0x1]  ;;  %v902_v23 = vld [vmem:[%s2349_s30 + $0x34] sm:$0x1]  ;;  %v457_v35 = vrot.slane %v1931_v18, 5 }
  0x5c   : > { %v908_v24 = vsel %vm194_vm0, %v907_v12, %v899_v22  ;;  %v911_v25 = vrot.slane %v902_v23, 5  ;;  %v1984_v26 = vld [vmem:[%s2349_s30 + $0x44] sm:$0x1]  ;;  %v2642_v30 = vld [vmem:[%s2349_s30 + $0xe2] sm:$0x1] }
  0x5d   : > { %v522_v45 = vsel %vm197_vm1, %v521_v41, %v520_v39  ;;  %v910_v31 = vsel %vm197_vm1, %v909_v15, %v908_v24  ;;  %v1986_v32 = vld [vmem:[%s2349_s30 + $0x64] sm:$0x1]  ;;  %v1987_v33 = vld [vmem:[%s2349_s30 + $0x74] sm:$0x1]  ;;  %v1932_v34 = vld [vmem:[%s2349_s30 + $0xc1] sm:$0x1]  ;;  %v924_v37 = vsel %vm194_vm0, %v923_v27, %v1984_v26 }
  0x5e   : > { %v524_v48 = vsel %vm200_vm2, %v523_v42, %v522_v45  ;;  %v2650_v36 = vld [vmem:[%s2349_s30 + $0x92] sm:$0x1]  ;;  %v925_v38 = vrot.slane %v1986_v32, 6  ;;  %v671_v41 = vrot.slane %v2633_v21, 7  ;;  %v2658_v42 = vld [vmem:[%s2349_s30 + $0xa2] sm:$0x1]  ;;  %v470_v13 = vsel %vm194_vm0, %v469_v4, %v1932_v34 }
  0x5f   : > { %526 = vst.msk [vmem:[#allocation2 + $0x1c] sm:$0xf] %vm203_vm3, %v524_v48  ;;  %v2654_v39 = vld [vmem:[%s2349_s30 + $0xf2] sm:$0x1]  ;;  %v927_v44 = vrot.slane %v1987_v33, 5  ;;  %v456_v48 = vsel %vm197_vm1, %v455_v19, %v454_v29  ;;  %v655_v6 = vrot.slane %v2650_v36, 7  ;;  %v472_v29 = vsel %vm197_vm1, %v471_v5, %v470_v13 }
  0x60   : > { %v1102_v45 = vld [vmem:[%s2349_s30 + $0x15] sm:$0x1]  ;;  %v2008_v53 = vld [vmem:[%s2349_s30 + $0x65] sm:$0x1]  ;;  %v185_v1 = vld [vmem:[%s2349_s30] sm:$0x1] }
  0x61   : > { %v2007_v46 = vld [vmem:[%s2349_s30 + $0x55] sm:$0x1]  ;;  %v1109_v52 = vrot.slane %v1102_v45, 7  ;;  %v1101_v61 = vld [vmem:[%s2349_s30 + $0x5] sm:$0x1]  ;;  %v675_v16 = vrot.slane %v2654_v39, 5 }
  0x62   : > { %v1104_v63 = vld [vmem:[%s2349_s30 + $0x35] sm:$0x1]  ;;  %v1950_v2 = vld [vmem:[%s2349_s30 + $0x82] sm:$0x1]  ;;  %v2006_v8 = vld [vmem:[%s2349_s30 + $0x45] sm:$0x1] }
  0x63   : > { %1653 = vrot.lane.b32.xlu2 %v1652_v47, %s2260_s4  ;;  %v705_v47 = vrot.slane %v698_v43, 7  ;;  %v912_v43 = vsel %vm200_vm2, %v911_v25, %v910_v31  ;;  %v1110_v7 = vsel %vm194_vm0, %v1109_v52, %v1101_v61  ;;  %v1125_v10 = vrot.slane %v2007_v46, 7  ;;  %v2009_v15 = vld [vmem:[%s2349_s30 + $0x75] sm:$0x1]  ;;  %v2696_v4 = vld [vmem:[%s2349_s30 + $0xb2] sm:$0x1] }
  0x64   : > { %v657_v18 = vrot.slane %v2658_v42, 6  ;;  %v1113_v19 = vrot.slane %v1104_v63, 5  ;;  %v2699_v22 = vld [vmem:[%s2349_s30 + $0xd3] sm:$0x1]  ;;  %v2702_v23 = vld [vmem:[%s2349_s30 + $0xe3] sm:$0x1]  ;;  %v656_v58 = vsel %vm194_vm0, %v655_v6, %v1950_v2  ;;  %v474_v46 = vsel %vm200_vm2, %v473_v17, %v472_v29 }
  0x65   : > { %v706_v51 = vsel %vm194_vm0, %v705_v47, %v697_v49  ;;  %v186_v47 = vld [vmem:[%s2349_s30 + $0x10] sm:$0x1]  ;;  %v673_v49 = vrot.slane %v2642_v30, 6  ;;  %v1127_v25 = vrot.slane %v2008_v53, 6  ;;  %v1954_v31 = vld [vmem:[%s2349_s30 + $0xc2] sm:$0x1]  ;;  %v1126_v32 = vsel %vm194_vm0, %v1125_v10, %v2006_v8 }
  0x66   : > { %v708_v54 = vsel %vm197_vm1, %v707_v50, %v706_v51  ;;  %v2622_v9 = vld [vmem:[#allocation2 + $0x18] sm:$0xff]  ;;  %v926_v50 = vsel %vm197_vm1, %v925_v38, %v924_v37  ;;  %v1103_v51 = vld [vmem:[%s2349_s30 + $0x25] sm:$0x1]  ;;  %v1129_v33 = vrot.slane %v2009_v15, 5  ;;  %v1903_v36 = vld [vmem:[%s2349_s30 + $0x50] sm:$0x1] }
  0x67   : > { %v710_v0 = vsel %vm200_vm2, %v709_v55, %v708_v54  ;;  %728 = vst.msk [vmem:[#allocation2 + $0x1c] sm:$0xf] %vm203_vm3, %v726_v14  ;;  %v187_v54 = vld [vmem:[%s2349_s30 + $0x20] sm:$0x1]  ;;  %v188_v55 = vld [vmem:[%s2349_s30 + $0x30] sm:$0x1]  ;;  %v928_v60 = vsel %vm200_vm2, %v927_v44, %v926_v50  ;;  %v458_v14 = vsel %vm200_vm2, %v457_v35, %v456_v48 }
  0x68   : > { %712 = vst.msk [vmem:[#allocation2 + $0x18] sm:$0xf] %vm203_vm3, %v710_v0  ;;  %v1111_v0 = vrot.slane %v1103_v51, 6  ;;  %v196_v26 = vrot.slane %v187_v54, 6  ;;  %v199_v27 = vrot.slane %v188_v55, 5  ;;  %v214_v44 = vrot.slane %v1903_v36, 7 }
  0x69   : > { %v1902_v35 = vld [vmem:[%s2349_s30 + $0x40] sm:$0x1]  ;;  %v1973_v48 = vld [vmem:[%s2349_s30 + $0x93] sm:$0x1]  ;;  %v2729_v50 = vld [vmem:[%s2349_s30 + $0xa3] sm:$0x1] }
  0x6a   : > { %v1112_v24 = vsel %vm197_vm1, %v1111_v0, %v1110_v7  ;;  %v1904_v37 = vld [vmem:[%s2349_s30 + $0x60] sm:$0x1]  ;;  %v659_v51 = vrot.slane %v2696_v4, 5  ;;  %v873_v52 = vrot.slane %v2699_v22, 7  ;;  %v875_v53 = vrot.slane %v2702_v23, 6 }
  0x6b   : > { %v1114_v38 = vsel %vm200_vm2, %v1113_v19, %v1112_v24  ;;  %v216_v45 = vrot.slane %v1904_v37, 6  ;;  %v215_v62 = vsel %vm194_vm0, %v214_v44, %v1902_v35  ;;  %v396_v0 = vld [vmem:[%s2349_s30 + $0x11] sm:$0x1]  ;;  %v857_v2 = vrot.slane %v1973_v48, 7  ;;  %v1976_v10 = vld [vmem:[%s2349_s30 + $0xc3] sm:$0x1] }
  0x6c   : > { %v859_v6 = vrot.slane %v2729_v50, 6  ;;  %v395_v13 = vld [vmem:[%s2349_s30 + $0x1] sm:$0x1]  ;;  %v398_v30 = vld [vmem:[%s2349_s30 + $0x31] sm:$0x1] }
  0x6d   : > { %v217_v7 = vsel %vm197_vm1, %v216_v45, %v215_v62  ;;  %v397_v19 = vld [vmem:[%s2349_s30 + $0x21] sm:$0x1]  ;;  %v598_v35 = vld [vmem:[%s2349_s30 + $0x12] sm:$0x1]  ;;  %v599_v44 = vld [vmem:[%s2349_s30 + $0x22] sm:$0x1] }
  0x6e   : > { %v1926_v22 = vld [vmem:[%s2349_s30 + $0x61] sm:$0x1]  ;;  %v405_v29 = vrot.slane %v397_v19, 6  ;;  %v1947_v45 = vld [vmem:[%s2349_s30 + $0x52] sm:$0x1]  ;;  %v605_v50 = vrot.slane %v598_v35, 7 }
  0x6f   : > { %v2671_v59 = vld [vmem:[#allocation2 + $0x18] sm:$0xff]  ;;  %v421_v39 = vrot.slane %v1926_v22, 6  ;;  %v597_v62 = vld [vmem:[%s2349_s30 + $0x2] sm:$0x1]  ;;  %v2860_v35 = vld [vmem:[%s2349_s30 + $0x34] sm:$0x1] }
  0x70   : > { %914 = vst.msk [vmem:[#allocation2 + $0x18] sm:$0xf] %vm203_vm3, %v912_v43  ;;  %v1905_v43 = vld [vmem:[%s2349_s30 + $0x70] sm:$0x1] }
  0x71   : > { %930 = vst.msk [vmem:[#allocation2 + $0x1c] sm:$0xf] %vm203_vm3, %v928_v60  ;;  %v658_v60 = vsel %vm197_vm1, %v657_v18, %v656_v58  ;;  %v218_v63 = vrot.slane %v1905_v43, 5 }
  0x72   : > { %v660_v18 = vsel %vm200_vm2, %v659_v51, %v658_v60 }
  0x73   : > { %v219_v4 = vsel %vm200_vm2, %v218_v63, %v217_v7  ;;  %v1948_v63 = vld [vmem:[%s2349_s30 + $0x62] sm:$0x1] }
  0x74   : > { %221 = vst.msk [vmem:[#allocation2 + $0x4] sm:$0xf] %vm203_vm3, %v219_v4  ;;  %v2828_v4 = vld [vmem:[%s2349_s30 + $0x23] sm:$0x1] }
  0x78   : > { %v2735_v54 = vld [vmem:[#allocation2 + $0x18] sm:$0xff] }
  0x79   : > { %1116 = vst.msk [vmem:[#allocation2 + $0x18] sm:$0xf] %vm203_vm3, %v1114_v38 }
  0x85   : > { %v2615_v3 = vpop.permute.xlu2 %491 }
  0x8d   : > { %v442_v56 = vpop.permute.xlu2 %441 }
  0x90   : > { %v339_v20 = vpop.permute.xlu0 %338 }
  0x91   : > { %341 = vst.msk [vmem:[#allocation2 + $0x20] sm:$0xf] %vm203_vm3, %v339_v20  ;;  %v193_v20 = vrot.slane %v186_v47, 7  ;;  %v1128_v47 = vsel %vm197_vm1, %v1127_v25, %v1126_v32  ;;  %v874_v32 = vsel %vm194_vm0, %v873_v52, %v1976_v10  ;;  %v606_v10 = vsel %vm194_vm0, %v605_v50, %v597_v62 }
  0x92   : > { %v237_v28 = vpop.permute.xlu1 %236  ;;  %v1130_v21 = vsel %vm200_vm2, %v1129_v33, %v1128_v47  ;;  %v876_v51 = vsel %vm197_vm1, %v875_v53, %v874_v32  ;;  %v607_v53 = vrot.slane %v599_v44, 6 }
  0x93   : > { %239 = vst.msk [vmem:[#allocation2 + $0x8] sm:$0xf] %vm203_vm3, %v237_v28  ;;  %v195_v34 = vsel %vm194_vm0, %v193_v20, %v185_v1  ;;  %v2749_v1 = vld [vmem:[%s2349_s30 + $0xf3] sm:$0x1]  ;;  %v403_v20 = vrot.slane %v396_v0, 7  ;;  %v621_v0 = vrot.slane %v1947_v45, 7 }
  0x94   : > { %v198_v5 = vsel %vm197_vm1, %v196_v26, %v195_v34  ;;  %1132 = vst.msk [vmem:[#allocation2 + $0x1c] sm:$0xf] %vm203_vm3, %v1130_v21  ;;  %v1946_v21 = vld [vmem:[%s2349_s30 + $0x42] sm:$0x1]  ;;  %v608_v22 = vsel %vm197_vm1, %v607_v53, %v606_v10  ;;  %v1968_v45 = vld [vmem:[%s2349_s30 + $0x43] sm:$0x1] }
  0x95   : > { %v201_v42 = vsel %vm200_vm2, %v199_v27, %v198_v5  ;;  %v644_v61 = vpop.permute.xlu2 %643  ;;  %v877_v27 = vrot.slane %v2749_v1, 5  ;;  %v404_v34 = vsel %vm194_vm0, %v403_v20, %v395_v13  ;;  %v407_v5 = vrot.slane %v398_v30, 5  ;;  %v2000_v53 = vld [vmem:[%s2349_s30 + $0xe4] sm:$0x1]  ;;  %v2001_v10 = vld [vmem:[%s2349_s30 + $0xf4] sm:$0x1] }
  0x96   : > { %204 = vst.msk [vmem:[#allocation2] sm:$0xf] %vm203_vm3, %v201_v42  ;;  %v406_v48 = vsel %vm197_vm1, %v405_v29, %v404_v34  ;;  %v622_v20 = vsel %vm194_vm0, %v621_v0, %v1946_v21  ;;  %v799_v34 = vld [vmem:[%s2349_s30 + $0x3] sm:$0x1]  ;;  %v2890_v21 = vld [vmem:[%s2349_s30 + $0x64] sm:$0x1] }
  0x97   : > { %v408_v23 = vsel %vm200_vm2, %v407_v5, %v406_v48  ;;  %v809_v5 = vrot.slane %v2828_v4, 6 }
  0x98   : > { %v289_v11 = vpop.permute.xlu0 %288  ;;  %v2682_v12 = vld [vmem:[#allocation2 + $0x20] sm:$0xf] }
  0x99   : > { %291 = vst.msk [vmem:[#allocation2 + $0x14] sm:$0xf] %vm203_vm3, %v289_v11  ;;  %1922 = vmatpush.msk.msra.mxu0 %vm356_vm4, %v2682_v12  ;;  %v1975_v11 = vld [vmem:[%s2349_s30 + $0xb3] sm:$0x1]  ;;  %v386_v37 = vrot.slane %v2682_v12, 4 }
  0x9a   : > { %v542_v57 = vpop.permute.xlu1 %541  ;;  %v343_v28 = vld [vmem:[#allocation2 + $0x8] sm:$0xff]  ;;  %v861_v33 = vrot.slane %v1975_v11, 5 }
  0x9b   : > { %544 = vst.msk [vmem:[#allocation2 + $0x20] sm:$0xf] %vm203_vm3, %v542_v57  ;;  %372 = vmatpush.msra.mxu0 %v2587_v40 }
  0x9c   : > { %444 = vst.msk [vmem:[#allocation2 + $0x8] sm:$0xf] %vm203_vm3, %v442_v56  ;;  %v672_v56 = vsel %vm194_vm0, %v671_v41, %v1954_v31  ;;  %v1972_v41 = vld [vmem:[%s2349_s30 + $0x83] sm:$0x1]  ;;  %v1927_v31 = vld [vmem:[%s2349_s30 + $0x71] sm:$0x1] }
  0x9d   : > { %460 = vst.msk [vmem:[#allocation2 + $0xc] sm:$0xf] %vm203_vm3, %v458_v14  ;;  %v1925_v14 = vld [vmem:[%s2349_s30 + $0x51] sm:$0x1]  ;;  %v674_v15 = vsel %vm197_vm1, %v673_v49, %v672_v56  ;;  %v1924_v49 = vld [vmem:[%s2349_s30 + $0x41] sm:$0x1] }
  0x9e   : > { %v419_v24 = vrot.slane %v1925_v14, 7  ;;  %v676_v26 = vsel %vm200_vm2, %v675_v16, %v674_v15  ;;  %v423_v43 = vrot.slane %v1927_v31, 5  ;;  %v1949_v14 = vld [vmem:[%s2349_s30 + $0x72] sm:$0x1]  ;;  %v623_v15 = vrot.slane %v1948_v63, 6 }
  0x9f   : > { %v2849_v31 = vld [vmem:[%s2349_s30 + $0x14] sm:$0x1] }
  0xa0   : > { %v2738_v17 = vld [vmem:[#allocation2 + $0x10] sm:$0xff]  ;;  %v744_v55 = vpop.permute.xlu0 %743  ;;  %v420_v36 = vsel %vm194_vm0, %v419_v24, %v1924_v49  ;;  %v625_v49 = vrot.slane %v1949_v14, 5  ;;  %v624_v29 = vsel %vm197_vm1, %v623_v15, %v622_v20  ;;  %v1009_v48 = vrot.slane %v2849_v31, 7  ;;  %v1001_v15 = vld [vmem:[%s2349_s30 + $0x4] sm:$0x1] }
  0xa1   : > { %476 = vst.msk [vmem:[#allocation2 + $0x10] sm:$0xf] %vm203_vm3, %v474_v46  ;;  %373 = vmatpush.msra.mxu0 %v2738_v17  ;;  %v422_v52 = vsel %vm197_vm1, %v421_v39, %v420_v36  ;;  %v2835_v24 = vld [vmem:[%s2349_s30 + $0x33] sm:$0x1]  ;;  %v2857_v39 = vld [vmem:[%s2349_s30 + $0x24] sm:$0x1] }
  0xa2   : > { %494 = vst.msk [vmem:[#allocation2 + $0x14] sm:$0xf] %vm203_vm3, %v2615_v3  ;;  %v549_v8 = vld [vmem:[#allocation2 + $0x20] sm:$0xf]  ;;  %v694_v25 = vpop.permute.xlu1 %693  ;;  %v424_v7 = vsel %vm200_vm2, %v423_v43, %v422_v52  ;;  %v811_v36 = vrot.slane %v2835_v24, 5  ;;  %v626_v44 = vsel %vm200_vm2, %v625_v49, %v624_v29  ;;  %v1011_v50 = vrot.slane %v2857_v39, 6 }
  0xa3   : > { %374 = vmatpush.msra.mxu0 %v343_v28  ;;  %746 = vst.msk [vmem:[#allocation2 + $0x20] sm:$0xf] %vm203_vm3, %v744_v55  ;;  %1944 = vmatpush.msk.msra.mxu1 %vm356_vm4, %v549_v8  ;;  %v584_v3 = vrot.slane %v549_v8, 4  ;;  %v858_v28 = vsel %vm194_vm0, %v857_v2, %v1972_v41  ;;  %v600_v55 = vld [vmem:[%s2349_s30 + $0x32] sm:$0x1]  ;;  %v383_v41 = vrot.slane %v2738_v17, 4 }
  0xa4   : > { %v546_v57 = vld [vmem:[#allocation2 + $0x8] sm:$0xff]  ;;  %v860_v42 = vsel %vm197_vm1, %v859_v6, %v858_v28  ;;  %v342_v6 = vld [vmem:[#allocation2] sm:$0xff]  ;;  %v609_v11 = vrot.slane %v600_v55, 5  ;;  %v2878_v55 = vld [vmem:[%s2349_s30 + $0x54] sm:$0x1] }
  0xa5   : > { %565 = vmatpush.msra.mxu1 %v2622_v9  ;;  %646 = vst.msk [vmem:[#allocation2 + $0x8] sm:$0xf] %vm203_vm3, %v644_v61  ;;  %v586_v58 = vmax.f32 %v2622_v9, %v584_v3  ;;  %v846_v9 = vpop.permute.xlu2 %845  ;;  %v862_v61 = vsel %vm200_vm2, %v861_v33, %v860_v42  ;;  %v2817_v8 = vld [vmem:[%s3216_s0] sm:$0xf]  ;;  %375 = vmatpush.msra.mxu0 %v342_v6  ;;  %v1154_v6 = vld [vmem:[#allocation2 + $0x18] sm:$0xff] }
  0xa6   : > { %662 = vst.msk [vmem:[#allocation2 + $0xc] sm:$0xf] %vm203_vm3, %v660_v18  ;;  %v878_v3 = vsel %vm200_vm2, %v877_v27, %v876_v51  ;;  %1923 = vmatmul.msk.f32.vlgmr.msra.gmra.mxu0 %vm352_vm5, %v2817_v8  ;;  %v2842_v27 = vld [vmem:[%s2349_s30 + $0x73] sm:$0x1]  ;;  %v610_v33 = vsel %vm200_vm2, %v609_v11, %v608_v22  ;;  %v1013_v51 = vrot.slane %v2860_v35, 5 }
  0xa7   : > { %v588_v60 = vrot.slane %v586_v58, 4  ;;  %410 = vst.msk [vmem:[#allocation2] sm:$0xf] %vm203_vm3, %v408_v23  ;;  %v1999_v23 = vld [vmem:[%s2349_s30 + $0xd4] sm:$0x1] }
  0xa8   : > { %v946_v16 = vpop.permute.xlu0 %945  ;;  %426 = vst.msk [vmem:[#allocation2 + $0x4] sm:$0xf] %vm203_vm3, %v424_v7  ;;  %v1075_v11 = vrot.slane %v1999_v23, 7  ;;  %v1990_v31 = vld [vmem:[%s2349_s30 + $0x44] sm:$0x1] }
  0xa9   : > { %v547_v38 = vld [vmem:[#allocation2 + $0x10] sm:$0xff] }
  0xaa   : > { %678 = vst.msk [vmem:[#allocation2 + $0x10] sm:$0xf] %vm203_vm3, %v676_v26  ;;  %566 = vmatpush.msra.mxu1 %v547_v38  ;;  %v2793_v46 = vld [vmem:[#allocation2 + $0x20] sm:$0xf]  ;;  %v581_v47 = vrot.slane %v547_v38, 4  ;;  %v896_v13 = vpop.permute.xlu1 %895 }
  0xab   : > { %696 = vst.msk [vmem:[#allocation2 + $0x14] sm:$0xf] %vm203_vm3, %v694_v25  ;;  %1966 = vmatpush.msk.msra.mxu2 %vm356_vm4, %v2793_v46  ;;  %v786_v18 = vrot.slane %v2793_v46, 4  ;;  %v1969_v25 = vld [vmem:[%s2349_s30 + $0x53] sm:$0x1]  ;;  %v827_v46 = vrot.slane %v2842_v27, 5 }
  0xac   : > { %567 = vmatpush.msra.mxu1 %v546_v57  ;;  %948 = vst.msk [vmem:[#allocation2 + $0x20] sm:$0xf] %vm203_vm3, %v946_v16  ;;  %v583_v56 = vmax.f32 %v547_v38, %v581_v47  ;;  %v800_v57 = vld [vmem:[%s2349_s30 + $0x13] sm:$0x1]  ;;  %v2839_v26 = vld [vmem:[%s2349_s30 + $0x63] sm:$0x1] }
  0xad   : > { %v748_v1 = vld [vmem:[#allocation2 + $0x8] sm:$0xff]  ;;  %767 = vmatpush.msra.mxu2 %v2671_v59  ;;  %v1048_v32 = vpop.permute.xlu2 %1047  ;;  %v788_v16 = vmax.f32 %v2671_v59, %v786_v18  ;;  %v807_v58 = vrot.slane %v800_v57, 7  ;;  %v823_v38 = vrot.slane %v1969_v25, 7  ;;  %v825_v59 = vrot.slane %v2839_v26, 6  ;;  %v1996_v25 = vld [vmem:[%s2349_s30 + $0xa4] sm:$0x1] }
  0xae   : > { %848 = vst.msk [vmem:[#allocation2 + $0x8] sm:$0xf] %vm203_vm3, %v846_v9  ;;  %v590_v2 = vmax.f32 %v583_v56, %v588_v60  ;;  %v1079_v18 = vrot.slane %v2001_v10, 5  ;;  %v1997_v26 = vld [vmem:[%s2349_s30 + $0xb4] sm:$0x1] }
  0xaf   : > { %864 = vst.msk [vmem:[#allocation2 + $0xc] sm:$0xf] %vm203_vm3, %v862_v61  ;;  %v545_v52 = vld [vmem:[#allocation2] sm:$0xff]  ;;  %v790_v60 = vrot.slane %v788_v16, 4  ;;  %v808_v0 = vsel %vm194_vm0, %v807_v58, %v799_v34  ;;  %v1061_v34 = vrot.slane %v1996_v25, 6  ;;  %v1063_v16 = vrot.slane %v1997_v26, 5 }
  0xb0   : > { %v1148_v19 = vpop.permute.xlu0 %1147  ;;  %2148 = vtanh.f32 %v590_v2  ;;  %v1998_v61 = vld [vmem:[%s2349_s30 + $0xc4] sm:$0x1]  ;;  %568 = vmatpush.msra.mxu1 %v545_v52  ;;  %612 = vst.msk [vmem:[#allocation2] sm:$0xf] %vm203_vm3, %v610_v33  ;;  %v2893_v2 = vld [vmem:[%s2349_s30 + $0x74] sm:$0x1]  ;;  %v810_v20 = vsel %vm197_vm1, %v809_v5, %v808_v0 }
  0xb1   : > { %1945 = vmatmul.msk.f32.vlgmr.msra.gmra.mxu1 %vm352_vm5, %v2817_v8  ;;  %628 = vst.msk [vmem:[#allocation2 + $0x4] sm:$0xf] %vm203_vm3, %v626_v44  ;;  %v1076_v22 = vsel %vm194_vm0, %v1075_v11, %v1998_v61  ;;  %v2017_v58 = vld [vmem:[%s2349_s30 + $0x95] sm:$0x1]  ;;  %v812_v5 = vsel %vm200_vm2, %v811_v36, %v810_v20  ;;  %v2016_v36 = vld [vmem:[%s2349_s30 + $0x85] sm:$0x1] }
  0xb2   : > { %v749_v30 = vld [vmem:[#allocation2 + $0x10] sm:$0xff]  ;;  %v1098_v63 = vpop.permute.xlu1 %1097  ;;  %v1303_v27 = vld [vmem:[%s2349_s30 + $0x6] sm:$0x1]  ;;  %v2262_v61 = vmov 0  }
  0xb3   : > { %880 = vst.msk [vmem:[#allocation2 + $0x10] sm:$0xf] %vm203_vm3, %v878_v3  ;;  %768 = vmatpush.msra.mxu2 %v749_v30  ;;  %v2845_v28 = vld [vmem:[#allocation2 + $0x20] sm:$0xf]  ;;  %v783_v9 = vrot.slane %v749_v30, 4  ;;  %2147 = vset.pattern.permute.xlu0 %v2262_v61 }
  0xb4   : > { %898 = vst.msk [vmem:[#allocation2 + $0x14] sm:$0xf] %vm203_vm3, %v896_v13  ;;  %1988 = vmatpush.msk.msra.mxu3 %vm356_vm4, %v2845_v28  ;;  %v988_v47 = vrot.slane %v2845_v28, 4  ;;  %v1077_v13 = vrot.slane %v2000_v53, 6  ;;  %v1994_v3 = vld [vmem:[%s2349_s30 + $0x84] sm:$0x1] }
  0xb5   : > { %769 = vmatpush.msra.mxu2 %v748_v1  ;;  %1150 = vst.msk [vmem:[#allocation2 + $0x20] sm:$0xf] %vm203_vm3, %v1148_v19  ;;  %v785_v56 = vmax.f32 %v749_v30, %v783_v9  ;;  %v824_v1 = vsel %vm194_vm0, %v823_v38, %v1968_v45  ;;  %v1995_v19 = vld [vmem:[%s2349_s30 + $0x94] sm:$0x1]  ;;  %v1025_v30 = vrot.slane %v2878_v55, 7  ;;  %v1027_v38 = vrot.slane %v2890_v21, 6 }
  0xb6   : > { %v2149_v42 = vpop.eup %2148  ;;  %969 = vmatpush.msra.mxu3 %v2735_v54  ;;  %v950_v43 = vld [vmem:[#allocation2 + $0x8] sm:$0xff]  ;;  %v826_v57 = vsel %vm197_vm1, %v825_v59, %v824_v1  ;;  %v1078_v49 = vsel %vm197_vm1, %v1077_v13, %v1076_v22  ;;  %v1059_v28 = vrot.slane %v1995_v19, 7  ;;  %v990_v29 = vmax.f32 %v2735_v54, %v988_v47  ;;  %v2928_v59 = vld [vmem:[%s2349_s30 + $0xb5] sm:$0x1]  ;;  %v184_v9 = vld [vmem:[%s3217_s1] sm:$0xf] }
  0xb7   : > { %593 = vrot.lane.b32.xlu2 %v2149_v42, %s2261_s7  ;;  %1050 = vst.msk [vmem:[#allocation2 + $0x8] sm:$0xf] %vm203_vm3, %v1048_v32  ;;  %v792_v7 = vmax.f32 %v785_v56, %v790_v60  ;;  %v1080_v33 = vsel %vm200_vm2, %v1079_v18, %v1078_v49  ;;  %v1029_v42 = vrot.slane %v2893_v2, 5  ;;  %v828_v44 = vsel %vm200_vm2, %v827_v46, %v826_v57  ;;  %v1304_v0 = vld [vmem:[%s2349_s30 + $0x16] sm:$0x1] }
  0xb8   : > { %v1350_v62 = vpop.permute.xlu0 %1349  ;;  %v1060_v54 = vsel %vm194_vm0, %v1059_v28, %v1994_v3  ;;  %v1010_v45 = vsel %vm194_vm0, %v1009_v48, %v1001_v15  ;;  %v747_v47 = vld [vmem:[#allocation2] sm:$0xff]  ;;  %v1026_v23 = vsel %vm194_vm0, %v1025_v30, %v1990_v31  ;;  %349 = vperm.xlu0 %2147, %v184_v9   ;;  %v1311_v39 = vrot.slane %v1304_v0, 7  ;;  %v2029_v22 = vld [vmem:[%s2349_s30 + $0x56] sm:$0x1]  ;;  %v2021_v61 = vld [vmem:[%s2349_s30 + $0xd5] sm:$0x1] }
  0xb9   : > { %2150 = vtanh.f32 %v792_v7  ;;  %v1062_v24 = vsel %vm197_vm1, %v1061_v34, %v1060_v54  ;;  %770 = vmatpush.msra.mxu2 %v747_v47  ;;  %814 = vst.msk [vmem:[#allocation2] sm:$0xf] %vm203_vm3, %v812_v5  ;;  %v1012_v1 = vsel %vm197_vm1, %v1011_v50, %v1010_v45  ;;  %v1305_v21 = vld [vmem:[%s2349_s30 + $0x26] sm:$0x1]  ;;  %v1265_v13 = vrot.slane %v2928_v59, 5  ;;  %v1250_v54 = vpop.permute.xlu2 %1249 }
  0xba   : > { %v1064_v52 = vsel %vm200_vm2, %v1063_v16, %v1062_v24  ;;  %1967 = vmatmul.msk.f32.vlgmr.msra.gmra.mxu2 %vm352_vm5, %v2817_v8  ;;  %830 = vst.msk [vmem:[#allocation2 + $0x4] sm:$0xf] %vm203_vm3, %v828_v44  ;;  %v1300_v7 = vpop.permute.xlu1 %1299  ;;  %v1313_v11 = vrot.slane %v1305_v21, 6  ;;  %v2028_v18 = vld [vmem:[%s2349_s30 + $0x46] sm:$0x1]  ;;  %v1014_v3 = vsel %vm200_vm2, %v1013_v51, %v1012_v1  ;;  %v1028_v19 = vsel %vm197_vm1, %v1027_v38, %v1026_v23 }
  0xbb   : > { %v951_v14 = vld [vmem:[#allocation2 + $0x10] sm:$0xff]  ;;  %1066 = vst.msk [vmem:[#allocation2 + $0xc] sm:$0xf] %vm203_vm3, %v1064_v52  ;;  %v2030_v25 = vld [vmem:[%s2349_s30 + $0x66] sm:$0x1]  ;;  %v1327_v30 = vrot.slane %v2029_v22, 7  ;;  %v1030_v34 = vsel %vm200_vm2, %v1029_v42, %v1028_v19 }
  0xbc   : > { %1100 = vst.msk [vmem:[#allocation2 + $0x14] sm:$0xf] %vm203_vm3, %v1098_v63  ;;  %970 = vmatpush.msra.mxu3 %v951_v14  ;;  %v1155_v4 = vld [vmem:[#allocation2 + $0x20] sm:$0xf]  ;;  %v985_v55 = vrot.slane %v951_v14, 4  ;;  %v992_v63 = vrot.slane %v990_v29, 4 }
  0xbd   : > { %2010 = vmatpush.msk.msrb.mxu0 %vm356_vm4, %v1155_v4  ;;  %1352 = vst.msk [vmem:[#allocation2 + $0x20] sm:$0xf] %vm203_vm3, %v1350_v62  ;;  %v1190_v32 = vrot.slane %v1155_v4, 4  ;;  %v1261_v62 = vrot.slane %v2017_v58, 7  ;;  %v1312_v4 = vsel %vm194_vm0, %v1311_v39, %v1303_v27  ;;  %v2031_v51 = vld [vmem:[%s2349_s30 + $0x76] sm:$0x1]  ;;  %v1328_v16 = vsel %vm194_vm0, %v1327_v30, %v2028_v18 }
  0xbe   : > { %971 = vmatpush.msra.mxu3 %v950_v43  ;;  %1082 = vst.msk [vmem:[#allocation2 + $0x10] sm:$0xf] %vm203_vm3, %v1080_v33  ;;  %v2018_v43 = vld [vmem:[%s2349_s30 + $0xa5] sm:$0x1]  ;;  %v987_v53 = vmax.f32 %v951_v14, %v985_v55  ;;  %v1314_v35 = vsel %vm197_vm1, %v1313_v11, %v1312_v4  ;;  %v1329_v49 = vrot.slane %v2030_v25, 6  ;;  %v1331_v29 = vrot.slane %v2031_v51, 5 }
  0xbf   : > { %1171 = vmatpush.msrb.mxu0 %v1154_v6  ;;  %v2151_v56 = vpop.eup %2150  ;;  %v2936_v46 = vmax.f32 %v1154_v6, %v1190_v32  ;;  %v1263_v48 = vrot.slane %v2018_v43, 6  ;;  %v1306_v6 = vld [vmem:[%s2349_s30 + $0x36] sm:$0x1]  ;;  %v1262_v50 = vsel %vm194_vm0, %v1261_v62, %v2016_v36  ;;  %v1505_v31 = vld [vmem:[%s2349_s30 + $0x7] sm:$0x1] }
  0xc0   : > { %v1552_v60 = vpop.permute.xlu0 %1551  ;;  %795 = vrot.lane.b32.xlu2 %v2151_v56, %s2263_s10  ;;  %v994_v14 = vmax.f32 %v987_v53, %v992_v63  ;;  %v1315_v15 = vrot.slane %v1306_v6, 5  ;;  %v1506_v32 = vld [vmem:[%s2349_s30 + $0x17] sm:$0x1]  ;;  %v1507_v58 = vld [vmem:[%s2349_s30 + $0x27] sm:$0x1]  ;;  %v1330_v44 = vsel %vm197_vm1, %v1329_v49, %v1328_v16  ;;  %v1277_v6 = vrot.slane %v2021_v61, 7 }
  0xc1   : > { %v1194_v20 = vrot.slane %v2936_v46, 4  ;;  %v1264_v26 = vsel %vm197_vm1, %v1263_v48, %v1262_v50  ;;  %v1508_v5 = vld [vmem:[%s2349_s30 + $0x37] sm:$0x1]  ;;  %v949_v38 = vld [vmem:[#allocation2] sm:$0xff]  ;;  %v1513_v45 = vrot.slane %v1506_v32, 7  ;;  %v1515_v24 = vrot.slane %v1507_v58, 6 }
  0xc2   : > { %2152 = vtanh.f32 %v994_v14  ;;  %v1316_v28 = vsel %vm200_vm2, %v1315_v15, %v1314_v35  ;;  %972 = vmatpush.msra.mxu3 %v949_v38  ;;  %1016 = vst.msk [vmem:[#allocation2] sm:$0xf] %vm203_vm3, %v1014_v3  ;;  %v1152_v2 = vld [vmem:[#allocation2 + $0x8] sm:$0xff]  ;;  %v1266_v42 = vsel %vm200_vm2, %v1265_v13, %v1264_v26  ;;  %v1517_v36 = vrot.slane %v1508_v5, 5  ;;  %v2051_v59 = vld [vmem:[%s2349_s30 + $0x57] sm:$0x1] }
  0xc3   : > { %1318 = vst.msk [vmem:[#allocation2 + $0x18] sm:$0xf] %vm203_vm3, %v1316_v28  ;;  %1989 = vmatmul.msk.f32.vlgmr.msra.gmra.mxu3 %vm352_vm5, %v2817_v8  ;;  %v1332_v47 = vsel %vm200_vm2, %v1331_v29, %v1330_v44  ;;  %v1514_v52 = vsel %vm194_vm0, %v1513_v45, %v1505_v31  ;;  %v2050_v62 = vld [vmem:[%s2349_s30 + $0x47] sm:$0x1]  ;;  %v2053_v56 = vld [vmem:[%s2349_s30 + $0x77] sm:$0x1]  ;;  %v3029_v45 = vmax.f32 %v2587_v40, %v386_v37 }
  0xc4   : > { %v2950_v10 = vld [vmem:[#allocation2 + $0x20] sm:$0xf]  ;;  %1032 = vst.msk [vmem:[#allocation2 + $0x4] sm:$0xf] %vm203_vm3, %v1030_v34  ;;  %v2052_v55 = vld [vmem:[%s2349_s30 + $0x67] sm:$0x1]  ;;  %v1516_v0 = vsel %vm197_vm1, %v1515_v24, %v1514_v52 }
  0xc5   : > { %2032 = vmatpush.msk.msrb.mxu1 %vm356_vm4, %v2950_v10  ;;  %1554 = vst.msk [vmem:[#allocation2 + $0x20] sm:$0xf] %vm203_vm3, %v1552_v60  ;;  %v1153_v57 = vld [vmem:[#allocation2 + $0x10] sm:$0xff]  ;;  %v1392_v43 = vrot.slane %v2950_v10, 4  ;;  %v1529_v46 = vrot.slane %v2051_v59, 7  ;;  %v1531_v48 = vrot.slane %v2052_v55, 6 }
  0xc6   : > { %1302 = vst.msk [vmem:[#allocation2 + $0x14] sm:$0xf] %vm203_vm3, %v1300_v7  ;;  %1172 = vmatpush.msrb.mxu0 %v1153_v57  ;;  %v1187_v33 = vrot.slane %v1153_v57, 4  ;;  %v2020_v60 = vld [vmem:[%s2349_s30 + $0xc5] sm:$0x1]  ;;  %v1533_v21 = vrot.slane %v2053_v56, 5 }
  0xc7   : > { %1252 = vst.msk [vmem:[#allocation2 + $0x8] sm:$0xf] %vm203_vm3, %v1250_v54  ;;  %v1530_v1 = vsel %vm194_vm0, %v1529_v46, %v2050_v62  ;;  %v2022_v23 = vld [vmem:[%s2349_s30 + $0xe5] sm:$0x1]  ;;  %v2023_v53 = vld [vmem:[%s2349_s30 + $0xf5] sm:$0x1]  ;;  %v1278_v18 = vsel %vm194_vm0, %v1277_v6, %v2020_v60 }
  0xc8   : > { %v1189_v9 = vmax.f32 %v1153_v57, %v1187_v33  ;;  %1173 = vmatpush.msrb.mxu0 %v1152_v2  ;;  %v2153_v27 = vpop.eup %2152  ;;  %1268 = vst.msk [vmem:[#allocation2 + $0xc] sm:$0xf] %vm203_vm3, %v1266_v42  ;;  %v1279_v7 = vrot.slane %v2022_v23, 6  ;;  %v1281_v39 = vrot.slane %v2023_v53, 5  ;;  %v2042_v11 = vld [vmem:[%s2349_s30 + $0xc6] sm:$0x1]  ;;  %v1532_v15 = vsel %vm197_vm1, %v1531_v48, %v1530_v1  ;;  %v1452_v42 = vpop.permute.xlu2 %1451 }
  0xc9   : > { %997 = vrot.lane.b32.xlu1 %v2153_v27, %s2264_s11  ;;  %1334 = vst.msk [vmem:[#allocation2 + $0x1c] sm:$0xf] %vm203_vm3, %v1332_v47  ;;  %v2043_v50 = vld [vmem:[%s2349_s30 + $0xd6] sm:$0x1]  ;;  %v2044_v13 = vld [vmem:[%s2349_s30 + $0xe6] sm:$0x1]  ;;  %v1518_v57 = vsel %vm200_vm2, %v1517_v36, %v1516_v0  ;;  %v1534_v32 = vsel %vm200_vm2, %v1533_v21, %v1532_v15 }
  0xca   : > { %v1196_v63 = vmax.f32 %v1189_v9, %v1194_v20  ;;  %v2045_v14 = vld [vmem:[%s2349_s30 + $0xf6] sm:$0x1]  ;;  %v1479_v3 = vrot.slane %v2043_v50, 7  ;;  %v1481_v19 = vrot.slane %v2044_v13, 6  ;;  %v1203_v20 = vld [vmem:[%s2349_s30 + $0x5] sm:$0x1]  ;;  %v1280_v4 = vsel %vm197_vm1, %v1279_v7, %v1278_v18  ;;  %v1754_v18 = vpop.permute.xlu0 %1753 }
  0xcb   : > { %v1483_v22 = vrot.slane %v2045_v14, 5  ;;  %v1151_v25 = vld [vmem:[#allocation2] sm:$0xff]  ;;  %v1204_v35 = vld [vmem:[%s2349_s30 + $0x15] sm:$0x1]  ;;  %v1282_v30 = vsel %vm200_vm2, %v1281_v39, %v1280_v4  ;;  %v2039_v52 = vld [vmem:[%s2349_s30 + $0x96] sm:$0x1] }
  0xcc   : > { %2154 = vtanh.f32 %v1196_v63  ;;  %v1205_v51 = vld [vmem:[%s2349_s30 + $0x25] sm:$0x1]  ;;  %v1480_v49 = vsel %vm194_vm0, %v1479_v3, %v2042_v11  ;;  %1174 = vmatpush.msrb.mxu0 %v1151_v25  ;;  %v1206_v26 = vld [vmem:[%s2349_s30 + $0x35] sm:$0x1]  ;;  %v1211_v28 = vrot.slane %v1204_v35, 7  ;;  %v390_v61 = vrot.slane %v3029_v45, 4  ;;  %v1502_v63 = vpop.permute.xlu1 %1501 }
  0xcd   : > { %v1213_v29 = vrot.slane %v1205_v51, 6  ;;  %v2012_v31 = vld [vmem:[%s2349_s30 + $0x45] sm:$0x1]  ;;  %1284 = vst.msk [vmem:[#allocation2 + $0x10] sm:$0xf] %vm203_vm3, %v1282_v30  ;;  %v1215_v33 = vrot.slane %v1206_v26, 5  ;;  %2011 = vmatmul.msk.f32.vlgmr.msrb.gmra.mxu0 %vm352_vm5, %v2817_v8  ;;  %v1482_v2 = vsel %vm197_vm1, %v1481_v19, %v1480_v49 }
  0xce   : > { %v2013_v34 = vld [vmem:[%s2349_s30 + $0x55] sm:$0x1]  ;;  %v1212_v5 = vsel %vm194_vm0, %v1211_v28, %v1203_v20  ;;  %v2014_v38 = vld [vmem:[%s2349_s30 + $0x65] sm:$0x1]  ;;  %v2038_v47 = vld [vmem:[%s2349_s30 + $0x86] sm:$0x1]  ;;  %v1484_v56 = vsel %vm200_vm2, %v1483_v22, %v1482_v2 }
  0xcf   : > { %v1354_v16 = vld [vmem:[#allocation2 + $0x8] sm:$0xff]  ;;  %v2015_v54 = vld [vmem:[%s2349_s30 + $0x75] sm:$0x1]  ;;  %v1227_v44 = vrot.slane %v2013_v34, 7  ;;  %v1214_v36 = vsel %vm197_vm1, %v1213_v29, %v1212_v5  ;;  %v1229_v59 = vrot.slane %v2014_v38, 6 }
  0xd0   : > { %v1356_v58 = vld [vmem:[#allocation2 + $0x18] sm:$0xff]  ;;  %v1231_v9 = vrot.slane %v2015_v54, 5  ;;  %v1216_v40 = vsel %vm200_vm2, %v1215_v33, %v1214_v36  ;;  %v2040_v62 = vld [vmem:[%s2349_s30 + $0xa6] sm:$0x1]  ;;  %v2041_v10 = vld [vmem:[%s2349_s30 + $0xb6] sm:$0x1] }
  0xd1   : > { %1373 = vmatpush.msrb.mxu1 %v1356_v58  ;;  %1520 = vst.msk [vmem:[#allocation2 + $0x18] sm:$0xf] %vm203_vm3, %v1518_v57  ;;  %v1394_v12 = vmax.f32 %v1356_v58, %v1392_v43  ;;  %v1228_v37 = vsel %vm194_vm0, %v1227_v44, %v2012_v31  ;;  %v1463_v43 = vrot.slane %v2039_v52, 7  ;;  %v1465_v27 = vrot.slane %v2040_v62, 6  ;;  %v1405_v60 = vld [vmem:[%s2349_s30 + $0x6] sm:$0x1] }
  0xd2   : > { %v2155_v24 = vpop.eup %2154  ;;  %1536 = vst.msk [vmem:[#allocation2 + $0x1c] sm:$0xf] %vm203_vm3, %v1534_v32  ;;  %v1230_v55 = vsel %vm197_vm1, %v1229_v59, %v1228_v37  ;;  %v1467_v48 = vrot.slane %v2041_v10, 5  ;;  %v1406_v1 = vld [vmem:[%s2349_s30 + $0x16] sm:$0x1]  ;;  %v385_v57 = vmax.f32 %v2738_v17, %v383_v41 }
  0xd3   : > { %1199 = vrot.lane.b32.xlu0 %v2155_v24, %s2265_s18  ;;  %1218 = vst.msk [vmem:[#allocation2] sm:$0xf] %vm203_vm3, %v1216_v40  ;;  %v1232_v46 = vsel %vm200_vm2, %v1231_v9, %v1230_v55  ;;  %v1464_v0 = vsel %vm194_vm0, %v1463_v43, %v2038_v47  ;;  %v1407_v23 = vld [vmem:[%s2349_s30 + $0x26] sm:$0x1]  ;;  %v1408_v6 = vld [vmem:[%s2349_s30 + $0x36] sm:$0x1] }
  0xd4   : > { %1454 = vst.msk [vmem:[#allocation2 + $0x8] sm:$0xf] %vm203_vm3, %v1452_v42  ;;  %v1355_v53 = vld [vmem:[#allocation2 + $0x10] sm:$0xff]  ;;  %v1466_v21 = vsel %vm197_vm1, %v1465_v27, %v1464_v0  ;;  %v1413_v7 = vrot.slane %v1406_v1, 7  ;;  %v1415_v39 = vrot.slane %v1407_v23, 6  ;;  %v1396_v11 = vrot.slane %v1394_v12, 4  ;;  %v1704_v52 = vpop.permute.xlu1 %1703 }
  0xd5   : > { %1234 = vst.msk [vmem:[#allocation2 + $0x4] sm:$0xf] %vm203_vm3, %v1232_v46  ;;  %1374 = vmatpush.msrb.mxu1 %v1355_v53  ;;  %v1468_v50 = vsel %vm200_vm2, %v1467_v48, %v1466_v21  ;;  %v1417_v13 = vrot.slane %v1408_v6, 5  ;;  %v2034_v14 = vld [vmem:[%s2349_s30 + $0x46] sm:$0x1]  ;;  %v1389_v15 = vrot.slane %v1355_v53, 4  ;;  %v392_v38 = vmax.f32 %v385_v57, %v390_v61  ;;  %v1654_v46 = vpop.permute.xlu2 %1653 }
  0xd6   : > { %1486 = vst.msk [vmem:[#allocation2 + $0x10] sm:$0xf] %vm203_vm3, %v1484_v56  ;;  %v1414_v3 = vsel %vm194_vm0, %v1413_v7, %v1405_v60  ;;  %v2035_v19 = vld [vmem:[%s2349_s30 + $0x56] sm:$0x1]  ;;  %v2036_v20 = vld [vmem:[%s2349_s30 + $0x66] sm:$0x1] }
  0xd7   : > { %1504 = vst.msk [vmem:[#allocation2 + $0x14] sm:$0xf] %vm203_vm3, %v1502_v63  ;;  %1375 = vmatpush.msrb.mxu1 %v1354_v16  ;;  %v1416_v4 = vsel %vm197_vm1, %v1415_v39, %v1414_v3  ;;  %v2037_v22 = vld [vmem:[%s2349_s30 + $0x76] sm:$0x1]  ;;  %v1429_v25 = vrot.slane %v2035_v19, 7  ;;  %v1431_v35 = vrot.slane %v2036_v20, 6  ;;  %v1391_v51 = vmax.f32 %v1355_v53, %v1389_v15 }
  0xd8   : > { %1470 = vst.msk [vmem:[#allocation2 + $0xc] sm:$0xf] %vm203_vm3, %v1468_v50  ;;  %v1418_v30 = vsel %vm200_vm2, %v1417_v13, %v1416_v4  ;;  %v1433_v49 = vrot.slane %v2037_v22, 5  ;;  %v1559_v26 = vld [vmem:[#allocation2 + $0x20] sm:$0xf] }
  0xd9   : > { %v1558_v28 = vld [vmem:[#allocation2 + $0x18] sm:$0xff]  ;;  %v1707_v29 = vld [vmem:[%s2349_s30 + $0x8] sm:$0x1]  ;;  %v1430_v17 = vsel %vm194_vm0, %v1429_v25, %v2034_v14  ;;  %2054 = vmatpush.msk.msrb.mxu2 %vm356_vm4, %v1559_v26  ;;  %v1594_v41 = vrot.slane %v1559_v26, 4  ;;  %1756 = vst.msk [vmem:[#allocation2 + $0x20] sm:$0xf] %vm203_vm3, %v1754_v18  ;;  %v1398_v32 = vmax.f32 %v1391_v51, %v1396_v11 }
  0xda   : > { %v1708_v31 = vld [vmem:[%s2349_s30 + $0x18] sm:$0x1]  ;;  %v1432_v34 = vsel %vm197_vm1, %v1431_v35, %v1430_v17  ;;  %v1709_v16 = vld [vmem:[%s2349_s30 + $0x28] sm:$0x1]  ;;  %v2064_v27 = vld [vmem:[%s2349_s30 + $0xc7] sm:$0x1] }
  0xdb   : > { %v1710_v58 = vld [vmem:[%s2349_s30 + $0x38] sm:$0x1]  ;;  %v1715_v5 = vrot.slane %v1708_v31, 7  ;;  %v1434_v54 = vsel %vm200_vm2, %v1433_v49, %v1432_v34  ;;  %1575 = vmatpush.msrb.mxu2 %v1558_v28  ;;  %v1596_v44 = vmax.f32 %v1558_v28, %v1594_v41  ;;  %v1717_v45 = vrot.slane %v1709_v16, 6  ;;  %v2072_v2 = vld [vmem:[%s2349_s30 + $0x48] sm:$0x1] }
  0xdc   : > { %v1353_v33 = vld [vmem:[#allocation2] sm:$0xff]  ;;  %v1719_v24 = vrot.slane %v1710_v58, 5  ;;  %v2073_v36 = vld [vmem:[%s2349_s30 + $0x58] sm:$0x1]  ;;  %v2074_v59 = vld [vmem:[%s2349_s30 + $0x68] sm:$0x1]  ;;  %2156 = vtanh.f32 %v1398_v32 }
  0xdd   : > { %1376 = vmatpush.msrb.mxu1 %v1353_v33  ;;  %1420 = vst.msk [vmem:[#allocation2] sm:$0xf] %vm203_vm3, %v1418_v30  ;;  %v1716_v42 = vsel %vm194_vm0, %v1715_v5, %v1707_v29  ;;  %v1598_v9 = vrot.slane %v1596_v44, 4  ;;  %v2075_v12 = vld [vmem:[%s2349_s30 + $0x78] sm:$0x1]  ;;  %v1731_v40 = vrot.slane %v2073_v36, 7  ;;  %2158 = vtanh.f32 %v392_v38 }
  0xde   : > { %1436 = vst.msk [vmem:[#allocation2 + $0x4] sm:$0xf] %vm203_vm3, %v1434_v54  ;;  %2033 = vmatmul.msk.f32.vlgmr.msrb.gmra.mxu1 %vm352_vm5, %v2817_v8  ;;  %v1718_v47 = vsel %vm197_vm1, %v1717_v45, %v1716_v42  ;;  %v1733_v37 = vrot.slane %v2074_v59, 6  ;;  %v1557_v62 = vld [vmem:[#allocation2 + $0x10] sm:$0xff]  ;;  %v1735_v10 = vrot.slane %v2075_v12, 5 }
  0xdf   : > { %v1720_v55 = vsel %vm200_vm2, %v1719_v24, %v1718_v47  ;;  %1576 = vmatpush.msrb.mxu2 %v1557_v62  ;;  %v1591_v43 = vrot.slane %v1557_v62, 4  ;;  %v2065_v56 = vld [vmem:[%s2349_s30 + $0xd7] sm:$0x1]  ;;  %v1732_v48 = vsel %vm194_vm0, %v1731_v40, %v2072_v2  ;;  %v2066_v60 = vld [vmem:[%s2349_s30 + $0xe7] sm:$0x1]  ;;  %v1556_v53 = vld [vmem:[#allocation2 + $0x8] sm:$0xff] }
  0xe0   : > { %1722 = vst.msk [vmem:[#allocation2 + $0x18] sm:$0xf] %vm203_vm3, %v1720_v55  ;;  %v2067_v61 = vld [vmem:[%s2349_s30 + $0xf7] sm:$0x1]  ;;  %v1734_v63 = vsel %vm197_vm1, %v1733_v37, %v1732_v48  ;;  %v1681_v1 = vrot.slane %v2065_v56, 7  ;;  %v1683_v23 = vrot.slane %v2066_v60, 6 }
  0xe1   : > { %v1593_v0 = vmax.f32 %v1557_v62, %v1591_v43  ;;  %1706 = vst.msk [vmem:[#allocation2 + $0x14] sm:$0xf] %vm203_vm3, %v1704_v52  ;;  %v1736_v21 = vsel %vm200_vm2, %v1735_v10, %v1734_v63  ;;  %v1685_v6 = vrot.slane %v2067_v61, 5  ;;  %1577 = vmatpush.msrb.mxu2 %v1556_v53  ;;  %v2060_v7 = vld [vmem:[%s2349_s30 + $0x87] sm:$0x1] }
  0xe2   : > { %1656 = vst.msk [vmem:[#allocation2 + $0x8] sm:$0xf] %vm203_vm3, %v1654_v46  ;;  %v2157_v39 = vpop.eup %2156  ;;  %v1682_v50 = vsel %vm194_vm0, %v1681_v1, %v2064_v27  ;;  %v2061_v13 = vld [vmem:[%s2349_s30 + $0x97] sm:$0x1]  ;;  %v2062_v14 = vld [vmem:[%s2349_s30 + $0xa7] sm:$0x1] }
  0xe3   : > { %1738 = vst.msk [vmem:[#allocation2 + $0x1c] sm:$0xf] %vm203_vm3, %v1736_v21  ;;  %v3104_v11 = vmax.f32 %v1593_v0, %v1598_v9  ;;  %v1684_v15 = vsel %vm197_vm1, %v1683_v23, %v1682_v50  ;;  %v2063_v18 = vld [vmem:[%s2349_s30 + $0xb7] sm:$0x1]  ;;  %v1665_v3 = vrot.slane %v2061_v13, 7  ;;  %v1667_v19 = vrot.slane %v2062_v14, 6  ;;  %1401 = vrot.lane.b32.xlu2 %v2157_v39, %s2266_s21  ;;  %v2159_v35 = vpop.eup %2158 }
  0xe4   : > { %v1686_v57 = vsel %vm200_vm2, %v1685_v6, %v1684_v15  ;;  %v1669_v4 = vrot.slane %v2063_v18, 5  ;;  %v1607_v22 = vld [vmem:[%s2349_s30 + $0x7] sm:$0x1]  ;;  %v1608_v25 = vld [vmem:[%s2349_s30 + $0x17] sm:$0x1] }
  0xe5   : > { %v1555_v20 = vld [vmem:[#allocation2] sm:$0xff]  ;;  %1688 = vst.msk [vmem:[#allocation2 + $0x10] sm:$0xf] %vm203_vm3, %v1686_v57  ;;  %v1666_v51 = vsel %vm194_vm0, %v1665_v3, %v2060_v7  ;;  %v1610_v49 = vld [vmem:[%s2349_s30 + $0x37] sm:$0x1]  ;;  %v1615_v28 = vrot.slane %v1608_v25, 7 }
  0xe6   : > { %1578 = vmatpush.msrb.mxu2 %v1555_v20  ;;  %v1609_v30 = vld [vmem:[%s2349_s30 + $0x27] sm:$0x1]  ;;  %v1668_v26 = vsel %vm197_vm1, %v1667_v19, %v1666_v51  ;;  %v1619_v17 = vrot.slane %v1610_v49, 5  ;;  %v2057_v32 = vld [vmem:[%s2349_s30 + $0x57] sm:$0x1] }
  0xe7   : > { %2055 = vmatmul.msk.f32.vlgmr.msrb.gmra.mxu2 %vm352_vm5, %v2817_v8  ;;  %v1617_v29 = vrot.slane %v1609_v30, 6  ;;  %v2056_v41 = vld [vmem:[%s2349_s30 + $0x47] sm:$0x1]  ;;  %v1670_v31 = vsel %vm200_vm2, %v1669_v4, %v1668_v26  ;;  %v2059_v34 = vld [vmem:[%s2349_s30 + $0x77] sm:$0x1]  ;;  %v1616_v16 = vsel %vm194_vm0, %v1615_v28, %v1607_v22  ;;  %v1631_v58 = vrot.slane %v2057_v32, 7 }
  0xe8   : > { %v2058_v33 = vld [vmem:[%s2349_s30 + $0x67] sm:$0x1]  ;;  %1672 = vst.msk [vmem:[#allocation2 + $0xc] sm:$0xf] %vm203_vm3, %v1670_v31  ;;  %v1635_v38 = vrot.slane %v2059_v34, 5 }
  0xe9   : > { %v1633_v5 = vrot.slane %v2058_v33, 6  ;;  %v1618_v54 = vsel %vm197_vm1, %v1617_v29, %v1616_v16  ;;  %v1761_v44 = vld [vmem:[#allocation2 + $0x20] sm:$0xf]  ;;  %394 = vst.msk [vmem:[%s3132_s26 + $0x4] sm:$0xf] %vm203_vm3, %v2159_v35  ;;  %v1632_v2 = vsel %vm194_vm0, %v1631_v58, %v2056_v41 }
  0xea   : > { %v1760_v45 = vld [vmem:[#allocation2 + $0x18] sm:$0xff]  ;;  %v1620_v24 = vsel %vm200_vm2, %v1619_v17, %v1618_v54  ;;  %2076 = vmatpush.msk.msrb.mxu3 %vm356_vm4, %v1761_v44  ;;  %v1796_v42 = vrot.slane %v1761_v44, 4 }
  0xeb   : > { %1622 = vst.msk [vmem:[#allocation2] sm:$0xf] %vm203_vm3, %v1620_v24  ;;  %v1634_v36 = vsel %vm197_vm1, %v1633_v5, %v1632_v2 }
  0xec   : > { %v1636_v59 = vsel %vm200_vm2, %v1635_v38, %v1634_v36  ;;  %1777 = vmatpush.msrb.mxu3 %v1760_v45  ;;  %v1798_v9 = vmax.f32 %v1760_v45, %v1796_v42  ;;  %v1759_v47 = vld [vmem:[#allocation2 + $0x10] sm:$0xff] }
  0xed   : > { %1638 = vst.msk [vmem:[#allocation2 + $0x4] sm:$0xf] %vm203_vm3, %v1636_v59  ;;  %v1793_v12 = vrot.slane %v1759_v47, 4 }
  0xee   : > { %v1800_v40 = vrot.slane %v1798_v9, 4  ;;  %1778 = vmatpush.msrb.mxu3 %v1759_v47 }
  0xef   : > { %v1795_v37 = vmax.f32 %v1759_v47, %v1793_v12  ;;  %v1758_v52 = vld [vmem:[#allocation2 + $0x8] sm:$0xff] }
  0xf0   : > { %1779 = vmatpush.msrb.mxu3 %v1758_v52 }
  0xf1   : > { %v1802_v62 = vmax.f32 %v1795_v37, %v1800_v40 }
  0xf4   : > { %v1757_v55 = vld [vmem:[#allocation2] sm:$0xff] }
  0xf5   : > { %1780 = vmatpush.msrb.mxu3 %v1757_v55 }
  0xf6   : > { %2077 = vmatmul.msk.f32.vlgmr.msrb.gmra.mxu3 %vm352_vm5, %v2817_v8 }
 0x111   : > { %v594_v10 = vpop.permute.xlu2 %593 }
 0x112   : > { %596 = vst.msk [vmem:[%s3132_s26 + $0x4] sm:$0xf] %vm578_vm6, %v594_v10 }
 0x11a   : > { %v796_v43 = vpop.permute.xlu2 %795 }
 0x11b   : > { %798 = vst.msk [vmem:[%s3132_s26 + $0x4] sm:$0xf] %vm780_vm7, %v796_v43 }
 0x123   : > { %v377_v56 = vpop.f32.mrf.mxu0 }
 0x12a   : > { %v350_v27 = vpop.permute.xlu0 %349 }
 0x12b   : > { %v378_v48 = vadd.f32 %v377_v56, %v350_v27 }
 0x12d   : > { %2160 = vtanh.f32 %v378_v48 }
 0x12e   : > { %v570_v46 = vpop.f32.mrf.mxu1 }
 0x12f   : > { %v571_v60 = vadd.f32 %v570_v46, %v350_v27 }
 0x131   : > { %2162 = vtanh.f32 %v571_v60 }
 0x133   : > { %v2161_v8 = vpop.eup %2160 }
 0x134   : > { %381 = vst.msk [vmem:[%s3132_s26] sm:$0xf] %vm203_vm3, %v2161_v8 }
 0x137   : > { %v2163_v61 = vpop.eup %2162 }
 0x138   : > { %575 = vrot.lane.b32.xlu1 %v2163_v61, %s2261_s7  ;;  %s1825_s7 = sshll.u32 %s1821_s5, 4  ;;  %s1826_s7 = int_to_ptr.hbm [resolvable:$true] %s1825_s7 }
 0x139   : > { %s2194_s9 = sshra.s32 %s1826_s7, 4  ;;  %s2195_s9 = int_to_ptr.hbm [resolvable:$true] %s2194_s9 }
 0x13a   : > { %s2196_s15 = scalar_lea.hbm %s2195_s9, 8  ;;  %p2201_p1 = scmp.lt.s32.totalorder %s2195_s9, %s3219_s3 }
 0x13b   : > { %v998_v63 = vpop.permute.xlu1 %997  ;;  %p2197_p12 = scmp.ne.s32.totalorder %s2195_s9, %s2196_s15 }
 0x13c   : > { %1000 = vst.msk [vmem:[%s3132_s26 + $0x4] sm:$0xf] %vm982_vm8, %v998_v63 }
 0x13d   : > { %v772_v0 = vpop.f32.mrf.mxu2  ;;  %v1402_v18 = vpop.permute.xlu2 %1401  ;;  %p2198_p13 = pnand %p2197_p12, %p2329_p4 }
 0x13e   : > { %v773_v1 = vadd.f32 %v772_v0, %v350_v27 }
 0x13f   : > { %p2199_p0 = pneg %p2198_p13 }
 0x140   : > { %2164 = vtanh.f32 %v773_v1 }
 0x145   : > { %v1200_v23 = vpop.permute.xlu0 %1199 }
 0x146   : > { %1202 = vst.msk [vmem:[%s3132_s26 + $0x4] sm:$0xf] %vm1184_vm9, %v1200_v23  ;;  %v2165_v53 = vpop.eup %2164  ;;  %v974_v21 = vpop.f32.mrf.mxu3 }
 0x147   : > { %v975_v6 = vadd.f32 %v974_v21, %v350_v27  ;;  %777 = vrot.lane.b32.xlu1 %v2165_v53, %s2263_s10  ;;  %1404 = vst.msk [vmem:[%s3132_s26 + $0x4] sm:$0xf] %vm1386_vm10, %v1402_v18 }
 0x149   : > { %2166 = vtanh.f32 %v975_v6 }
 0x14a   : > { %v1176_v7 = vpop.f32.mrf.mxu0 }
 0x14b   : > { %v1177_v39 = vadd.f32 %v1176_v7, %v350_v27 }
 0x14d   : > { %2168 = vtanh.f32 %v1177_v39 }
 0x14f   : > { %v2167_v50 = vpop.eup %2166 }
 0x150   : > { %979 = vrot.lane.b32.xlu0 %v2167_v50, %s2264_s11 }
 0x153   : > { %v2169_v13 = vpop.eup %2168 }
 0x154   : > { %1181 = vrot.lane.b32.xlu2 %v2169_v13, %s2265_s18  ;;  %s2200_s18 = scalar_lea.hbm %s3219_s3, 16 }
 0x155   : > { %p2202_p2 = scmp.lt.s32.totalorder %s2200_s18, %s2196_s15 }
 0x157   : > { %p2203_p3 = por %p2202_p2, %p2201_p1 }
 0x159   : > { %p2204_p5 = pnand %p2203_p3, %p2199_p0 }
 0x15b   : > { %v1378_v14 = vpop.f32.mrf.mxu1 }
 0x15c   : > { %v1379_v15 = vadd.f32 %v1378_v14, %v350_v27 }
 0x15e   : > { %2170 = vtanh.f32 %v1379_v15 }
 0x15f   : > { %2172 = vtanh.f32 %v3104_v11 }
 0x164   : > { %v2171_v3 = vpop.eup %2170 }
 0x165   : > { %1383 = vrot.lane.b32.xlu1 %v2171_v3, %s2266_s21  ;;  %v2173_v57 = vpop.eup %2172 }
 0x16a   : > { %v1580_v19 = vpop.f32.mrf.mxu2 }
 0x16b   : > { %v1581_v20 = vadd.f32 %v1580_v19, %v350_v27 }
 0x16d   : > { %2174 = vtanh.f32 %v1581_v20  ;;  %1603 = vrot.lane.b32.xlu1 %v2173_v57, %s2267_s27 }
 0x16e   : > { %2176 = vtanh.f32 %v1802_v62 }
 0x173   : > { %v2175_v4 = vpop.eup %2174 }
 0x174   : > { %1585 = vrot.lane.b32.xlu0 %v2175_v4, %s2267_s27  ;;  %v2177_v22 = vpop.eup %2176 }
 0x179   : > { %v1782_v25 = vpop.f32.mrf.mxu3 }
 0x17a   : > { %v1783_v35 = vadd.f32 %v1782_v25, %v350_v27 }
 0x17c   : > { %1805 = vrot.lane.b32.xlu0 %v2177_v22, %s2268_s28  ;;  %2178 = vtanh.f32 %v1783_v35 }
 0x182   : > { %v2179_v11 = vpop.eup %2178 }
 0x183   : > { %1787 = vrot.lane.b32.xlu2 %v2179_v11, %s2268_s28 }
 0x1aa   : > { %v576_v51 = vpop.permute.xlu1 %575 }
 0x1ab   : > { %579 = vst.msk [vmem:[%s3132_s26] sm:$0xf] %vm578_vm6, %v576_v51 }
 0x1ae   : > { %v1182_v26 = vpop.permute.xlu2 %1181 }
 0x1b9   : > { %v778_v30 = vpop.permute.xlu1 %777 }
 0x1ba   : > { %781 = vst.msk [vmem:[%s3132_s26] sm:$0xf] %vm780_vm7, %v778_v30 }
 0x1c2   : > { %v980_v49 = vpop.permute.xlu0 %979 }
 0x1c3   : > { %983 = vst.msk [vmem:[%s3132_s26] sm:$0xf] %vm982_vm8, %v980_v49 }
 0x1c4   : > { %1185 = vst.msk [vmem:[%s3132_s26] sm:$0xf] %vm1184_vm9, %v1182_v26 }
 0x1d7   : > { %v1384_v28 = vpop.permute.xlu1 %1383 }
 0x1d8   : > { %1387 = vst.msk [vmem:[%s3132_s26] sm:$0xf] %vm1386_vm10, %v1384_v28 }
 0x1dd   : > { %v1788_v41 = vpop.permute.xlu2 %1787 }
 0x1df   : > { %v1604_v29 = vpop.permute.xlu1 %1603 }
 0x1e0   : > { %1606 = vst.msk [vmem:[%s3132_s26 + $0x4] sm:$0xf] %vm1588_vm11, %v1604_v29 }
 0x1e6   : > { %v1586_v17 = vpop.permute.xlu0 %1585 }
 0x1e7   : > { %1589 = vst.msk [vmem:[%s3132_s26] sm:$0xf] %vm1588_vm11, %v1586_v17 }
 0x1e8   : > { %1791 = vst.msk [vmem:[%s3132_s26] sm:$0xf] %vm1790_vm12, %v1788_v41 }
 0x1ee   : > { %v1806_v31 = vpop.permute.xlu0 %1805 }
 0x1ef   : > { %1808 = vst.msk [vmem:[%s3132_s26 + $0x4] sm:$0xf] %vm1790_vm12, %v1806_v31 }
 0x1f0   : > { %2207 = shalt.err (!%p2204_p5)
}
 0x1f1   : > { %2083 = dma.vmem_to_hbm [thread:$0]  (%p2329_p4), %s1824_s6, 128, %s1826_s7, %s1810_s8  }
 0x1f2 PF: > { %p2089_p6 = scmp.ge.s32.totalorder %s2258_s17, 2  ;;  %s1837_s19 = sand.u32 1, %s2238_s12  }
 0x1f3   : > { %s1838_s26 = scalar_lea.sflag [#allocation4], %s1837_s19 }
 0x1f4   : > { %p2086_p7 = pnand %p2089_p6, %p2336_p8 }
 0x1f6   : > { %p2087_p9 = pneg %p2086_p7 }
 0x1f8   : > { %2233 = dma.done.wait (%p2087_p9), %s1838_s26, 128  }
 0x1f9   : > { %2235 = vsyncadd (%p2087_p9), %s1838_s26, 4294967168  ;;  %s16_s17 = sadd.s32 1, %s2258_s17   ;;  %s3222_s12 = smov %s2242_s13 }
 0x1fa   : > { %p13_p10 = scmp.ge.s32.totalorder %s16_s17, 4   ;;  %s3223_s13 = smov %s2246_s14 }
 0x1fb   : > { %s3224_s14 = smov %s2342_s25  ;;  %s3225_s15 = smov %s2254_s16 }
 0x1fc   : > { %s3226_s16 = smov %s3228_s20  ;;  %15 = sbr.rel (!%p13_p10) target bundleno = 4 (0x4), region = 70 }
 0x201   :  { %1844 = vsyncpa [#allocation4], 1 }
 0x202   :  { %1846 = vsyncpa [#allocation4 + $0x1], 1 }

</bundles_post_ra>
